<compile_context>
chip_gen: v7x
topology: tpu7x:2x2x1
jax: 0.10.0
libtpu: 0.0.40
codegen_flags: <defaults>
</compile_context>

<pallas_src>
import jax
import jax.numpy as jnp
from jax.experimental import pallas as pl
from jax.experimental.pallas import tpu as pltpu

LP = 8  # left pad along W so the padded interior starts sublane-aligned


# ----------------------------- fused Pallas kernel ---------------------------

def bottleneck_kernel(x_ref, w1_ref, w2_ref, w3_ref, b1_ref, b2_ref, b3_ref,
                      o_ref, pad_ref):
    """Fused Bottleneck forward for one NHWC image.

    x_ref   : (1, H, W, Cin)      bf16 activation (also the residual)
    w1_ref  : (Cin, P)            bf16, BN1 scale folded in
    w2_ref  : (9, P, P)           bf16 per-tap 3x3 weights, BN2 scale folded in
    w3_ref  : (P, Cout)           bf16, BN3 scale folded in
    b*_ref  : (1, C)              f32 folded BN biases
    o_ref   : (1, H, W, Cout)     bf16 output
    pad_ref : (H+2, LP+W+1, P)    bf16 VMEM scratch; interior lives at
                                  rows 1..H, cols LP..LP+W-1 (sublane aligned)
    """
    _, H, W, Cin = x_ref.shape
    P = w1_ref.shape[1]
    Cout = w3_ref.shape[1]

    x2d = x_ref[...].reshape(H * W, Cin)                        # bf16 (residual too)

    # ---- conv1 (1x1) + folded BN1 + ReLU -----------------------------------
    h1 = jnp.dot(x2d, w1_ref[...], preferred_element_type=jnp.float32)
    h1 = jnp.maximum(h1 + b1_ref[...], 0.0).astype(jnp.bfloat16)

    # ---- zero only the 1-pixel border the taps read (cheap, megacore-safe) --
    zrow = jnp.zeros((1, W + 2, P), jnp.bfloat16)
    pad_ref[0:1,         LP - 1:LP + W + 1, :] = zrow           # top border row
    pad_ref[H + 1:H + 2, LP - 1:LP + W + 1, :] = zrow           # bottom border row
    zcol = jnp.zeros((H, 1, P), jnp.bfloat16)
    pad_ref[1:H + 1, LP - 1:LP,         :] = zcol               # left border col
    pad_ref[1:H + 1, LP + W:LP + W + 1, :] = zcol               # right border col

    # ---- sublane-aligned interior write of the conv1 output -----------------
    pad_ref[1:H + 1, LP:LP + W, :] = h1.reshape(H, W, P)

    # ---- conv2 (3x3, stride 1, pad 1): 9 accumulated matmuls ----------------
    h2 = None
    for dy in range(3):
        for dx in range(3):
            k = 3 * dy + dx
            tap = pad_ref[dy:dy + H, LP - 1 + dx:LP - 1 + dx + W, :]
            d = jnp.dot(tap.reshape(H * W, P), w2_ref[k],
                        preferred_element_type=jnp.float32)
            h2 = d if h2 is None else h2 + d
    h2 = jnp.maximum(h2 + b2_ref[...], 0.0).astype(jnp.bfloat16)

    # ---- conv3 (1x1) + folded BN3 + residual + ReLU, bf16 store --------------
    h3 = jnp.dot(h2, w3_ref[...], preferred_element_type=jnp.float32)
    out = jnp.maximum(h3 + b3_ref[...] + x2d, 0.0)              # bf16 residual upcasts lazily
    o_ref[...] = out.astype(jnp.bfloat16).reshape(1, H, W, Cout)


# ----------------------------- parameter folding -----------------------------

def fold_params(p, eps=1e-5):
    """Fold inference-mode BN scale into the conv weights (bf16) + f32 biases."""
    def fold(bn):
        s = bn["gamma"] / jnp.sqrt(bn["var"] + eps)
        return s, bn["beta"] - bn["mean"] * s

    s1, b1 = fold(p["bn1"])
    s2, b2 = fold(p["bn2"])
    s3, b3 = fold(p["bn3"])
    P = p["w1"].shape[1]
    w1 = (p["w1"] * s1[None, :]).astype(jnp.bfloat16)                     # (Cin, P)
    w2 = (p["w2"] * s2[None, None, None, :]).astype(jnp.bfloat16)        # (3,3,P,P)
    w2 = w2.reshape(9, P, P)                                              # per-tap layout
    w3 = (p["w3"] * s3[None, :]).astype(jnp.bfloat16)                    # (P, 4P)
    return dict(w1=w1, w2=w2, w3=w3,
                b1=b1.reshape(1, -1), b2=b2.reshape(1, -1), b3=b3.reshape(1, -1))


# ----------------------------- public wrapper --------------------------------

def bottleneck_forward(x_nchw, params):
    """Bottleneck forward.  x_nchw: (N, Cin, H, W) f32 (PyTorch layout).

    Returns NCHW bf16.  When embedding in a network, keep activations NHWC bf16
    end-to-end and drop the transposes around this call.
    """
    f = fold_params(params)
    N, Cin, H, W = x_nchw.shape
    P = f["w1"].shape[1]
    Cout = f["w3"].shape[1]
    assert Cin == Cout, "residual path needs inplanes == 4*planes (downsample not implemented)"
    # TODO(synk): stride>1 / downsample path not implemented.

    x_nhwc = jnp.transpose(x_nchw, (0, 2, 3, 1)).astype(jnp.bfloat16)

    # Explicit VMEM budget: double-buffered activation/out blocks + resident weights
    # + padded scratch, with generous headroom, clamped to stay under v7x's 64 MiB/TC.
    act_blk = H * W * Cin * 2
    out_blk = H * W * Cout * 2
    weights = (Cin * P + 9 * P * P + P * Cout) * 2 + (2 * P + Cout) * 4
    pad_scr = (H + 2) * (LP + W + 1) * P * 2
    est = 2 * act_blk + 2 * out_blk + 2 * weights + pad_scr
    vmem_limit = int(min(max(4 * est, 16 * 2**20), 64 * 2**20))

    out_nhwc = pl.pallas_call(
        bottleneck_kernel,
        out_shape=jax.ShapeDtypeStruct((N, H, W, Cout), jnp.bfloat16),
        grid=(N,),
        in_specs=[
            pl.BlockSpec((1, H, W, Cin), lambda n: (n, 0, 0, 0)),   # activation / residual
            pl.BlockSpec((Cin, P), lambda n: (0, 0)),               # w1 (VMEM-resident)
            pl.BlockSpec((9, P, P), lambda n: (0, 0, 0)),           # w2 (VMEM-resident)
            pl.BlockSpec((P, Cout), lambda n: (0, 0)),              # w3 (VMEM-resident)
            pl.BlockSpec((1, P), lambda n: (0, 0)),                 # b1
            pl.BlockSpec((1, P), lambda n: (0, 0)),                 # b2
            pl.BlockSpec((1, Cout), lambda n: (0, 0)),              # b3
        ],
        out_specs=pl.BlockSpec((1, H, W, Cout), lambda n: (n, 0, 0, 0)),
        scratch_shapes=[
            pltpu.VMEM((H + 2, LP + W + 1, P), jnp.bfloat16),       # padded conv1 output
        ],
        compiler_params=pltpu.CompilerParams(
            dimension_semantics=("parallel",),
            vmem_limit_bytes=vmem_limit),
    )(x_nhwc, f["w1"], f["w2"], f["w3"], f["b1"], f["b2"], f["b3"])

    return jnp.transpose(out_nhwc, (0, 3, 1, 2))                    # NHWC -> NCHW (bf16)


# ----------------------------- pure-JAX reference ----------------------------

def bottleneck_ref(x_nchw, params):
    """Reference with the same bf16 weight/activation/output casts, f32 accumulation."""
    hi = jax.lax.Precision.HIGHEST
    f = fold_params(params)
    x = jnp.transpose(x_nchw, (0, 2, 3, 1)).astype(jnp.bfloat16).astype(jnp.float32)
    N, H, W, _ = x.shape
    P = f["w1"].shape[1]

    h1 = jnp.einsum("nhwc,cp->nhwp", x, f["w1"].astype(jnp.float32), precision=hi)
    h1 = jnp.maximum(h1 + f["b1"], 0.0).astype(jnp.bfloat16)

    hp = jnp.pad(h1, ((0, 0), (1, 1), (1, 1), (0, 0)))
    slab = jnp.concatenate(
        [hp[:, dy:dy + H, dx:dx + W, :] for dy in range(3) for dx in range(3)],
        axis=-1).astype(jnp.float32)                               # (N,H,W,9P)
    w2 = f["w2"].reshape(9 * P, P).astype(jnp.float32)
    h2 = jnp.einsum("nhwk,kp->nhwp", slab, w2, precision=hi)
    h2 = jnp.maximum(h2 + f["b2"], 0.0).astype(jnp.bfloat16).astype(jnp.float32)

    h3 = jnp.einsum("nhwp,pq->nhwq", h2, f["w3"].astype(jnp.float32), precision=hi)
    out = jnp.maximum(h3 + f["b3"] + x, 0.0).astype(jnp.bfloat16)
    return jnp.transpose(out, (0, 3, 1, 2))


# ----------------------------- parameter init --------------------------------

def make_params(inplanes, planes, key):
    ks = jax.random.split(key, 15)

    def bn(kg, kb, km, kv, c):
        return dict(
            gamma=1.0 + 0.1 * jax.random.normal(kg, (c,), jnp.float32),
            beta=0.1 * jax.random.normal(kb, (c,), jnp.float32),
            mean=0.1 * jax.random.normal(km, (c,), jnp.float32),
            var=1.0 + 0.1 * jnp.abs(jax.random.normal(kv, (c,), jnp.float32)))

    w1 = jax.random.normal(ks[0], (inplanes, planes), jnp.float32) / jnp.sqrt(inplanes)
    w2 = jax.random.normal(ks[1], (3, 3, planes, planes), jnp.float32) / jnp.sqrt(9.0 * planes)
    w3 = jax.random.normal(ks[2], (planes, 4 * planes), jnp.float32) / jnp.sqrt(planes)
    return dict(w1=w1, w2=w2, w3=w3,
                bn1=bn(ks[3], ks[4], ks[5], ks[6], planes),
                bn2=bn(ks[7], ks[8], ks[9], ks[10], planes),
                bn3=bn(ks[11], ks[12], ks[13], ks[14], 4 * planes))


# --------------------------------- main ---------------------------------------

if __name__ == "__main__":
    # expansion=4 -> output channels = 4*planes = 128 = inplanes (lane-dense output,
    # residual path valid).  N=2 gives two parallel grid steps (one per v7x TC).
    inplanes, planes = 128, 32
    N, H, W = 2, 16, 16

    key = jax.random.PRNGKey(0)
    kx, kp = jax.random.split(key)
    x = jax.random.normal(kx, (N, inplanes, H, W), jnp.float32)   # NCHW, like PyTorch
    params = make_params(inplanes, planes, kp)

    fwd = jax.jit(bottleneck_forward)
    out = jax.block_until_ready(fwd(x, params))
    ref = jax.block_until_ready(bottleneck_ref(x, params))

    assert out.shape == (N, 4 * planes, H, W), out.shape
    max_diff = float(jnp.max(jnp.abs(out.astype(jnp.float32) - ref.astype(jnp.float32))))
    assert max_diff < 5e-2, f"mismatch vs reference: {max_diff}"

    print("KERNEL_OK")
</pallas_src>

<mosaic_0001>
module attributes {stable_mosaic.version = 11 : i64} {
  func.func @bottleneck_kernel(%arg0: i32, %arg1: memref<1x16x16x128xbf16, #tpu.memory_space<vmem>>, %arg2: memref<128x32xbf16, #tpu.memory_space<vmem>>, %arg3: memref<9x32x32xbf16, #tpu.memory_space<vmem>>, %arg4: memref<32x128xbf16, #tpu.memory_space<vmem>>, %arg5: memref<1x32xf32, #tpu.memory_space<vmem>>, %arg6: memref<1x32xf32, #tpu.memory_space<vmem>>, %arg7: memref<1x128xf32, #tpu.memory_space<vmem>>, %arg8: memref<1x16x16x128xbf16, #tpu.memory_space<vmem>>, %arg9: memref<18x25x32xbf16, #tpu.memory_space<vmem>>) attributes {dimension_semantics = [#tpu.dimension_semantics<parallel>], iteration_bounds = array<i64: 2>, scalar_prefetch = 0 : i64, scratch_operands = 1 : i64, tpu.core_type = #tpu.core_type<tc>, window_params = [{transform_indices = @transform_0, window_bounds = array<i64: 1, 16, 16, 128>}, {pipeline_mode = #tpu.pipeline_mode<synchronous>, transform_indices = @transform_1, window_bounds = array<i64: 128, 32>}, {pipeline_mode = #tpu.pipeline_mode<synchronous>, transform_indices = @transform_2, window_bounds = array<i64: 9, 32, 32>}, {pipeline_mode = #tpu.pipeline_mode<synchronous>, transform_indices = @transform_3, window_bounds = array<i64: 32, 128>}, {pipeline_mode = #tpu.pipeline_mode<synchronous>, transform_indices = @transform_4, window_bounds = array<i64: 1, 32>}, {pipeline_mode = #tpu.pipeline_mode<synchronous>, transform_indices = @transform_5, window_bounds = array<i64: 1, 32>}, {pipeline_mode = #tpu.pipeline_mode<synchronous>, transform_indices = @transform_6, window_bounds = array<i64: 1, 128>}, {transform_indices = @transform_7, window_bounds = array<i64: 1, 16, 16, 128>}]} {
    %c0 = arith.constant 0 : index
    %c0_0 = arith.constant 0 : index
    %c0_1 = arith.constant 0 : index
    %c0_2 = arith.constant 0 : index
    %0 = vector.load %arg1[%c0, %c0_0, %c0_1, %c0_2] : memref<1x16x16x128xbf16, #tpu.memory_space<vmem>>, vector<1x16x16x128xbf16>
    %1 = vector.shape_cast %0 : vector<1x16x16x128xbf16> to vector<256x128xbf16>
    %c0_3 = arith.constant 0 : index
    %c0_4 = arith.constant 0 : index
    %2 = vector.load %arg2[%c0_3, %c0_4] : memref<128x32xbf16, #tpu.memory_space<vmem>>, vector<128x32xbf16>
    %cst = arith.constant dense<0.000000e+00> : vector<256x32xf32>
    %3 = tpu.matmul %1, %2, %cst {dimension_numbers = #tpu.dot_dimension_numbers<[1], [0], [0], [1], [0, 0, 1, 1], [], []>} : vector<256x128xbf16>, vector<128x32xbf16>, vector<256x32xf32> -> vector<256x32xf32>
    %c0_5 = arith.constant 0 : index
    %c0_6 = arith.constant 0 : index
    %4 = vector.load %arg5[%c0_5, %c0_6] : memref<1x32xf32, #tpu.memory_space<vmem>>, vector<1x32xf32>
    %5 = vector.broadcast %4 : vector<1x32xf32> to vector<256x32xf32>
    %6 = arith.addf %3, %5 : vector<256x32xf32>
    %cst_7 = arith.constant 0.000000e+00 : f32
    %7 = vector.broadcast %cst_7 : f32 to vector<256x32xf32>
    %8 = arith.maximumf %6, %7 : vector<256x32xf32>
    %9 = arith.truncf %8 : vector<256x32xf32> to vector<256x32xbf16>
    %cst_8 = arith.constant 0.000000e+00 : bf16
    %10 = vector.broadcast %cst_8 : bf16 to vector<1x18x32xbf16>
    %c0_9 = arith.constant 0 : index
    %c7 = arith.constant 7 : index
    %c0_10 = arith.constant 0 : index
    %11 = vector.load %arg9[%c0_9, %c7, %c0_10] : memref<18x25x32xbf16, #tpu.memory_space<vmem>>, vector<1x18x32xbf16>
    tpu.vector_store %arg9[%c0_9, %c7, %c0_10], %10 {strides = array<i32>} : memref<18x25x32xbf16, #tpu.memory_space<vmem>>, vector<1x18x32xbf16>,
    %c17 = arith.constant 17 : index
    %c7_11 = arith.constant 7 : index
    %c0_12 = arith.constant 0 : index
    %12 = vector.load %arg9[%c17, %c7_11, %c0_12] : memref<18x25x32xbf16, #tpu.memory_space<vmem>>, vector<1x18x32xbf16>
    tpu.vector_store %arg9[%c17, %c7_11, %c0_12], %10 {strides = array<i32>} : memref<18x25x32xbf16, #tpu.memory_space<vmem>>, vector<1x18x32xbf16>,
    %cst_13 = arith.constant 0.000000e+00 : bf16
    %13 = vector.broadcast %cst_13 : bf16 to vector<16x1x32xbf16>
    %c1 = arith.constant 1 : index
    %c7_14 = arith.constant 7 : index
    %c0_15 = arith.constant 0 : index
    %14 = vector.load %arg9[%c1, %c7_14, %c0_15] : memref<18x25x32xbf16, #tpu.memory_space<vmem>>, vector<16x1x32xbf16>
    tpu.vector_store %arg9[%c1, %c7_14, %c0_15], %13 {strides = array<i32>} : memref<18x25x32xbf16, #tpu.memory_space<vmem>>, vector<16x1x32xbf16>,
    %c1_16 = arith.constant 1 : index
    %c24 = arith.constant 24 : index
    %c0_17 = arith.constant 0 : index
    %15 = vector.load %arg9[%c1_16, %c24, %c0_17] : memref<18x25x32xbf16, #tpu.memory_space<vmem>>, vector<16x1x32xbf16>
    tpu.vector_store %arg9[%c1_16, %c24, %c0_17], %13 {strides = array<i32>} : memref<18x25x32xbf16, #tpu.memory_space<vmem>>, vector<16x1x32xbf16>,
    %16 = vector.shape_cast %9 : vector<256x32xbf16> to vector<16x16x32xbf16>
    %c1_18 = arith.constant 1 : index
    %c8 = arith.constant 8 : index
    %c0_19 = arith.constant 0 : index
    %17 = vector.load %arg9[%c1_18, %c8, %c0_19] : memref<18x25x32xbf16, #tpu.memory_space<vmem>>, vector<16x16x32xbf16>
    tpu.vector_store %arg9[%c1_18, %c8, %c0_19], %16 {strides = array<i32>} : memref<18x25x32xbf16, #tpu.memory_space<vmem>>, vector<16x16x32xbf16>,
    %c0_20 = arith.constant 0 : index
    %c7_21 = arith.constant 7 : index
    %c0_22 = arith.constant 0 : index
    %18 = vector.load %arg9[%c0_20, %c7_21, %c0_22] : memref<18x25x32xbf16, #tpu.memory_space<vmem>>, vector<16x16x32xbf16>
    %19 = vector.shape_cast %18 : vector<16x16x32xbf16> to vector<256x32xbf16>
    %c0_23 = arith.constant 0 : index
    %c0_24 = arith.constant 0 : index
    %c0_25 = arith.constant 0 : index
    %20 = vector.load %arg3[%c0_23, %c0_24, %c0_25] : memref<9x32x32xbf16, #tpu.memory_space<vmem>>, vector<1x32x32xbf16>
    %21 = vector.shape_cast %20 : vector<1x32x32xbf16> to vector<32x32xbf16>
    %cst_26 = arith.constant dense<0.000000e+00> : vector<256x32xf32>
    %22 = tpu.matmul %19, %21, %cst_26 {dimension_numbers = #tpu.dot_dimension_numbers<[1], [0], [0], [1], [0, 0, 1, 1], [], []>} : vector<256x32xbf16>, vector<32x32xbf16>, vector<256x32xf32> -> vector<256x32xf32>
    %c0_27 = arith.constant 0 : index
    %c8_28 = arith.constant 8 : index
    %c0_29 = arith.constant 0 : index
    %23 = vector.load %arg9[%c0_27, %c8_28, %c0_29] : memref<18x25x32xbf16, #tpu.memory_space<vmem>>, vector<16x16x32xbf16>
    %24 = vector.shape_cast %23 : vector<16x16x32xbf16> to vector<256x32xbf16>
    %c1_30 = arith.constant 1 : index
    %c0_31 = arith.constant 0 : index
    %c0_32 = arith.constant 0 : index
    %25 = vector.load %arg3[%c1_30, %c0_31, %c0_32] : memref<9x32x32xbf16, #tpu.memory_space<vmem>>, vector<1x32x32xbf16>
    %26 = vector.shape_cast %25 : vector<1x32x32xbf16> to vector<32x32xbf16>
    %cst_33 = arith.constant dense<0.000000e+00> : vector<256x32xf32>
    %27 = tpu.matmul %24, %26, %cst_33 {dimension_numbers = #tpu.dot_dimension_numbers<[1], [0], [0], [1], [0, 0, 1, 1], [], []>} : vector<256x32xbf16>, vector<32x32xbf16>, vector<256x32xf32> -> vector<256x32xf32>
    %28 = arith.addf %22, %27 : vector<256x32xf32>
    %c0_34 = arith.constant 0 : index
    %c9 = arith.constant 9 : index
    %c0_35 = arith.constant 0 : index
    %29 = vector.load %arg9[%c0_34, %c9, %c0_35] : memref<18x25x32xbf16, #tpu.memory_space<vmem>>, vector<16x16x32xbf16>
    %30 = vector.shape_cast %29 : vector<16x16x32xbf16> to vector<256x32xbf16>
    %c2 = arith.constant 2 : index
    %c0_36 = arith.constant 0 : index
    %c0_37 = arith.constant 0 : index
    %31 = vector.load %arg3[%c2, %c0_36, %c0_37] : memref<9x32x32xbf16, #tpu.memory_space<vmem>>, vector<1x32x32xbf16>
    %32 = vector.shape_cast %31 : vector<1x32x32xbf16> to vector<32x32xbf16>
    %cst_38 = arith.constant dense<0.000000e+00> : vector<256x32xf32>
    %33 = tpu.matmul %30, %32, %cst_38 {dimension_numbers = #tpu.dot_dimension_numbers<[1], [0], [0], [1], [0, 0, 1, 1], [], []>} : vector<256x32xbf16>, vector<32x32xbf16>, vector<256x32xf32> -> vector<256x32xf32>
    %34 = arith.addf %28, %33 : vector<256x32xf32>
    %c1_39 = arith.constant 1 : index
    %c7_40 = arith.constant 7 : index
    %c0_41 = arith.constant 0 : index
    %35 = vector.load %arg9[%c1_39, %c7_40, %c0_41] : memref<18x25x32xbf16, #tpu.memory_space<vmem>>, vector<16x16x32xbf16>
    %36 = vector.shape_cast %35 : vector<16x16x32xbf16> to vector<256x32xbf16>
    %c3 = arith.constant 3 : index
    %c0_42 = arith.constant 0 : index
    %c0_43 = arith.constant 0 : index
    %37 = vector.load %arg3[%c3, %c0_42, %c0_43] : memref<9x32x32xbf16, #tpu.memory_space<vmem>>, vector<1x32x32xbf16>
    %38 = vector.shape_cast %37 : vector<1x32x32xbf16> to vector<32x32xbf16>
    %cst_44 = arith.constant dense<0.000000e+00> : vector<256x32xf32>
    %39 = tpu.matmul %36, %38, %cst_44 {dimension_numbers = #tpu.dot_dimension_numbers<[1], [0], [0], [1], [0, 0, 1, 1], [], []>} : vector<256x32xbf16>, vector<32x32xbf16>, vector<256x32xf32> -> vector<256x32xf32>
    %40 = arith.addf %34, %39 : vector<256x32xf32>
    %c1_45 = arith.constant 1 : index
    %c8_46 = arith.constant 8 : index
    %c0_47 = arith.constant 0 : index
    %41 = vector.load %arg9[%c1_45, %c8_46, %c0_47] : memref<18x25x32xbf16, #tpu.memory_space<vmem>>, vector<16x16x32xbf16>
    %42 = vector.shape_cast %41 : vector<16x16x32xbf16> to vector<256x32xbf16>
    %c4 = arith.constant 4 : index
    %c0_48 = arith.constant 0 : index
    %c0_49 = arith.constant 0 : index
    %43 = vector.load %arg3[%c4, %c0_48, %c0_49] : memref<9x32x32xbf16, #tpu.memory_space<vmem>>, vector<1x32x32xbf16>
    %44 = vector.shape_cast %43 : vector<1x32x32xbf16> to vector<32x32xbf16>
    %cst_50 = arith.constant dense<0.000000e+00> : vector<256x32xf32>
    %45 = tpu.matmul %42, %44, %cst_50 {dimension_numbers = #tpu.dot_dimension_numbers<[1], [0], [0], [1], [0, 0, 1, 1], [], []>} : vector<256x32xbf16>, vector<32x32xbf16>, vector<256x32xf32> -> vector<256x32xf32>
    %46 = arith.addf %40, %45 : vector<256x32xf32>
    %c1_51 = arith.constant 1 : index
    %c9_52 = arith.constant 9 : index
    %c0_53 = arith.constant 0 : index
    %47 = vector.load %arg9[%c1_51, %c9_52, %c0_53] : memref<18x25x32xbf16, #tpu.memory_space<vmem>>, vector<16x16x32xbf16>
    %48 = vector.shape_cast %47 : vector<16x16x32xbf16> to vector<256x32xbf16>
    %c5 = arith.constant 5 : index
    %c0_54 = arith.constant 0 : index
    %c0_55 = arith.constant 0 : index
    %49 = vector.load %arg3[%c5, %c0_54, %c0_55] : memref<9x32x32xbf16, #tpu.memory_space<vmem>>, vector<1x32x32xbf16>
    %50 = vector.shape_cast %49 : vector<1x32x32xbf16> to vector<32x32xbf16>
    %cst_56 = arith.constant dense<0.000000e+00> : vector<256x32xf32>
    %51 = tpu.matmul %48, %50, %cst_56 {dimension_numbers = #tpu.dot_dimension_numbers<[1], [0], [0], [1], [0, 0, 1, 1], [], []>} : vector<256x32xbf16>, vector<32x32xbf16>, vector<256x32xf32> -> vector<256x32xf32>
    %52 = arith.addf %46, %51 : vector<256x32xf32>
    %c2_57 = arith.constant 2 : index
    %c7_58 = arith.constant 7 : index
    %c0_59 = arith.constant 0 : index
    %53 = vector.load %arg9[%c2_57, %c7_58, %c0_59] : memref<18x25x32xbf16, #tpu.memory_space<vmem>>, vector<16x16x32xbf16>
    %54 = vector.shape_cast %53 : vector<16x16x32xbf16> to vector<256x32xbf16>
    %c6 = arith.constant 6 : index
    %c0_60 = arith.constant 0 : index
    %c0_61 = arith.constant 0 : index
    %55 = vector.load %arg3[%c6, %c0_60, %c0_61] : memref<9x32x32xbf16, #tpu.memory_space<vmem>>, vector<1x32x32xbf16>
    %56 = vector.shape_cast %55 : vector<1x32x32xbf16> to vector<32x32xbf16>
    %cst_62 = arith.constant dense<0.000000e+00> : vector<256x32xf32>
    %57 = tpu.matmul %54, %56, %cst_62 {dimension_numbers = #tpu.dot_dimension_numbers<[1], [0], [0], [1], [0, 0, 1, 1], [], []>} : vector<256x32xbf16>, vector<32x32xbf16>, vector<256x32xf32> -> vector<256x32xf32>
    %58 = arith.addf %52, %57 : vector<256x32xf32>
    %c2_63 = arith.constant 2 : index
    %c8_64 = arith.constant 8 : index
    %c0_65 = arith.constant 0 : index
    %59 = vector.load %arg9[%c2_63, %c8_64, %c0_65] : memref<18x25x32xbf16, #tpu.memory_space<vmem>>, vector<16x16x32xbf16>
    %60 = vector.shape_cast %59 : vector<16x16x32xbf16> to vector<256x32xbf16>
    %c7_66 = arith.constant 7 : index
    %c0_67 = arith.constant 0 : index
    %c0_68 = arith.constant 0 : index
    %61 = vector.load %arg3[%c7_66, %c0_67, %c0_68] : memref<9x32x32xbf16, #tpu.memory_space<vmem>>, vector<1x32x32xbf16>
    %62 = vector.shape_cast %61 : vector<1x32x32xbf16> to vector<32x32xbf16>
    %cst_69 = arith.constant dense<0.000000e+00> : vector<256x32xf32>
    %63 = tpu.matmul %60, %62, %cst_69 {dimension_numbers = #tpu.dot_dimension_numbers<[1], [0], [0], [1], [0, 0, 1, 1], [], []>} : vector<256x32xbf16>, vector<32x32xbf16>, vector<256x32xf32> -> vector<256x32xf32>
    %64 = arith.addf %58, %63 : vector<256x32xf32>
    %c2_70 = arith.constant 2 : index
    %c9_71 = arith.constant 9 : index
    %c0_72 = arith.constant 0 : index
    %65 = vector.load %arg9[%c2_70, %c9_71, %c0_72] : memref<18x25x32xbf16, #tpu.memory_space<vmem>>, vector<16x16x32xbf16>
    %66 = vector.shape_cast %65 : vector<16x16x32xbf16> to vector<256x32xbf16>
    %c8_73 = arith.constant 8 : index
    %c0_74 = arith.constant 0 : index
    %c0_75 = arith.constant 0 : index
    %67 = vector.load %arg3[%c8_73, %c0_74, %c0_75] : memref<9x32x32xbf16, #tpu.memory_space<vmem>>, vector<1x32x32xbf16>
    %68 = vector.shape_cast %67 : vector<1x32x32xbf16> to vector<32x32xbf16>
    %cst_76 = arith.constant dense<0.000000e+00> : vector<256x32xf32>
    %69 = tpu.matmul %66, %68, %cst_76 {dimension_numbers = #tpu.dot_dimension_numbers<[1], [0], [0], [1], [0, 0, 1, 1], [], []>} : vector<256x32xbf16>, vector<32x32xbf16>, vector<256x32xf32> -> vector<256x32xf32>
    %70 = arith.addf %64, %69 : vector<256x32xf32>
    %c0_77 = arith.constant 0 : index
    %c0_78 = arith.constant 0 : index
    %71 = vector.load %arg6[%c0_77, %c0_78] : memref<1x32xf32, #tpu.memory_space<vmem>>, vector<1x32xf32>
    %72 = vector.broadcast %71 : vector<1x32xf32> to vector<256x32xf32>
    %73 = arith.addf %70, %72 : vector<256x32xf32>
    %cst_79 = arith.constant 0.000000e+00 : f32
    %74 = vector.broadcast %cst_79 : f32 to vector<256x32xf32>
    %75 = arith.maximumf %73, %74 : vector<256x32xf32>
    %76 = arith.truncf %75 : vector<256x32xf32> to vector<256x32xbf16>
    %c0_80 = arith.constant 0 : index
    %c0_81 = arith.constant 0 : index
    %77 = vector.load %arg4[%c0_80, %c0_81] : memref<32x128xbf16, #tpu.memory_space<vmem>>, vector<32x128xbf16>
    %cst_82 = arith.constant dense<0.000000e+00> : vector<256x128xf32>
    %78 = tpu.matmul %76, %77, %cst_82 {dimension_numbers = #tpu.dot_dimension_numbers<[1], [0], [0], [1], [0, 0, 1, 1], [], []>} : vector<256x32xbf16>, vector<32x128xbf16>, vector<256x128xf32> -> vector<256x128xf32>
    %c0_83 = arith.constant 0 : index
    %c0_84 = arith.constant 0 : index
    %79 = vector.load %arg7[%c0_83, %c0_84] : memref<1x128xf32, #tpu.memory_space<vmem>>, vector<1x128xf32>
    %80 = vector.broadcast %79 : vector<1x128xf32> to vector<256x128xf32>
    %81 = arith.addf %78, %80 : vector<256x128xf32>
    %82 = arith.extf %1 : vector<256x128xbf16> to vector<256x128xf32>
    %83 = arith.addf %81, %82 : vector<256x128xf32>
    %cst_85 = arith.constant 0.000000e+00 : f32
    %84 = vector.broadcast %cst_85 : f32 to vector<256x128xf32>
    %85 = arith.maximumf %83, %84 : vector<256x128xf32>
    %86 = arith.truncf %85 : vector<256x128xf32> to vector<256x128xbf16>
    %87 = vector.shape_cast %86 : vector<256x128xbf16> to vector<1x16x16x128xbf16>
    %c0_86 = arith.constant 0 : index
    %c0_87 = arith.constant 0 : index
    %c0_88 = arith.constant 0 : index
    %c0_89 = arith.constant 0 : index
    %88 = vector.load %arg8[%c0_86, %c0_87, %c0_88, %c0_89] : memref<1x16x16x128xbf16, #tpu.memory_space<vmem>>, vector<1x16x16x128xbf16>
    tpu.vector_store %arg8[%c0_86, %c0_87, %c0_88, %c0_89], %87 {strides = array<i32>} : memref<1x16x16x128xbf16, #tpu.memory_space<vmem>>, vector<1x16x16x128xbf16>,
    return
  }
  func.func @transform_0(%arg0: i32) -> (i32, i32, i32, i32) {
    %c0_i32 = arith.constant 0 : i32
    %c0_i32_0 = arith.constant 0 : i32
    %c0_i32_1 = arith.constant 0 : i32
    %c0_i32_2 = arith.constant 0 : i32
    return %arg0, %c0_i32, %c0_i32_0, %c0_i32_1 : i32, i32, i32, i32
  }
  func.func @transform_1(%arg0: i32) -> (i32, i32) {
    %c0_i32 = arith.constant 0 : i32
    %c0_i32_0 = arith.constant 0 : i32
    %c0_i32_1 = arith.constant 0 : i32
    return %c0_i32, %c0_i32_0 : i32, i32
  }
  func.func @transform_2(%arg0: i32) -> (i32, i32, i32) {
    %c0_i32 = arith.constant 0 : i32
    %c0_i32_0 = arith.constant 0 : i32
    %c0_i32_1 = arith.constant 0 : i32
    %c0_i32_2 = arith.constant 0 : i32
    return %c0_i32, %c0_i32_0, %c0_i32_1 : i32, i32, i32
  }
  func.func @transform_3(%arg0: i32) -> (i32, i32) {
    %c0_i32 = arith.constant 0 : i32
    %c0_i32_0 = arith.constant 0 : i32
    %c0_i32_1 = arith.constant 0 : i32
    return %c0_i32, %c0_i32_0 : i32, i32
  }
  func.func @transform_4(%arg0: i32) -> (i32, i32) {
    %c0_i32 = arith.constant 0 : i32
    %c0_i32_0 = arith.constant 0 : i32
    %c0_i32_1 = arith.constant 0 : i32
    return %c0_i32, %c0_i32_0 : i32, i32
  }
  func.func @transform_5(%arg0: i32) -> (i32, i32) {
    %c0_i32 = arith.constant 0 : i32
    %c0_i32_0 = arith.constant 0 : i32
    %c0_i32_1 = arith.constant 0 : i32
    return %c0_i32, %c0_i32_0 : i32, i32
  }
  func.func @transform_6(%arg0: i32) -> (i32, i32) {
    %c0_i32 = arith.constant 0 : i32
    %c0_i32_0 = arith.constant 0 : i32
    %c0_i32_1 = arith.constant 0 : i32
    return %c0_i32, %c0_i32_0 : i32, i32
  }
  func.func @transform_7(%arg0: i32) -> (i32, i32, i32, i32) {
    %c0_i32 = arith.constant 0 : i32
    %c0_i32_0 = arith.constant 0 : i32
    %c0_i32_1 = arith.constant 0 : i32
    %c0_i32_2 = arith.constant 0 : i32
    return %arg0, %c0_i32, %c0_i32_0, %c0_i32_1 : i32, i32, i32, i32
  }
}

</mosaic_0001>

<bundles_post_ra>
// kernel: bottleneck_forward.1
= control target key start
LH: loop header
LB: loop body
LE: loop exit
PB: predicated region body
PF: predicated region fallthrough
CT: control target
= control target key end

     0   :  { %12 = vsyncpa [#allocation4], 0  ;;  %s10742_s0 = inlined_call_operand.vmem [shape: bf16[2,16,16,128], index: 0, kind: input, shape index: {}]   ;;  %s10743_s1 = inlined_call_operand.vmem [shape: bf16[128,32], index: 1, kind: input, shape index: {}]   ;;  %s10744_s2 = inlined_call_operand.vmem [shape: bf16[9,32,32], index: 2, kind: input, shape index: {}]   ;;  %s10745_s3 = inlined_call_operand.vmem [shape: bf16[32,128], index: 3, kind: input, shape index: {}]   ;;  %s10746_s4 = inlined_call_operand.vmem [shape: f32[1,32], index: 4, kind: input, shape index: {}]   ;;  %s10747_s5 = inlined_call_operand.vmem [shape: f32[1,32], index: 5, kind: input, shape index: {}]   ;;  %s10748_s6 = inlined_call_operand.vmem [shape: f32[1,128], index: 6, kind: input, shape index: {}]   ;;  %s10749_s7 = inlined_call_operand.hbm [shape: bf16[2,16,16,128], index: 7, kind: output, shape index: {}]  }
   0x1   :  { %14 = vsyncpa [#allocation4 + $0x1], 0  ;;  %s8703_s24 = smov 0   ;;  %s8705_s25 = smov 0  }
   0x2   :  { %s8707_s26 = smov 0   ;;  %s8709_s27 = smov 0  }
   0x3 LB: > { %s8724_s28 = sadd.s32 4294967295, %s8657_s27   ;;  %s6890_s29 = sadd.s32 4294967294, %s8657_s27   ;;  %s8657_s27 = sphi %s8709_s27, %s11013_s27   ;;  %s8653_s26 = sphi %s8707_s26, %s11012_s26   ;;  %s8649_s25 = sphi %s8705_s25, %s11011_s25   ;;  %s8645_s24 = sphi %s8703_s24, %s11010_s24  }
   0x4   : > { %s8728_s30 = sadd.s32 1, %s8657_s27   ;;  %s179_s8 = sadd.s32 1, %s8653_s26 }
   0x5   : > { %s176_s9 = ssub.s32 %s8657_s27, %s8728_s30  ;;  %p189_p0 = scmp.ne.s32.totalorder %s8653_s26, %s8649_s25 }
   0x6   : > { %p177_p1 = scmp.eq.s32.totalorder %s176_s9, 0  ;;  %p190_p2 = scmp.eq.s32.totalorder %s8724_s28, 1 }
   0x7   : > { %p195_p3 = scmp.ne.s32.totalorder %s8649_s25, %s8645_s24  ;;  %p196_p4 = scmp.eq.s32.totalorder %s6890_s29, 1 }
   0x8   : > { %s8739_s10 = scalar_select %p177_p1, %s8653_s26, %s179_s8  }
   0x9   : > { %p8741_p5 = por %p190_p2, %p189_p0  ;;  %p8745_p6 = por %p196_p4, %p195_p3 }
   0xa   : > { %p6893_p7 = scmp.ge.s32.totalorder %s8657_s27, 1  ;;  %p240_p8 = scmp.lt.s32.totalorder %s8657_s27, 3 }
   0xc   : > { %p241_p9 = pnand %p6893_p7, %p240_p8 }
   0xe   : > { %244 = sbr.rel (%p241_p9) target bundleno = 1212 (0x4bc), region = 48 }
  0x15   : > { %v8472_v0 = vld [vmem:[%s10743_s1] sm:$0xff]   ;;  %p272_p10 = scmp.lt.s32.totalorder %s8724_s28, 1  ;;  %v8473_v1 = vld [vmem:[%s10743_s1 + $0x8] sm:$0xff]   ;;  %v8474_v2 = vld [vmem:[%s10743_s1 + $0x10] sm:$0xff]   ;;  %vm692_vm0 = vcmask 257024   ;;  %v8659_v24 = vmov 0  }
  0x16   : > { %7762 = vmatprep.subr.bf16.mxu0 %v8472_v0  ;;  %v8475_v3 = vld [vmem:[%s10743_s1 + $0x18] sm:$0xff]   ;;  %v8476_v5 = vld [vmem:[%s10743_s1 + $0x20] sm:$0xff]   ;;  %v8477_v6 = vld [vmem:[%s10743_s1 + $0x28] sm:$0xff]   ;;  %693 = vst.msk [vmem:[#allocation2 + $0x4] sm:$0xf] %vm692_vm0, %v8659_v24  ;;  %vm1454_vm1 = vcmask 261120  }
  0x17   : > { %s273_s17 = scalar_select %p272_p10, %s8724_s28, 1  ;;  %7763 = vmatpush3.bf16.msra.mxu0 %v8472_v0  ;;  %v8478_v7 = vld [vmem:[%s10743_s1 + $0x30] sm:$0xff]   ;;  %v8479_v8 = vld [vmem:[%s10743_s1 + $0x38] sm:$0xff]   ;;  %694 = vst.msk [vmem:[#allocation2 + $0x8] sm:$0xf] %vm692_vm0, %v8659_v24  ;;  %vm686_vm2 = vcmask 257027  }
  0x18   : > { %7764 = vmatprep.subr.bf16.mxu0 %v8473_v1  ;;  %705 = vst.msk [vmem:[#allocation2 + $0x114] sm:$0xf] %vm692_vm0, %v8659_v24  ;;  %706 = vst.msk [vmem:[#allocation2 + $0x118] sm:$0xf] %vm692_vm0, %v8659_v24  ;;  %v8496_v25 = vld [vmem:[%s10744_s2 + $0x10] sm:$0xff]   ;;  %v8497_v26 = vld [vmem:[%s10744_s2 + $0x18] sm:$0xff]  }
  0x19   : > { %s7397_s20 = sshll.u32 %s273_s17, 7  ;;  %vm687_vm3 = vsmask.f32 7950  ;;  %v10819_v30 = vmov 0  ;;  %v723_v31 = vld [vmem:[#allocation2 + $0x50] sm:$0x8] }
  0x1a   : > { %s8765_s23 = scalar_lea.vmem %s10742_s0, %s7397_s20  ;;  %vm8815_vm4 = vmand %vm686_vm2, %vm687_vm3  ;;  %v726_v33 = vld [vmem:[#allocation2 + $0x60] sm:$0x8]  ;;  %v711_v36 = vld [vmem:[#allocation2 + $0x10] sm:$0x8]  ;;  %vm696_vm5 = vsmask.f32 256 }
  0x1b   : > { %7765 = vmatpush3.bf16.msra.mxu0 %v8473_v1  ;;  %v278_v4 = vld [vmem:[%s8765_s23] sm:$0xff]   ;;  %v280_v9 = vld [vmem:[%s8765_s23 + $0x8] sm:$0xff]   ;;  %v282_v10 = vld [vmem:[%s8765_s23 + $0x10] sm:$0xff]   ;;  %v10820_v30 = vsel %vm8815_vm4, 4294967295, %v10819_v30  ;;  %v724_v32 = vsel %vm8815_vm4, 0, %v723_v31  ;;  %v727_v34 = vsel %vm8815_vm4, 0, %v726_v33 }
  0x1c   : > { %7766 = vmatprep.subr.bf16.mxu0 %v8474_v2  ;;  %7778 = vmatprep.mubr.bf16.mxu0 %v278_v4  ;;  %v284_v11 = vld [vmem:[%s8765_s23 + $0x18] sm:$0xff]   ;;  %v286_v12 = vld [vmem:[%s8765_s23 + $0x20] sm:$0xff]   ;;  %v288_v13 = vld [vmem:[%s8765_s23 + $0x28] sm:$0xff]   ;;  %10821 = vst [vmem:[#allocation6_spill] sm:$0xff] %v10820_v30  ;;  %v712_v38 = vsel %vm8815_vm4, 0, %v711_v36  ;;  %vm695_vm7 = vcmask 253952  }
  0x1d   : > { %v290_v14 = vld [vmem:[%s8765_s23 + $0x30] sm:$0xff]   ;;  %v292_v15 = vld [vmem:[%s8765_s23 + $0x38] sm:$0xff]   ;;  %v294_v16 = vld [vmem:[%s8765_s23 + $0x40] sm:$0xff]   ;;  %725 = vst [vmem:[#allocation2 + $0x50] sm:$0x8] %v724_v32  ;;  %s269_s20 = sand.u32 1, %s8649_s25  }
  0x1e   : > { %v296_v17 = vld [vmem:[%s8765_s23 + $0x48] sm:$0xff]   ;;  %v298_v18 = vld [vmem:[%s8765_s23 + $0x50] sm:$0xff]   ;;  %v300_v19 = vld [vmem:[%s8765_s23 + $0x58] sm:$0xff]   ;;  %728 = vst [vmem:[#allocation2 + $0x60] sm:$0x8] %v727_v34  ;;  %s6894_s21 = sshll.u32 %s269_s20, 7 }
  0x1f   : > { %7767 = vmatpush3.bf16.msra.mxu0 %v8474_v2  ;;  %v302_v20 = vld [vmem:[%s8765_s23 + $0x60] sm:$0xff]   ;;  %v304_v21 = vld [vmem:[%s8765_s23 + $0x68] sm:$0xff]   ;;  %v306_v22 = vld [vmem:[%s8765_s23 + $0x70] sm:$0xff]   ;;  %713 = vst [vmem:[#allocation2 + $0x10] sm:$0x8] %v712_v38  ;;  %s10634_s22 = scalar_lea.vmem [#allocation3], %s6894_s21 }
  0x20   : > { %7768 = vmatprep.subr.bf16.mxu0 %v8475_v3  ;;  %v308_v23 = vld [vmem:[%s8765_s23 + $0x78] sm:$0xff]   ;;  %v8808_v27 = vld [vmem:[#allocation2 + $0x4] sm:$0xf]  ;;  %v8810_v28 = vld [vmem:[#allocation2 + $0x8] sm:$0xf]  ;;  %s6828_s29 = sshll.u32 %s10634_s22, 4  ;;  %s10695_s29 = int_to_ptr.vmem [resolvable:$true] %s6828_s29 }
  0x21   : > { %v6974_v29 = vcombine.low %v8808_v27, %v8810_v28  ;;  %v714_v35 = vld [vmem:[#allocation2 + $0x20] sm:$0x8]  ;;  %v8503_v39 = vld [vmem:[%s10744_s2 + $0x30] sm:$0xff]   ;;  %v8506_v40 = vld [vmem:[%s10744_s2 + $0x38] sm:$0xff]   ;;  %v1007_v59 = vshrl.u32 %v8808_v27, 16  ;;  %v1016_v60 = vshrl.u32 %v8810_v28, 16 }
  0x22   : > { %v715_v37 = vsel %vm8815_vm4, 0, %v714_v35  ;;  %8170 = vmatprep.subr.bf16.mxu1 %v8503_v39  ;;  %v732_v41 = vld [vmem:[#allocation2 + $0x80] sm:$0x8]  ;;  %v729_v42 = vld [vmem:[#allocation2 + $0x70] sm:$0x8]  ;;  %v1019_v4 = vshll.u32 %v8810_v28, 16  ;;  %vm8870_vm8 = vmand %vm695_vm7, %vm696_vm5 }
  0x23   : > { %7769 = vmatpush3.bf16.msra.mxu0 %v8475_v3  ;;  %716 = vst [vmem:[#allocation2 + $0x20] sm:$0x8] %v715_v37  ;;  %8172 = vmatpush3.bf16.msra.mxu1 %v8503_v39  ;;  %v733_v43 = vsel %vm8815_vm4, 0, %v732_v41  ;;  %v730_v44 = vsel %vm8815_vm4, 0, %v729_v42  ;;  %v8840_v45 = vld [vmem:[%s10744_s2 + $0x40] sm:$0xff]   ;;  %v1009_v2 = vrot.slane %v1007_v59, 7 }
  0x24   : > { %7770 = vmatprep.subr.bf16.mxu0 %v8476_v5  ;;  %8171 = vmatprep.subr.bf16.mxu1 %v8506_v40  ;;  %734 = vst [vmem:[#allocation2 + $0x80] sm:$0x8] %v733_v43  ;;  %731 = vst [vmem:[#allocation2 + $0x70] sm:$0x8] %v730_v44  ;;  %v738_v46 = vld [vmem:[#allocation2 + $0xa0] sm:$0x8] }
  0x25   : > { %v735_v47 = vld [vmem:[#allocation2 + $0x90] sm:$0x8]  ;;  %v739_v48 = vsel %vm8815_vm4, 0, %v738_v46  ;;  %v744_v50 = vld [vmem:[#allocation2 + $0xc0] sm:$0x8]  ;;  %v1018_v3 = vrot.slane %v1016_v60, 7 }
  0x26   : > { %v736_v49 = vsel %vm8815_vm4, 0, %v735_v47  ;;  %740 = vst [vmem:[#allocation2 + $0xa0] sm:$0x8] %v739_v48  ;;  %v741_v51 = vld [vmem:[#allocation2 + $0xb0] sm:$0x8]  ;;  %v745_v52 = vsel %vm8815_vm4, 0, %v744_v50 }
  0x27   : > { %7771 = vmatpush3.bf16.msra.mxu0 %v8476_v5  ;;  %8173 = vmatpush3.bf16.msra.mxu1 %v8506_v40  ;;  %737 = vst [vmem:[#allocation2 + $0x90] sm:$0x8] %v736_v49  ;;  %v742_v53 = vsel %vm8815_vm4, 0, %v741_v51  ;;  %746 = vst [vmem:[#allocation2 + $0xc0] sm:$0x8] %v745_v52  ;;  %v8867_v5 = vld [vmem:[%s10744_s2] sm:$0xff]  }
  0x28   : > { %7772 = vmatprep.subr.bf16.mxu0 %v8477_v6  ;;  %7954 = vmatprep.subr.bf16.mxu1 %v8840_v45  ;;  %743 = vst [vmem:[#allocation2 + $0xb0] sm:$0x8] %v742_v53  ;;  %v750_v54 = vld [vmem:[#allocation2 + $0xe0] sm:$0x8]  ;;  %v747_v55 = vld [vmem:[#allocation2 + $0xd0] sm:$0x8] }
  0x29   : > { %v751_v56 = vsel %vm8815_vm4, 0, %v750_v54  ;;  %v748_v57 = vsel %vm8815_vm4, 0, %v747_v55  ;;  %v756_v58 = vld [vmem:[#allocation2 + $0x100] sm:$0x8]  ;;  %v753_v61 = vld [vmem:[#allocation2 + $0xf0] sm:$0x8] }
  0x2a   : > { %752 = vst [vmem:[#allocation2 + $0xe0] sm:$0x8] %v751_v56  ;;  %749 = vst [vmem:[#allocation2 + $0xd0] sm:$0x8] %v748_v57  ;;  %v757_v62 = vsel %vm8815_vm4, 0, %v756_v58  ;;  %v754_v63 = vsel %vm8815_vm4, 0, %v753_v61 }
  0x2b   : > { %7773 = vmatpush3.bf16.msra.mxu0 %v8477_v6  ;;  %758 = vst [vmem:[#allocation2 + $0x100] sm:$0x8] %v757_v62  ;;  %v689_v0 = vld [vmem:[#allocation2] sm:$0x8]  ;;  %755 = vst [vmem:[#allocation2 + $0xf0] sm:$0x8] %v754_v63 }
  0x2c   : > { %7774 = vmatprep.subr.bf16.mxu0 %v8478_v7  ;;  %v690_v1 = vsel %vm8815_vm4, 0, %v689_v0  ;;  %vm999_vm6 = vsmask.f32 4368  ;;  %v10822_v6 = vmov 0  ;;  %v2686_v24 = vld [vmem:[#allocation2 + $0x50] sm:$0x8] }
  0x2d   : > { %691 = vst [vmem:[#allocation2] sm:$0x8] %v690_v1  ;;  %v10823_v6 = vsel %vm8870_vm8, 4294967295, %v10822_v6  ;;  %vm8875_vm9 = vmor %vm696_vm5, %vm999_vm6  ;;  %v2692_v28 = vld [vmem:[#allocation2 + $0x70] sm:$0x8]  ;;  %v2811_v32 = vshrl.u32 %v2686_v24, 16 }
  0x2e   : > { %10824 = vst [vmem:[#allocation7_spill] sm:$0xff] %v10823_v6  ;;  %v2701_v31 = vld [vmem:[#allocation2 + $0xa0] sm:$0x8]  ;;  %v2698_v33 = vld [vmem:[#allocation2 + $0x90] sm:$0x8]  ;;  %v2855_v39 = vshrl.u32 %v2692_v28, 16 }
  0x2f   : > { %7775 = vmatpush3.bf16.msra.mxu0 %v8478_v7  ;;  %v1010_v7 = vshll.u32 %v8808_v27, 16  ;;  %v957_v27 = vld [vmem:[#allocation2 + $0x20] sm:$0x8]  ;;  %v2704_v36 = vld [vmem:[#allocation2 + $0xb0] sm:$0x8]  ;;  %v2921_v41 = vshrl.u32 %v2701_v31, 16 }
  0x30   : > { %7776 = vmatprep.subr.bf16.mxu0 %v8479_v8  ;;  %v2707_v34 = vld [vmem:[#allocation2 + $0xc0] sm:$0x8]  ;;  %v1046_v38 = vshrl.u32 %v957_v27, 16  ;;  %v2899_v43 = vshrl.u32 %v2698_v33, 16  ;;  %v8894_v46 = vld [vmem:[%s10746_s4] ss:$0 sm:$0xff] }
  0x31   : > { %v2713_v37 = vld [vmem:[#allocation2 + $0xe0] sm:$0x8]  ;;  %v2965_v44 = vshrl.u32 %v2707_v34, 16  ;;  %v2943_v47 = vshrl.u32 %v2704_v36, 16  ;;  %v8896_v49 = vrot.slane %v2811_v32, 11  ;;  %v8902_v53 = vrot.slane %v2855_v39, 11 }
  0x32   : > { %v3009_v48 = vshrl.u32 %v2713_v37, 16  ;;  %v2710_v51 = vld [vmem:[#allocation2 + $0xd0] sm:$0x8]  ;;  %v8900_v52 = vrot.slane %v1046_v38, 11  ;;  %v8906_v55 = vrot.slane %v2921_v41, 11  ;;  %v8910_v58 = vrot.slane %v2899_v43, 11 }
  0x33   : > { %7777 = vmatpush3.bf16.msra.mxu0 %v8479_v8  ;;  %v1014_v8 = vrot.slane %v1009_v2, 4  ;;  %v2719_v57 = vld [vmem:[#allocation2 + $0x100] sm:$0x8]  ;;  %v8912_v59 = vrot.slane %v2965_v44, 11  ;;  %v2716_v60 = vld [vmem:[#allocation2 + $0xf0] sm:$0x8] }
  0x34   : > { %7810 = vmatprep.subr.bf16.mxu0 %v8496_v25  ;;  %v762_v61 = vld [vmem:[#allocation2 + $0x2c] sm:$0x1]  ;;  %v8914_v63 = vrot.slane %v2943_v47, 11  ;;  %v2987_v0 = vshrl.u32 %v2710_v51, 16  ;;  %v8916_v1 = vrot.slane %v3009_v48, 11  ;;  %s8595_s14 = scalar_lea.vmem %s10695_s29, 2048 }
  0x35   : > { %v978_v31 = vld [vmem:[#allocation2 + $0x90] sm:$0x8]  ;;  %v981_v36 = vld [vmem:[#allocation2 + $0xa0] sm:$0x8]  ;;  %vm1981_vm10 = vsmask.f32 3328  ;;  %p8596_p11 = scmp.ne.s32.totalorder %s10695_s29, %s8595_s14 }
  0x36   : > { %7779 = vmatmul.mubr.bf16.vlgmr.msra.gmra.mrb[0].mxu0 %v280_v9  ;;  %v1021_v9 = vor.u32 %v1019_v4, %v1018_v3  ;;  %v8925_v38 = vrot.slane %v2987_v0, 11  ;;  %v1200_v48 = vshrl.u32 %v978_v31, 16  ;;  %vm1982_vm11 = vsmask.f32 7440  ;;  %s8660_s15 = smov [#allocation3]  }
  0x37   : > { %7782 = vmatprep.mubr.bf16.mxu0 %v282_v10  ;;  %7811 = vmatpush3.bf16.msra.mxu0 %v8496_v25  ;;  %v759_v10 = vld [vmem:[#allocation2 + $0x1c] sm:$0x1]  ;;  %v2689_v25 = vld [vmem:[#allocation2 + $0x60] sm:$0x8]  ;;  %vm9741_vm12 = vmor %vm1981_vm10, %vm1982_vm11  ;;  %p8597_p12 = pnand %p8596_p11, %p8741_p5  ;;  %s8599_s16 = sshll.u32 %s8660_s15, 4  ;;  %s8600_s16 = int_to_ptr.vmem [resolvable:$false] %s8599_s16 }
  0x38   : > { %7812 = vmatprep.subr.bf16.mxu0 %v8497_v26  ;;  %v2833_v35 = vshrl.u32 %v2689_v25, 16  ;;  %s8601_s17 = scalar_lea.vmem %s8600_s16, 4096  ;;  %p8602_p0 = scmp.lt.s32.totalorder %s10695_s29, %s8600_s16 }
  0x39   : > { %p8598_p13 = pneg %p8597_p12  ;;  %p8603_p1 = scmp.lt.s32.totalorder %s8601_s17, %s8595_s14 }
  0x3a   : > { %v8898_v50 = vrot.slane %v2833_v35, 11 }
  0x3b   : > { %7813 = vmatpush3.bf16.msra.mxu0 %v8497_v26  ;;  %v954_v26 = vld [vmem:[#allocation2 + $0x10] sm:$0x8]  ;;  %p8604_p2 = por %p8603_p1, %p8602_p0 }
  0x3c   : > { %7846 = vmatprep.subr.bf16.mxu0 %v8867_v5  ;;  %v1024_v42 = vshrl.u32 %v954_v26, 16 }
  0x3d   : > { %p8605_p3 = pnand %p8604_p2, %p8598_p13 }
  0x3e   : > { %7783 = vmatmul.mubr.bf16.gmra.mrb[4].mxu0 %v284_v11  ;;  %v8908_v56 = vrot.slane %v1024_v42, 11  ;;  %v8558_v11 = vld [vmem:[%s10745_s3] sm:$0xff]  }
  0x3f   : > { %7786 = vmatprep.mubr.bf16.mxu0 %v286_v12  ;;  %v717_v12 = vld [vmem:[#allocation2 + $0x30] sm:$0x8] }
  0x46   : > { %7787 = vmatmul.mubr.bf16.gmra.mrb[8].mxu0 %v288_v13  ;;  %v760_v13 = vsel %vm8870_vm8, 0, %v759_v10 }
  0x47   : > { %7790 = vmatprep.mubr.bf16.mxu0 %v290_v14  ;;  %v1022_v14 = vsel %vm8875_vm9, %v1014_v8, %v1021_v9  ;;  %761 = vst [vmem:[#allocation2 + $0x1c] sm:$0x1] %v760_v13  ;;  %v3031_v13 = vshrl.u32 %v2716_v60, 16 }
  0x49   : > { %v8927_v39 = vrot.slane %v3031_v13, 11 }
  0x4e   : > { %7791 = vmatmul.mubr.bf16.gmra.mrb[12].mxu0 %v292_v15  ;;  %v718_v15 = vsel %vm8815_vm4, 0, %v717_v12  ;;  %v1938_v41 = vld [vmem:[#allocation2 + $0x1c] sm:$0x1] }
  0x4f   : > { %7794 = vmatprep.mubr.bf16.mxu0 %v294_v16  ;;  %v951_v16 = vld [vmem:[#allocation2] sm:$0x8]  ;;  %719 = vst [vmem:[#allocation2 + $0x30] sm:$0x8] %v718_v15 }
  0x50   : > { %v969_v15 = vld [vmem:[#allocation2 + $0x60] sm:$0x8] }
  0x56   : > { %7795 = vmatmul.mubr.bf16.gmra.mrb[16].mxu0 %v296_v17  ;;  %v720_v17 = vld [vmem:[#allocation2 + $0x40] sm:$0x8]  ;;  %v960_v8 = vld [vmem:[#allocation2 + $0x30] sm:$0x8] }
  0x57   : > { %7798 = vmatprep.mubr.bf16.mxu0 %v298_v18  ;;  %v1002_v18 = vshrl.u32 %v951_v16, 16  ;;  %v1068_v24 = vshrl.u32 %v960_v8, 16 }
  0x59   : > { %v8932_v44 = vrot.slane %v1068_v24, 11 }
  0x5e   : > { %7799 = vmatmul.mubr.bf16.gmra.mrb[20].mxu0 %v300_v19  ;;  %v1012_v19 = vor.u32 %v1010_v7, %v1009_v2  ;;  %v763_v2 = vsel %vm8870_vm8, 0, %v762_v61  ;;  %v3053_v7 = vshrl.u32 %v2719_v57, 16 }
  0x5f   : > { %7802 = vmatprep.mubr.bf16.mxu0 %v302_v20  ;;  %v721_v20 = vsel %vm8815_vm4, 0, %v720_v17  ;;  %764 = vst [vmem:[#allocation2 + $0x2c] sm:$0x1] %v763_v2 }
  0x60   : > { %722 = vst [vmem:[#allocation2 + $0x40] sm:$0x8] %v721_v20  ;;  %v975_v20 = vld [vmem:[#allocation2 + $0x80] sm:$0x8] }
  0x61   : > { %v1178_v35 = vshrl.u32 %v975_v20, 16 }
  0x66   : > { %7803 = vmatmul.mubr.bf16.gmra.mrb[24].mxu0 %v304_v21  ;;  %v6954_v21 = vrot.slane %v1002_v18, 11  ;;  %v8949_v13 = vld [vmem:[#allocation2 + $0x2c] sm:$0x1] }
  0x67   : > { %7806 = vmatprep.mubr.bf16.mxu0 %v306_v22  ;;  %v963_v9 = vld [vmem:[#allocation2 + $0x40] sm:$0x8]  ;;  %10830 = vst [vmem:[#allocation11_spill] sm:$0xff] %v8949_v13 }
  0x68   : > { %v1013_v22 = vsel %vm8875_vm9, %v6954_v21, %v1012_v19  ;;  %v972_v19 = vld [vmem:[#allocation2 + $0x70] sm:$0x8]  ;;  %v1090_v25 = vshrl.u32 %v963_v9, 16 }
  0x69   : > { %v1156_v34 = vshrl.u32 %v972_v19, 16 }
  0x6a   : > { %v8934_v47 = vrot.slane %v1090_v25, 11 }
  0x6e   : > { %7807 = vmatmul.mubr.bf16.gmra.mrb[28].mxu0 %v308_v23  ;;  %v8889_v23 = vcombine.low %v1013_v22, %v1022_v14  ;;  %v966_v14 = vld [vmem:[#allocation2 + $0x50] sm:$0x8] }
  0x6f   : > { %7814 = vmatprep.mubr.msk.bf16.mxu0 %vm1454_vm1, %v6974_v29  ;;  %v2695_v29 = vld [vmem:[#allocation2 + $0x80] sm:$0x8]  ;;  %v1112_v28 = vshrl.u32 %v966_v14, 16 }
  0x70   : > { %v2877_v40 = vshrl.u32 %v2695_v29, 16  ;;  %v1134_v29 = vshrl.u32 %v969_v15, 16 }
  0x71   : > { %v8938_v60 = vrot.slane %v1112_v28, 11 }
  0x72   : > { %v8904_v54 = vrot.slane %v2877_v40, 11  ;;  %v8929_v40 = vrot.slane %v3053_v7, 11  ;;  %v8940_v61 = vrot.slane %v1134_v29, 11  ;;  %v2028_v7 = vshll.u32 %v1938_v41, 16 }
  0x74   : > { %10827 = vst [vmem:[#allocation8_spill] sm:$0xff] %v8940_v61 }
 0x109   : > { %v7780_v62 = vpop.f32.mrb[0].mxu0 }
 0x10a   : > { %v520_v3 = vadd.f32 %v7780_v62, %v8894_v46  ;;  %v511_v4 = vpop.f32.mrb[1].mxu0  ;;  %v1222_v62 = vshrl.u32 %v981_v36, 16 }
 0x10b   : > { %v512_v10 = vadd.f32 %v8894_v46, %v511_v4  ;;  %v7781_v12 = vpop.f32.mrb[2].mxu0  ;;  %v8946_v4 = vrot.slane %v1178_v35, 11 }
 0x10c   : > { %v640_v16 = vmax.f32 %v520_v3, 0.0  ;;  %v523_v17 = vadd.f32 %v7781_v12, %v8894_v46  ;;  %v514_v18 = vpop.f32.mrb[3].mxu0  ;;  %v8944_v3 = vrot.slane %v1156_v34, 11  ;;  %v984_v12 = vld [vmem:[#allocation2 + $0xb0] sm:$0x8]  ;;  %v8954_v20 = vrot.slane %v1222_v62, 11 }
 0x10d   : > { %v638_v21 = vmax.f32 %v512_v10, 0.0  ;;  %v515_v22 = vadd.f32 %v8894_v46, %v514_v18  ;;  %10829 = vst [vmem:[#allocation10_spill] sm:$0xff] %v8946_v4 }
 0x10e   : > { %v7400_v26 = vpack.c.bf16 %v640_v16, %v640_v16  ;;  %v641_v27 = vmax.f32 %v523_v17, 0.0  ;;  %10828 = vst [vmem:[#allocation9_spill] sm:$0xff] %v8944_v3  ;;  %v8952_v16 = vrot.slane %v1200_v48, 11  ;;  %v1244_v17 = vshrl.u32 %v984_v12, 16  ;;  %10832 = vst [vmem:[#allocation13_spill] sm:$0xff] %v8954_v20 }
 0x10f   : > { %v7398_v32 = vpack.c.bf16 %v638_v21, %v638_v21  ;;  %v639_v33 = vmax.f32 %v515_v22, 0.0  ;;  %v8956_v21 = vrot.slane %v2028_v7, 5 }
 0x110   : > { %921 = vst.msk [vmem:[#allocation2 + $0x24] sm:$0xf] %vm692_vm0, %v7400_v26  ;;  %v7401_v37 = vpack.c.bf16 %v641_v27, %v641_v27  ;;  %10831 = vst [vmem:[#allocation12_spill] sm:$0xff] %v8952_v16  ;;  %v8958_v26 = vrot.slane %v1244_v17, 11 }
 0x111   : > { %919 = vst.msk [vmem:[#allocation2 + $0x14] sm:$0xf] %vm692_vm0, %v7398_v32  ;;  %v7399_v42 = vpack.c.bf16 %v639_v33, %v639_v33  ;;  %v7784_v43 = vpop.f32.mrb[4].mxu0  ;;  %10833 = vst [vmem:[#allocation14_spill] sm:$0xff] %v8956_v21 }
 0x112   : > { %922 = vst.msk [vmem:[#allocation2 + $0x28] sm:$0xf] %vm692_vm0, %v7401_v37  ;;  %v536_v51 = vadd.f32 %v7784_v43, %v8894_v46  ;;  %v527_v57 = vpop.f32.mrb[5].mxu0  ;;  %10834 = vst [vmem:[#allocation15_spill] sm:$0xff] %v8958_v26 }
 0x113   : > { %920 = vst.msk [vmem:[#allocation2 + $0x18] sm:$0xf] %vm692_vm0, %v7399_v42  ;;  %v528_v0 = vadd.f32 %v8894_v46, %v527_v57  ;;  %v7785_v2 = vpop.f32.mrb[6].mxu0 }
 0x114   : > { %v644_v8 = vmax.f32 %v536_v51, 0.0  ;;  %v539_v9 = vadd.f32 %v7785_v2, %v8894_v46  ;;  %v530_v10 = vpop.f32.mrb[7].mxu0 }
 0x115   : > { %v642_v14 = vmax.f32 %v528_v0, 0.0  ;;  %v531_v15 = vadd.f32 %v8894_v46, %v530_v10 }
 0x116   : > { %v7404_v18 = vpack.c.bf16 %v644_v8, %v644_v8  ;;  %v645_v19 = vmax.f32 %v539_v9, 0.0 }
 0x117   : > { %v7402_v22 = vpack.c.bf16 %v642_v14, %v642_v14  ;;  %v643_v24 = vmax.f32 %v531_v15, 0.0  ;;  %v958_v25 = vld [vmem:[#allocation2 + $0x24] sm:$0xf] }
 0x118   : > { %925 = vst.msk [vmem:[#allocation2 + $0x44] sm:$0xf] %vm692_vm0, %v7404_v18  ;;  %v7405_v28 = vpack.c.bf16 %v645_v19, %v645_v19  ;;  %v955_v29 = vld [vmem:[#allocation2 + $0x14] sm:$0xf]  ;;  %v1051_v31 = vshrl.u32 %v958_v25, 16  ;;  %v1054_v32 = vshll.u32 %v958_v25, 16 }
 0x119   : > { %v8962_v33 = vld [vmem:[#allocation2 + $0x14] sm:$0xf]  ;;  %923 = vst.msk [vmem:[#allocation2 + $0x34] sm:$0xf] %vm692_vm0, %v7402_v22  ;;  %v7403_v34 = vpack.c.bf16 %v643_v24, %v643_v24  ;;  %v7788_v35 = vpop.f32.mrb[8].mxu0  ;;  %v1029_v36 = vshrl.u32 %v955_v29, 16 }
 0x11a   : > { %v1032_v37 = vshll.u32 %v955_v29, 16  ;;  %v8965_v41 = vld [vmem:[#allocation2 + $0x28] sm:$0xf]  ;;  %926 = vst.msk [vmem:[#allocation2 + $0x48] sm:$0xf] %vm692_vm0, %v7405_v28  ;;  %v552_v43 = vadd.f32 %v7788_v35, %v8894_v46  ;;  %v543_v48 = vpop.f32.mrb[9].mxu0 }
 0x11b   : > { %v956_v51 = vld [vmem:[#allocation2 + $0x18] sm:$0xf]  ;;  %v8970_v57 = vrot.slane %v1051_v31, 7  ;;  %v1060_v62 = vshrl.u32 %v8965_v41, 16  ;;  %v1063_v0 = vshll.u32 %v8965_v41, 16  ;;  %v544_v2 = vadd.f32 %v8894_v46, %v543_v48  ;;  %v7789_v7 = vpop.f32.mrb[10].mxu0 }
 0x11c   : > { %924 = vst.msk [vmem:[#allocation2 + $0x38] sm:$0xf] %vm692_vm0, %v7403_v34  ;;  %v1031_v8 = vrot.slane %v1029_v36, 7  ;;  %v1038_v9 = vshrl.u32 %v956_v51, 16  ;;  %v1041_v10 = vshll.u32 %v956_v51, 16  ;;  %v648_v12 = vmax.f32 %v552_v43, 0.0 }
 0x11d   : > { %v555_v14 = vadd.f32 %v7789_v7, %v8894_v46  ;;  %v546_v15 = vpop.f32.mrb[11].mxu0  ;;  %v6975_v17 = vcombine.low %v955_v29, %v956_v51  ;;  %v8977_v18 = vrot.slane %v1060_v62, 7  ;;  %v8519_v19 = vld [vmem:[%s10744_s2 + $0x8] sm:$0xff]   ;;  %v646_v22 = vmax.f32 %v544_v2, 0.0 }
 0x11e   : > { %v547_v24 = vadd.f32 %v8894_v46, %v546_v15  ;;  %v1040_v28 = vrot.slane %v1038_v9, 7  ;;  %v6976_v31 = vcombine.low %v958_v25, %v8965_v41  ;;  %v7408_v34 = vpack.c.bf16 %v648_v12, %v648_v12 }
 0x11f   : > { %v649_v35 = vmax.f32 %v555_v14, 0.0  ;;  %7815 = vmatmul.mubr.msk.bf16.vlgmr.msra.gmra.mrb[32].mxu0 %vm1454_vm1, %v6975_v17  ;;  %v1034_v36 = vor.u32 %v1032_v37, %v1031_v8  ;;  %v1036_v43 = vrot.slane %v1031_v8, 4  ;;  %v7406_v48 = vpack.c.bf16 %v646_v22, %v646_v22  ;;  %v8986_v51 = vld [vmem:[#allocation2 + $0x44] sm:$0xf] }
 0x120   : > { %v647_v29 = vmax.f32 %v547_v24, 0.0  ;;  %7818 = vmatprep.mubr.msk.bf16.mxu0 %vm1454_vm1, %v6976_v31  ;;  %7847 = vmatpush3.bf16.msra.mxu0 %v8867_v5  ;;  %v1043_v62 = vor.u32 %v1041_v10, %v1040_v28  ;;  %v8990_v2 = vor.u32 %v1054_v32, %v8970_v57  ;;  %929 = vst.msk [vmem:[#allocation2 + $0x64] sm:$0xf] %vm692_vm0, %v7408_v34  ;;  %v8993_v7 = vld [vmem:[#allocation2 + $0x34] sm:$0xf]  ;;  %v1095_v37 = vshrl.u32 %v8986_v51, 16 }
 0x121   : > { %v7409_v25 = vpack.c.bf16 %v649_v35, %v649_v35  ;;  %7848 = vmatprep.subr.bf16.mxu0 %v8519_v19  ;;  %v1035_v9 = vsel %vm8875_vm9, %v8908_v56, %v1034_v36  ;;  %927 = vst.msk [vmem:[#allocation2 + $0x54] sm:$0xf] %vm692_vm0, %v7406_v48  ;;  %v7792_v10 = vpop.f32.mrb[12].mxu0  ;;  %v1073_v32 = vshrl.u32 %v8993_v7, 16  ;;  %v9003_v14 = vld [vmem:[#allocation2 + $0x48] sm:$0xf] }
 0x122   : > { %v7407_v5 = vpack.c.bf16 %v647_v29, %v647_v29  ;;  %v1044_v15 = vsel %vm8875_vm9, %v1036_v43, %v1043_v62  ;;  %v568_v17 = vadd.f32 %v7792_v10, %v8894_v46  ;;  %v559_v22 = vpop.f32.mrb[13].mxu0  ;;  %v9011_v56 = vrot.slane %v1095_v37, 7 }
 0x123   : > { %930 = vst.msk [vmem:[#allocation2 + $0x68] sm:$0xf] %vm692_vm0, %v7409_v25  ;;  %v9009_v24 = vld [vmem:[#allocation2 + $0x38] sm:$0xf]  ;;  %v1104_v28 = vshrl.u32 %v9003_v14, 16  ;;  %v560_v34 = vadd.f32 %v8894_v46, %v559_v22  ;;  %v7793_v35 = vpop.f32.mrb[14].mxu0 }
 0x124   : > { %928 = vst.msk [vmem:[#allocation2 + $0x58] sm:$0xf] %vm692_vm0, %v7407_v5  ;;  %v9017_v36 = vrot.slane %v1073_v32, 7  ;;  %v1082_v43 = vshrl.u32 %v9009_v24, 16  ;;  %7849 = vmatpush3.bf16.msra.mxu0 %v8519_v19  ;;  %v652_v29 = vmax.f32 %v568_v17, 0.0  ;;  %v571_v62 = vadd.f32 %v7793_v35, %v8894_v46  ;;  %v562_v25 = vpop.f32.mrb[15].mxu0 }
 0x125   : > { %v6977_v37 = vcombine.low %v8993_v7, %v9009_v24  ;;  %v9024_v10 = vrot.slane %v1104_v28, 7  ;;  %v9029_v5 = vld [vmem:[%s10744_s2 + $0x20] sm:$0xff]   ;;  %v650_v32 = vmax.f32 %v560_v34, 0.0  ;;  %v563_v22 = vadd.f32 %v8894_v46, %v562_v25  ;;  %v9036_v17 = vld [vmem:[#allocation2 + $0x18] sm:$0xf] }
 0x126   : > { %v9032_v27 = vrot.slane %v1082_v43, 7  ;;  %v6978_v19 = vcombine.low %v8986_v51, %v9003_v14  ;;  %v7412_v35 = vpack.c.bf16 %v652_v29, %v652_v29  ;;  %v653_v31 = vmax.f32 %v571_v62, 0.0  ;;  %7882 = vmatprep.subr.bf16.mxu0 %v9029_v5 }
 0x127   : > { %7819 = vmatmul.mubr.msk.bf16.gmra.mrb[36].mxu0 %vm1454_vm1, %v6977_v37  ;;  %v9039_v28 = vcombine.low %v1035_v9, %v1044_v15  ;;  %v7410_v43 = vpack.c.bf16 %v650_v32, %v650_v32  ;;  %v651_v25 = vmax.f32 %v563_v22, 0.0  ;;  %v9047_v8 = vld [vmem:[#allocation2 + $0x64] sm:$0xf]  ;;  %v9053_v9 = vor.u32 %v1063_v0, %v8977_v18 }
 0x128   : > { %7822 = vmatprep.mubr.msk.bf16.mxu0 %vm1454_vm1, %v6978_v19  ;;  %933 = vst.msk [vmem:[#allocation2 + $0x84] sm:$0xf] %vm692_vm0, %v7412_v35  ;;  %v7413_v15 = vpack.c.bf16 %v653_v31, %v653_v31  ;;  %v9056_v62 = vld [vmem:[#allocation2 + $0x54] sm:$0xf]  ;;  %v1139_v37 = vshrl.u32 %v9047_v8, 16 }
 0x129   : > { %v9060_v22 = vld [vmem:[#allocation2 + $0x54] sm:$0xf]  ;;  %931 = vst.msk [vmem:[#allocation2 + $0x74] sm:$0xf] %vm692_vm0, %v7410_v43  ;;  %v7411_v48 = vpack.c.bf16 %v651_v25, %v651_v25  ;;  %v7796_v41 = vpop.f32.mrb[16].mxu0  ;;  %v1117_v0 = vshrl.u32 %v9056_v62, 16 }
 0x12a   : > { %10835 = vst [vmem:[#allocation16_spill] sm:$0xff] %v9060_v22  ;;  %v9067_v31 = vld [vmem:[#allocation2 + $0x68] sm:$0xf]  ;;  %v2816_v35 = vshrl.u32 %v9060_v22, 16  ;;  %934 = vst.msk [vmem:[#allocation2 + $0x88] sm:$0xf] %vm692_vm0, %v7413_v15  ;;  %v584_v32 = vadd.f32 %v7796_v41, %v8894_v46 }
 0x12b   : > { %10836 = vst [vmem:[#allocation17_spill] sm:$0xff] %v9067_v31  ;;  %v575_v12 = vpop.f32.mrb[17].mxu0  ;;  %v9072_v42 = vld [vmem:[#allocation2 + $0x58] sm:$0xf]  ;;  %v9074_v19 = vrot.slane %v1139_v37, 7  ;;  %v1148_v43 = vshrl.u32 %v9067_v31, 16  ;;  %v6980_v26 = vcombine.low %v9047_v8, %v9067_v31 }
 0x12c   : > { %932 = vst.msk [vmem:[#allocation2 + $0x78] sm:$0xf] %vm692_vm0, %v7411_v48  ;;  %v576_v18 = vadd.f32 %v8894_v46, %v575_v12  ;;  %v7797_v34 = vpop.f32.mrb[18].mxu0  ;;  %v9080_v29 = vrot.slane %v1117_v0, 7  ;;  %v1126_v15 = vshrl.u32 %v9072_v42, 16  ;;  %v656_v30 = vmax.f32 %v584_v32, 0.0 }
 0x12d   : > { %v587_v21 = vadd.f32 %v7797_v34, %v8894_v46  ;;  %v578_v37 = vpop.f32.mrb[19].mxu0  ;;  %v6979_v13 = vcombine.low %v9056_v62, %v9072_v42  ;;  %v9087_v6 = vrot.slane %v1148_v43, 7  ;;  %v9089_v25 = vld [vmem:[#allocation2 + $0x58] sm:$0xf]  ;;  %v9096_v41 = vld [vmem:[#allocation2 + $0x64] sm:$0xf] }
 0x12e   : > { %10838 = vst [vmem:[#allocation19_spill] sm:$0xff] %v9089_v25  ;;  %v654_v48 = vmax.f32 %v576_v18, 0.0  ;;  %v579_v12 = vadd.f32 %v8894_v46, %v578_v37  ;;  %v9092_v0 = vrot.slane %v1126_v15, 7  ;;  %10839 = vst [vmem:[#allocation20_spill] sm:$0xff] %v9096_v41  ;;  %v7416_v32 = vpack.c.bf16 %v656_v30, %v656_v30 }
 0x12f   : > { %10837 = vst [vmem:[#allocation18_spill] sm:$0xff] %v9087_v6  ;;  %v657_v34 = vmax.f32 %v587_v21, 0.0  ;;  %7823 = vmatmul.mubr.msk.bf16.gmra.mrb[40].mxu0 %vm1454_vm1, %v6979_v13  ;;  %v2818_v20 = vrot.slane %v2816_v35, 7  ;;  %v2819_v43 = vshll.u32 %v9060_v22, 16  ;;  %v2825_v18 = vshrl.u32 %v9089_v25, 16 }
 0x130   : > { %v7414_v16 = vpack.c.bf16 %v654_v48, %v654_v48  ;;  %v655_v4 = vmax.f32 %v579_v12, 0.0  ;;  %7826 = vmatprep.mubr.msk.bf16.mxu0 %vm1454_vm1, %v6980_v26  ;;  %v2828_v15 = vshll.u32 %v9089_v25, 16  ;;  %937 = vst.msk [vmem:[#allocation2 + $0xa4] sm:$0xf] %vm692_vm0, %v7416_v32  ;;  %v9104_v30 = vld [vmem:[#allocation2 + $0x74] sm:$0xf] }
 0x131   : > { %v7417_v37 = vpack.c.bf16 %v657_v34, %v657_v34  ;;  %v2821_v3 = vor.u32 %v2819_v43, %v2818_v20  ;;  %v2823_v31 = vrot.slane %v2818_v20, 4  ;;  %10840 = vst [vmem:[#allocation21_spill] sm:$0xff] %v9104_v30  ;;  %v2838_v13 = vshrl.u32 %v9096_v41, 16  ;;  %v7800_v35 = vpop.f32.mrb[20].mxu0 }
 0x132   : > { %935 = vst.msk [vmem:[#allocation2 + $0x94] sm:$0xf] %vm692_vm0, %v7414_v16  ;;  %v7415_v21 = vpack.c.bf16 %v655_v4, %v655_v4  ;;  %v2827_v48 = vrot.slane %v2825_v18, 7  ;;  %v1161_v26 = vshrl.u32 %v9104_v30, 16  ;;  %v600_v32 = vadd.f32 %v7800_v35, %v8894_v46  ;;  %v591_v34 = vpop.f32.mrb[21].mxu0 }
 0x133   : > { %938 = vst.msk [vmem:[#allocation2 + $0xa8] sm:$0xf] %vm692_vm0, %v7417_v37  ;;  %v2822_v20 = vsel %vm8875_vm9, %v8896_v49, %v2821_v3  ;;  %v9115_v43 = vld [vmem:[#allocation2 + $0x78] sm:$0xf]  ;;  %v9117_v22 = vrot.slane %v2838_v13, 7  ;;  %v2841_v4 = vshll.u32 %v9096_v41, 16  ;;  %v592_v16 = vadd.f32 %v8894_v46, %v591_v34 }
 0x134   : > { %10841 = vst [vmem:[#allocation22_spill] sm:$0xff] %v9115_v43  ;;  %936 = vst.msk [vmem:[#allocation2 + $0x98] sm:$0xf] %vm692_vm0, %v7415_v21  ;;  %v7801_v18 = vpop.f32.mrb[22].mxu0  ;;  %v2830_v12 = vor.u32 %v2828_v15, %v2827_v48  ;;  %v9122_v37 = vrot.slane %v1161_v26, 7  ;;  %v1170_v35 = vshrl.u32 %v9115_v43, 16  ;;  %v6981_v13 = vcombine.low %v9104_v30, %v9115_v43 }
 0x135   : > { %v660_v25 = vmax.f32 %v600_v32, 0.0  ;;  %v603_v6 = vadd.f32 %v7801_v18, %v8894_v46  ;;  %v594_v49 = vpop.f32.mrb[23].mxu0  ;;  %v9129_v41 = vld [vmem:[#allocation2 + $0x68] sm:$0xf]  ;;  %v658_v21 = vmax.f32 %v592_v16, 0.0  ;;  %v2843_v3 = vor.u32 %v2841_v4, %v9117_v22 }
 0x136   : > { %10842 = vst [vmem:[#allocation23_spill] sm:$0xff] %v9122_v37  ;;  %10843 = vst [vmem:[#allocation24_spill] sm:$0xff] %v9129_v41  ;;  %v595_v34 = vadd.f32 %v8894_v46, %v594_v49  ;;  %v2831_v15 = vsel %vm8875_vm9, %v2823_v31, %v2830_v12  ;;  %v9134_v48 = vrot.slane %v1170_v35, 7  ;;  %v9136_v26 = vld [vmem:[#allocation2 + $0x84] sm:$0xf]  ;;  %v2845_v49 = vrot.slane %v9117_v22, 4 }
 0x137   : > { %10845 = vst [vmem:[#allocation26_spill] sm:$0xff] %v9136_v26  ;;  %v7420_v32 = vpack.c.bf16 %v660_v25, %v660_v25  ;;  %v661_v18 = vmax.f32 %v603_v6, 0.0  ;;  %v7104_v37 = vcombine.low %v2822_v20, %v2831_v15  ;;  %7827 = vmatmul.mubr.msk.bf16.gmra.mrb[44].mxu0 %vm1454_vm1, %v6981_v13  ;;  %v9140_v43 = vld [vmem:[#allocation2 + $0x88] sm:$0xf]  ;;  %v7418_v30 = vpack.c.bf16 %v658_v21, %v658_v21  ;;  %v9151_v20 = vld [vmem:[#allocation2 + $0x74] sm:$0xf] }
 0x138   : > { %10844 = vst [vmem:[#allocation25_spill] sm:$0xff] %v9134_v48  ;;  %10846 = vst [vmem:[#allocation27_spill] sm:$0xff] %v9140_v43  ;;  %v659_v16 = vmax.f32 %v595_v34, 0.0  ;;  %v2847_v61 = vshrl.u32 %v9129_v41, 16  ;;  %v2844_v6 = vsel %vm8875_vm9, %v8898_v50, %v2843_v3  ;;  %v2850_v25 = vshll.u32 %v9129_v41, 16 }
 0x139   : > { %941 = vst.msk [vmem:[#allocation2 + $0xc4] sm:$0xf] %vm692_vm0, %v7420_v32  ;;  %v7421_v31 = vpack.c.bf16 %v661_v18, %v661_v18  ;;  %7930 = vmatprep.mubr.msk.bf16.mxu1 %vm1454_vm1, %v7104_v37  ;;  %v1183_v12 = vshrl.u32 %v9136_v26, 16  ;;  %10847 = vst [vmem:[#allocation28_spill] sm:$0xff] %v9151_v20  ;;  %v1192_v13 = vshrl.u32 %v9140_v43, 16  ;;  %v7804_v21 = vpop.f32.mrb[24].mxu0  ;;  %v6982_v34 = vcombine.low %v9136_v26, %v9140_v43 }
 0x13a   : > { %939 = vst.msk [vmem:[#allocation2 + $0xb4] sm:$0xf] %vm692_vm0, %v7418_v30  ;;  %v7419_v22 = vpack.c.bf16 %v659_v16, %v659_v16  ;;  %v2849_v4 = vrot.slane %v2847_v61, 7  ;;  %v9156_v37 = vld [vmem:[#allocation2 + $0x78] sm:$0xf]  ;;  %v616_v30 = vadd.f32 %v7804_v21, %v8894_v46  ;;  %v607_v15 = vpop.f32.mrb[25].mxu0 }
 0x13b   : > { %10848 = vst [vmem:[#allocation29_spill] sm:$0xff] %v9156_v37  ;;  %942 = vst.msk [vmem:[#allocation2 + $0xc8] sm:$0xf] %vm692_vm0, %v7421_v31  ;;  %v9159_v50 = vrot.slane %v1183_v12, 7  ;;  %v9166_v32 = vrot.slane %v1192_v13, 7  ;;  %v608_v18 = vadd.f32 %v8894_v46, %v607_v15  ;;  %v7805_v16 = vpop.f32.mrb[26].mxu0  ;;  %7830 = vmatprep.mubr.msk.bf16.mxu0 %vm1454_vm1, %v6982_v34 }
 0x13c   : > { %940 = vst.msk [vmem:[#allocation2 + $0xb8] sm:$0xf] %vm692_vm0, %v7419_v22  ;;  %v2852_v61 = vor.u32 %v2850_v25, %v2849_v4  ;;  %v2860_v31 = vshrl.u32 %v9151_v20, 16  ;;  %v664_v12 = vmax.f32 %v616_v30, 0.0  ;;  %v619_v3 = vadd.f32 %v7805_v16, %v8894_v46  ;;  %v610_v35 = vpop.f32.mrb[27].mxu0  ;;  %v8514_v16 = vld [vmem:[%s10744_s2 + $0x48] sm:$0xff]  }
 0x13d   : > { %10849 = vst [vmem:[#allocation30_spill] sm:$0xff] %v9159_v50  ;;  %10850 = vst [vmem:[#allocation31_spill] sm:$0xff] %v9166_v32  ;;  %v2863_v43 = vshll.u32 %v9151_v20, 16  ;;  %v2869_v21 = vshrl.u32 %v9156_v37, 16  ;;  %v662_v22 = vmax.f32 %v608_v18, 0.0  ;;  %v611_v4 = vadd.f32 %v8894_v46, %v610_v35 }
 0x13e   : > { %v2853_v25 = vsel %vm8875_vm9, %v2845_v49, %v2852_v61  ;;  %v2862_v13 = vrot.slane %v2860_v31, 7  ;;  %v9177_v15 = vld [vmem:[#allocation2 + $0x94] sm:$0xf]  ;;  %v7424_v26 = vpack.c.bf16 %v664_v12, %v664_v12  ;;  %v665_v34 = vmax.f32 %v619_v3, 0.0  ;;  %v9179_v50 = vld [vmem:[#allocation2 + $0x98] sm:$0xf] }
 0x13f   : > { %10851 = vst [vmem:[#allocation32_spill] sm:$0xff] %v9177_v15  ;;  %v7105_v32 = vcombine.low %v2844_v6, %v2853_v25  ;;  %v2871_v30 = vrot.slane %v2869_v21, 7  ;;  %10852 = vst [vmem:[#allocation33_spill] sm:$0xff] %v9179_v50  ;;  %v7422_v20 = vpack.c.bf16 %v662_v22, %v662_v22  ;;  %v663_v41 = vmax.f32 %v611_v4, 0.0  ;;  %v9184_v61 = vld [vmem:[#allocation2 + $0x84] sm:$0xf] }
 0x140   : > { %v2865_v48 = vor.u32 %v2863_v43, %v2862_v13  ;;  %v2867_v49 = vrot.slane %v2862_v13, 4  ;;  %10853 = vst [vmem:[#allocation34_spill] sm:$0xff] %v9184_v61  ;;  %945 = vst.msk [vmem:[#allocation2 + $0xe4] sm:$0xf] %vm692_vm0, %v7424_v26  ;;  %v7425_v6 = vpack.c.bf16 %v665_v34, %v665_v34  ;;  %v2872_v35 = vshll.u32 %v9156_v37, 16 }
 0x141   : > { %7931 = vmatmul.mubr.msk.bf16.vlgmr.msra.gmra.mrb[0].mxu1 %vm1454_vm1, %v7105_v32  ;;  %v1205_v3 = vshrl.u32 %v9177_v15, 16  ;;  %v9191_v31 = vld [vmem:[#allocation2 + $0x88] sm:$0xf]  ;;  %943 = vst.msk [vmem:[#allocation2 + $0xd4] sm:$0xf] %vm692_vm0, %v7422_v20  ;;  %v7423_v43 = vpack.c.bf16 %v663_v41, %v663_v41  ;;  %v1214_v26 = vshrl.u32 %v9179_v50, 16 }
 0x142   : > { %10854 = vst [vmem:[#allocation35_spill] sm:$0xff] %v9191_v31  ;;  %7955 = vmatpush3.bf16.msra.mxu1 %v8840_v45  ;;  %v2866_v32 = vsel %vm8875_vm9, %v8902_v53, %v2865_v48  ;;  %v9200_v21 = vld [vmem:[#allocation2 + $0xa4] sm:$0xf]  ;;  %v7808_v25 = vpop.f32.mrb[28].mxu0  ;;  %946 = vst.msk [vmem:[#allocation2 + $0xe8] sm:$0xf] %vm692_vm0, %v7425_v6  ;;  %v2874_v22 = vor.u32 %v2872_v35, %v2871_v30  ;;  %v6983_v45 = vcombine.low %v9177_v15, %v9179_v50 }
 0x143   : > { %v9203_v4 = vrot.slane %v1205_v3, 7  ;;  %v2882_v41 = vshrl.u32 %v9184_v61, 16  ;;  %v9208_v20 = vld [vmem:[#allocation2 + $0xa8] sm:$0xf]  ;;  %v623_v53 = vpop.f32.mrb[29].mxu0  ;;  %7956 = vmatprep.subr.bf16.mxu1 %v8514_v16  ;;  %v9213_v48 = vld [vmem:[%s10744_s2 + $0x50] sm:$0xff]  }
 0x144   : > { %10856 = vst [vmem:[#allocation37_spill] sm:$0xff] %v9208_v20  ;;  %944 = vst.msk [vmem:[#allocation2 + $0xd8] sm:$0xf] %vm692_vm0, %v7423_v43  ;;  %v9216_v13 = vrot.slane %v1214_v26, 7  ;;  %v2885_v34 = vshll.u32 %v9184_v61, 16  ;;  %v2891_v30 = vshrl.u32 %v9191_v31, 16  ;;  %v2875_v3 = vsel %vm8875_vm9, %v2867_v49, %v2874_v22  ;;  %7831 = vmatmul.mubr.msk.bf16.gmra.mrb[48].mxu0 %vm1454_vm1, %v6983_v45 }
 0x145   : > { %10855 = vst [vmem:[#allocation36_spill] sm:$0xff] %v9203_v4  ;;  %v2894_v6 = vshll.u32 %v9191_v31, 16  ;;  %v7809_v35 = vpop.f32.mrb[30].mxu0  ;;  %v2884_v12 = vrot.slane %v2882_v41, 7  ;;  %v1227_v18 = vshrl.u32 %v9200_v21, 16  ;;  %v7106_v26 = vcombine.low %v2866_v32, %v2875_v3 }
 0x146   : > { %10857 = vst [vmem:[#allocation38_spill] sm:$0xff] %v9216_v13  ;;  %v626_v43 = vpop.f32.mrb[31].mxu0  ;;  %v2893_v13 = vrot.slane %v2891_v30, 7  ;;  %v1236_v61 = vshrl.u32 %v9208_v20, 16  ;;  %v9228_v37 = vld [vmem:[#allocation2 + $0x94] sm:$0xf]  ;;  %7957 = vmatpush3.bf16.msra.mxu1 %v8514_v16  ;;  %v6984_v22 = vcombine.low %v9200_v21, %v9208_v20  ;;  %v632_v41 = vadd.f32 %v7808_v25, %v8894_v46 }
 0x147   : > { %v2887_v31 = vor.u32 %v2885_v34, %v2884_v12  ;;  %v2889_v4 = vrot.slane %v2884_v12, 4  ;;  %v9230_v49 = vrot.slane %v1227_v18, 7  ;;  %7990 = vmatprep.subr.bf16.mxu1 %v9213_v48  ;;  %7934 = vmatprep.mubr.msk.bf16.mxu1 %vm1454_vm1, %v7106_v26  ;;  %v624_v30 = vadd.f32 %v8894_v46, %v623_v53  ;;  %v9246_v34 = vld [vmem:[#allocation2 + $0x98] sm:$0xf]  ;;  %v9252_v3 = vld [vmem:[#allocation2 + $0xb4] sm:$0xf] }
 0x148   : > { %v2896_v32 = vor.u32 %v2894_v6, %v2893_v13  ;;  %v9236_v45 = vrot.slane %v1236_v61, 7  ;;  %7834 = vmatprep.mubr.msk.bf16.mxu0 %vm1454_vm1, %v6984_v22  ;;  %v635_v18 = vadd.f32 %v7809_v35, %v8894_v46  ;;  %v627_v12 = vadd.f32 %v8894_v46, %v626_v43  ;;  %10858 = vst [vmem:[#allocation39_spill] sm:$0xff] %v9252_v3  ;;  %v9254_v35 = vld [vmem:[#allocation2 + $0xb8] sm:$0xf]  ;;  %v9258_v20 = vld [vmem:[#allocation2 + $0xa4] sm:$0xf] }
 0x149   : > { %v2888_v16 = vsel %vm8875_vm9, %v8904_v54, %v2887_v31  ;;  %v2904_v13 = vshrl.u32 %v9228_v37, 16  ;;  %v668_v25 = vmax.f32 %v632_v41, 0.0  ;;  %v666_v6 = vmax.f32 %v624_v30, 0.0  ;;  %10859 = vst [vmem:[#allocation40_spill] sm:$0xff] %v9254_v35  ;;  %10860 = vst [vmem:[#allocation41_spill] sm:$0xff] %v9258_v20 }
 0x14a   : > { %v2897_v61 = vsel %vm8875_vm9, %v2889_v4, %v2896_v32  ;;  %v2907_v53 = vshll.u32 %v9228_v37, 16  ;;  %v669_v31 = vmax.f32 %v635_v18, 0.0  ;;  %v667_v26 = vmax.f32 %v627_v12, 0.0 }
 0x14b   : > { %v7107_v54 = vcombine.low %v2888_v16, %v2897_v61  ;;  %v2906_v22 = vrot.slane %v2904_v13, 7  ;;  %v7428_v46 = vpack.c.bf16 %v668_v25, %v668_v25  ;;  %v7426_v43 = vpack.c.bf16 %v666_v6, %v666_v6  ;;  %v9261_v16 = vld [vmem:[#allocation2 + $0xa8] sm:$0xf]  ;;  %v9268_v25 = vld [vmem:[#allocation2 + $0xc4] sm:$0xf] }
 0x14c   : > { %v2913_v15 = vshrl.u32 %v9246_v34, 16  ;;  %v2916_v50 = vshll.u32 %v9246_v34, 16  ;;  %v7429_v4 = vpack.c.bf16 %v669_v31, %v669_v31  ;;  %v7427_v32 = vpack.c.bf16 %v667_v26, %v667_v26  ;;  %10861 = vst [vmem:[#allocation42_spill] sm:$0xff] %v9261_v16  ;;  %10862 = vst [vmem:[#allocation43_spill] sm:$0xff] %v9268_v25  ;;  %v9279_v31 = vld [vmem:[#allocation2 + $0xc8] sm:$0xf] }
 0x14d   : > { %7935 = vmatmul.mubr.msk.bf16.gmra.mrb[4].mxu1 %vm1454_vm1, %v7107_v54  ;;  %v2909_v41 = vor.u32 %v2907_v53, %v2906_v22  ;;  %v2911_v30 = vrot.slane %v2906_v22, 4  ;;  %949 = vst.msk [vmem:[#allocation2 + $0x104] sm:$0xf] %vm692_vm0, %v7428_v46  ;;  %947 = vst.msk [vmem:[#allocation2 + $0xf4] sm:$0xf] %vm692_vm0, %v7426_v43  ;;  %v1249_v12 = vshrl.u32 %v9252_v3, 16 }
 0x14e   : > { %v2915_v18 = vrot.slane %v2913_v15, 7  ;;  %v1258_v61 = vshrl.u32 %v9254_v35, 16  ;;  %950 = vst.msk [vmem:[#allocation2 + $0x108] sm:$0xf] %vm692_vm0, %v7429_v4  ;;  %948 = vst.msk [vmem:[#allocation2 + $0xf8] sm:$0xf] %vm692_vm0, %v7427_v32  ;;  %v6985_v15 = vcombine.low %v9252_v3, %v9254_v35 }
 0x14f   : > { %v2910_v6 = vsel %vm8875_vm9, %v8910_v58, %v2909_v41  ;;  %v2926_v54 = vshrl.u32 %v9258_v20, 16  ;;  %10863 = vst [vmem:[#allocation44_spill] sm:$0xff] %v9279_v31  ;;  %v9281_v22 = vrot.slane %v1249_v12, 7  ;;  %v2929_v43 = vshll.u32 %v9258_v20, 16  ;;  %v9290_v53 = vld [vmem:[#allocation2 + $0xb4] sm:$0xf] }
 0x150   : > { %v2918_v26 = vor.u32 %v2916_v50, %v2915_v18  ;;  %v9283_v46 = vrot.slane %v1258_v61, 7  ;;  %7835 = vmatmul.mubr.msk.bf16.gmra.mrb[52].mxu0 %vm1454_vm1, %v6985_v15  ;;  %v2935_v58 = vshrl.u32 %v9261_v16, 16  ;;  %v2938_v32 = vshll.u32 %v9261_v16, 16  ;;  %10865 = vst [vmem:[#allocation46_spill] sm:$0xff] %v9290_v53  ;;  %v9297_v13 = vld [vmem:[#allocation2 + $0xb8] sm:$0xf] }
 0x151   : > { %v2928_v4 = vrot.slane %v2926_v54, 7  ;;  %v1271_v41 = vshrl.u32 %v9268_v25, 16  ;;  %v1280_v12 = vshrl.u32 %v9279_v31, 16  ;;  %10866 = vst [vmem:[#allocation47_spill] sm:$0xff] %v9297_v13  ;;  %v9299_v16 = vld [vmem:[#allocation2 + $0xd4] sm:$0xf] }
 0x152   : > { %10864 = vst [vmem:[#allocation45_spill] sm:$0xff] %v9283_v46  ;;  %v2919_v50 = vsel %vm8875_vm9, %v2911_v30, %v2918_v26  ;;  %v2937_v35 = vrot.slane %v2935_v58, 7  ;;  %10867 = vst [vmem:[#allocation48_spill] sm:$0xff] %v9299_v16  ;;  %v6986_v30 = vcombine.low %v9268_v25, %v9279_v31  ;;  %v2948_v26 = vshrl.u32 %v9290_v53, 16  ;;  %v9308_v18 = vld [vmem:[#allocation2 + $0xd8] sm:$0xf] }
 0x153   : > { %v7108_v15 = vcombine.low %v2910_v6, %v2919_v50  ;;  %v2931_v54 = vor.u32 %v2929_v43, %v2928_v4  ;;  %v2933_v20 = vrot.slane %v2928_v4, 4  ;;  %v9301_v46 = vrot.slane %v1271_v41, 7  ;;  %10869 = vst [vmem:[#allocation50_spill] sm:$0xff] %v9308_v18  ;;  %v9320_v31 = vld [vmem:[#allocation2 + $0xc4] sm:$0xf] }
 0x154   : > { %v9303_v3 = vrot.slane %v1280_v12, 7  ;;  %v2940_v43 = vor.u32 %v2938_v32, %v2937_v35  ;;  %v2951_v4 = vshll.u32 %v9290_v53, 16  ;;  %v2957_v58 = vshrl.u32 %v9297_v13, 16  ;;  %7838 = vmatprep.mubr.msk.bf16.mxu0 %vm1454_vm1, %v6986_v30  ;;  %10870 = vst [vmem:[#allocation51_spill] sm:$0xff] %v9320_v31  ;;  %v9353_v32 = vld [vmem:[#allocation2 + $0xd8] sm:$0xf] }
 0x155   : > { %7938 = vmatprep.mubr.msk.bf16.mxu1 %vm1454_vm1, %v7108_v15  ;;  %v2932_v6 = vsel %vm8875_vm9, %v8906_v55, %v2931_v54  ;;  %v2950_v41 = vrot.slane %v2948_v26, 7  ;;  %v2960_v50 = vshll.u32 %v9297_v13, 16  ;;  %v1293_v12 = vshrl.u32 %v9299_v16, 16  ;;  %v9326_v54 = vld [vmem:[#allocation2 + $0xc8] sm:$0xf]  ;;  %10876 = vst [vmem:[#allocation57_spill] sm:$0xff] %v9353_v32 }
 0x156   : > { %10868 = vst [vmem:[#allocation49_spill] sm:$0xff] %v9303_v3  ;;  %v2941_v15 = vsel %vm8875_vm9, %v2933_v20, %v2940_v43  ;;  %v2959_v55 = vrot.slane %v2957_v58, 7  ;;  %v1302_v35 = vshrl.u32 %v9308_v18, 16  ;;  %10871 = vst [vmem:[#allocation52_spill] sm:$0xff] %v9326_v54  ;;  %v9330_v3 = vld [vmem:[#allocation2 + $0xe4] sm:$0xf]  ;;  %v6987_v20 = vcombine.low %v9299_v16, %v9308_v18 }
 0x157   : > { %v7109_v30 = vcombine.low %v2932_v6, %v2941_v15  ;;  %v2953_v26 = vor.u32 %v2951_v4, %v2950_v41  ;;  %v2955_v53 = vrot.slane %v2950_v41, 4  ;;  %v9328_v13 = vrot.slane %v1293_v12, 7  ;;  %10872 = vst [vmem:[#allocation53_spill] sm:$0xff] %v9330_v3  ;;  %v9337_v58 = vld [vmem:[#allocation2 + $0xe8] sm:$0xf] }
 0x158   : > { %v2962_v61 = vor.u32 %v2960_v50, %v2959_v55  ;;  %v9332_v25 = vrot.slane %v1302_v35, 7  ;;  %v2970_v43 = vshrl.u32 %v9320_v31, 16  ;;  %10874 = vst [vmem:[#allocation55_spill] sm:$0xff] %v9337_v58  ;;  %v2973_v4 = vshll.u32 %v9320_v31, 16  ;;  %v9346_v12 = vld [vmem:[#allocation2 + $0xd4] sm:$0xf]  ;;  %7839 = vmatmul.mubr.msk.bf16.gmra.mrb[56].mxu0 %vm1454_vm1, %v6987_v20 }
 0x159   : > { %7939 = vmatmul.mubr.msk.bf16.gmra.mrb[8].mxu1 %vm1454_vm1, %v7109_v30  ;;  %v2954_v6 = vsel %vm8875_vm9, %v8914_v63, %v2953_v26  ;;  %v2979_v41 = vshrl.u32 %v9326_v54, 16  ;;  %v2982_v50 = vshll.u32 %v9326_v54, 16  ;;  %10875 = vst [vmem:[#allocation56_spill] sm:$0xff] %v9346_v12  ;;  %v1315_v35 = vshrl.u32 %v9330_v3, 16  ;;  %v9357_v18 = vld [vmem:[#allocation2 + $0xf4] sm:$0xf] }
 0x15a   : > { %10873 = vst [vmem:[#allocation54_spill] sm:$0xff] %v9332_v25  ;;  %v2963_v15 = vsel %vm8875_vm9, %v2955_v53, %v2962_v61  ;;  %v2972_v55 = vrot.slane %v2970_v43, 7  ;;  %v1324_v31 = vshrl.u32 %v9337_v58, 16  ;;  %10877 = vst [vmem:[#allocation58_spill] sm:$0xff] %v9357_v18  ;;  %v6988_v61 = vcombine.low %v9330_v3, %v9337_v58  ;;  %v9363_v20 = vld [vmem:[#allocation2 + $0xf8] sm:$0xf] }
 0x15b   : > { %v7110_v63 = vcombine.low %v2954_v6, %v2963_v15  ;;  %v2981_v26 = vrot.slane %v2979_v41, 7  ;;  %v9359_v53 = vrot.slane %v1315_v35, 7  ;;  %10879 = vst [vmem:[#allocation60_spill] sm:$0xff] %v9363_v20  ;;  %v2992_v41 = vshrl.u32 %v9346_v12, 16  ;;  %v9388_v58 = vld [vmem:[#allocation2 + $0xf4] sm:$0xf] }
 0x15c   : > { %v2975_v25 = vor.u32 %v2973_v4, %v2972_v55  ;;  %v2977_v16 = vrot.slane %v2972_v55, 4  ;;  %v9366_v6 = vrot.slane %v1324_v31, 7  ;;  %v2995_v15 = vshll.u32 %v9346_v12, 16  ;;  %7842 = vmatprep.mubr.msk.bf16.mxu0 %vm1454_vm1, %v6988_v61  ;;  %v9383_v12 = vld [vmem:[#allocation2 + $0xe8] sm:$0xf]  ;;  %10883 = vst [vmem:[#allocation64_spill] sm:$0xff] %v9388_v58 }
 0x15d   : > { %10878 = vst [vmem:[#allocation59_spill] sm:$0xff] %v9359_v53  ;;  %7942 = vmatprep.mubr.msk.bf16.mxu1 %vm1454_vm1, %v7110_v63  ;;  %v2984_v43 = vor.u32 %v2982_v50, %v2981_v26  ;;  %v3001_v55 = vshrl.u32 %v9353_v32, 16  ;;  %v3004_v35 = vshll.u32 %v9353_v32, 16  ;;  %v1337_v54 = vshrl.u32 %v9357_v18, 16  ;;  %v9377_v63 = vld [vmem:[#allocation2 + $0xe4] sm:$0xf] }
 0x15e   : > { %10880 = vst [vmem:[#allocation61_spill] sm:$0xff] %v9366_v6  ;;  %v2976_v4 = vsel %vm8875_vm9, %v8912_v59, %v2975_v25  ;;  %10881 = vst [vmem:[#allocation62_spill] sm:$0xff] %v9377_v63  ;;  %v2994_v50 = vrot.slane %v2992_v41, 7  ;;  %v1346_v30 = vshrl.u32 %v9363_v20, 16 }
 0x15f   : > { %v2985_v31 = vsel %vm8875_vm9, %v2977_v16, %v2984_v43  ;;  %10882 = vst [vmem:[#allocation63_spill] sm:$0xff] %v9383_v12  ;;  %v3003_v25 = vrot.slane %v3001_v55, 7  ;;  %v9385_v61 = vrot.slane %v1337_v54, 7  ;;  %v6989_v16 = vcombine.low %v9357_v18, %v9363_v20  ;;  %v9394_v43 = vld [vmem:[#allocation2 + $0xf8] sm:$0xf] }
 0x160   : > { %v7111_v59 = vcombine.low %v2976_v4, %v2985_v31  ;;  %v2997_v6 = vor.u32 %v2995_v15, %v2994_v50  ;;  %v2999_v3 = vrot.slane %v2994_v50, 4  ;;  %v9390_v53 = vrot.slane %v1346_v30, 7  ;;  %v9400_v31 = vld [vmem:[#allocation2 + $0x104] sm:$0xf] }
 0x161   : > { %v3006_v41 = vor.u32 %v3004_v35, %v3003_v25  ;;  %v3014_v4 = vshrl.u32 %v9377_v63, 16  ;;  %v3017_v54 = vshll.u32 %v9377_v63, 16  ;;  %v3023_v55 = vshrl.u32 %v9383_v12, 16  ;;  %7843 = vmatmul.mubr.msk.bf16.gmra.mrb[60].mxu0 %vm1454_vm1, %v6989_v16  ;;  %v9415_v16 = vld [vmem:[#allocation2 + $0x108] sm:$0xf] }
 0x162   : > { %10884 = vst [vmem:[#allocation65_spill] sm:$0xff] %v9390_v53  ;;  %7943 = vmatmul.mubr.msk.bf16.gmra.mrb[12].mxu1 %vm1454_vm1, %v7111_v59  ;;  %v2998_v30 = vsel %vm8875_vm9, %v8925_v38, %v2997_v6  ;;  %v3026_v15 = vshll.u32 %v9383_v12, 16  ;;  %v3036_v50 = vshrl.u32 %v9388_v58, 16  ;;  %v3039_v35 = vshll.u32 %v9388_v58, 16  ;;  %7850 = vmatprep.mubr.msk.bf16.mxu0 %vm1454_vm1, %v8889_v23 }
 0x163   : > { %v3007_v59 = vsel %vm8875_vm9, %v2999_v3, %v3006_v41  ;;  %v3016_v25 = vrot.slane %v3014_v4, 7  ;;  %v3025_v32 = vrot.slane %v3023_v55, 7  ;;  %v3045_v26 = vshrl.u32 %v9394_v43, 16 }
 0x164   : > { %v7112_v63 = vcombine.low %v2998_v30, %v3007_v59  ;;  %v3038_v38 = vrot.slane %v3036_v50, 7  ;;  %v3048_v6 = vshll.u32 %v9394_v43, 16  ;;  %v3058_v12 = vshrl.u32 %v9400_v31, 16 }
 0x165   : > { %v3019_v20 = vor.u32 %v3017_v54, %v3016_v25  ;;  %v3021_v58 = vrot.slane %v3016_v25, 4  ;;  %v3028_v53 = vor.u32 %v3026_v15, %v3025_v32  ;;  %v3047_v18 = vrot.slane %v3045_v26, 7 }
 0x166   : > { %7946 = vmatprep.mubr.msk.bf16.mxu1 %vm1454_vm1, %v7112_v63  ;;  %v3041_v3 = vor.u32 %v3039_v35, %v3038_v38  ;;  %v3043_v41 = vrot.slane %v3038_v38, 4  ;;  %v3060_v4 = vrot.slane %v3058_v12, 7  ;;  %v3061_v23 = vshll.u32 %v9400_v31, 16 }
 0x167   : > { %v3020_v55 = vsel %vm8875_vm9, %v8916_v1, %v3019_v20  ;;  %v3029_v30 = vsel %vm8875_vm9, %v3021_v58, %v3028_v53  ;;  %v3050_v50 = vor.u32 %v3048_v6, %v3047_v18  ;;  %v3067_v54 = vshrl.u32 %v9415_v16, 16  ;;  %v9437_v58 = vld [vmem:[#allocation2 + $0x24] sm:$0xf]  ;;  %v9457_v6 = vld [vmem:[#allocation2 + $0x28] sm:$0xf] }
 0x168   : > { %v7113_v59 = vcombine.low %v3020_v55, %v3029_v30  ;;  %v3042_v32 = vsel %vm8875_vm9, %v8927_v39, %v3041_v3  ;;  %v3063_v63 = vor.u32 %v3061_v23, %v3060_v4  ;;  %v3065_v26 = vrot.slane %v3060_v4, 4  ;;  %v8534_v39 = vld [vmem:[%s10744_s2 + $0x28] sm:$0xff]   ;;  %v10944_v4 = vld [vmem:[#allocation13_spill] sm:$0xff] }
 0x169   : > { %v3051_v12 = vsel %vm8875_vm9, %v3043_v41, %v3050_v50  ;;  %v3069_v15 = vrot.slane %v3067_v54, 7  ;;  %v3070_v35 = vshll.u32 %v9415_v16, 16  ;;  %v10885_v1 = vrot.slane %v8970_v57, 4  ;;  %7851 = vmatmul.mubr.msk.bf16.vlgmr.msra.gmra.mrb[32].mxu0 %vm1454_vm1, %v9039_v28  ;;  %v10945_v41 = vld [vmem:[#allocation15_spill] sm:$0xff] }
 0x16a   : > { %7947 = vmatmul.mubr.msk.bf16.gmra.mrb[16].mxu1 %vm1454_vm1, %v7113_v59  ;;  %v7114_v53 = vcombine.low %v3042_v32, %v3051_v12  ;;  %v3064_v20 = vsel %vm8875_vm9, %v8929_v40, %v3063_v63  ;;  %v10886_v57 = vsel %vm8875_vm9, %v8900_v52, %v8990_v2  ;;  %v10887_v25 = vshrl.u32 %v8962_v33, 16  ;;  %7883 = vmatpush3.bf16.msra.mxu0 %v9029_v5  ;;  %v9479_v32 = vld [vmem:[#allocation2 + $0x34] sm:$0xf]  ;;  %v9488_v63 = vld [vmem:[#allocation2 + $0x38] sm:$0xf] }
 0x16b   : > { %v1066_v18 = vsel %vm8875_vm9, %v10885_v1, %v9053_v9  ;;  %v3072_v3 = vor.u32 %v3070_v35, %v3069_v15  ;;  %v2737_v28 = vshrl.u32 %v9036_v17, 16  ;;  %v10888_v52 = vshll.u32 %v8993_v7, 16  ;;  %10890 = vst [vmem:[#allocation66_spill] sm:$0xff] %v9479_v32  ;;  %7884 = vmatprep.subr.bf16.mxu0 %v8534_v39  ;;  %10891 = vst [vmem:[#allocation67_spill] sm:$0xff] %v9488_v63 }
 0x16c   : > { %v7010_v9 = vcombine.low %v10886_v57, %v1066_v18  ;;  %v9455_v38 = vrot.slane %v10887_v25, 7  ;;  %7950 = vmatprep.mubr.msk.bf16.mxu1 %vm1454_vm1, %v7114_v53  ;;  %v1080_v2 = vrot.slane %v9017_v36, 4  ;;  %v10889_v23 = vshll.u32 %v9009_v24, 16  ;;  %v9508_v25 = vld [vmem:[%s10744_s2 + $0x30] sm:$0xff]  }
 0x16d   : > { %v1078_v40 = vor.u32 %v10888_v52, %v9017_v36  ;;  %v2750_v30 = vshrl.u32 %v9437_v58, 16  ;;  %v3073_v50 = vsel %vm8875_vm9, %v3065_v26, %v3072_v3  ;;  %v9475_v5 = vrot.slane %v2737_v28, 7 }
 0x16e   : > { %7854 = vmatprep.mubr.msk.bf16.mxu0 %vm1454_vm1, %v7010_v9  ;;  %v1087_v55 = vor.u32 %v10889_v23, %v9032_v27  ;;  %v2759_v59 = vshrl.u32 %v9457_v6, 16  ;;  %v7115_v7 = vcombine.low %v3064_v20, %v3073_v50  ;;  %v7139_v35 = vcombine.low %v9437_v58, %v9457_v6  ;;  %7885 = vmatpush3.bf16.msra.mxu0 %v8534_v39  ;;  %v9503_v9 = vld [vmem:[#allocation2 + $0x44] sm:$0xf] }
 0x16f   : > { %v1079_v24 = vsel %vm8875_vm9, %v8932_v44, %v1078_v40  ;;  %v9486_v36 = vrot.slane %v2750_v30, 7  ;;  %v10892_v1 = vshll.u32 %v8986_v51, 16  ;;  %v1102_v18 = vrot.slane %v9011_v56, 4  ;;  %10894 = vst [vmem:[#allocation68_spill] sm:$0xff] %v9503_v9  ;;  %7918 = vmatprep.subr.bf16.mxu0 %v9508_v25  ;;  %v10940_v51 = vld [vmem:[#allocation12_spill] sm:$0xff] }
 0x170   : > { %v1088_v27 = vsel %vm8875_vm9, %v1080_v2, %v1087_v55  ;;  %v9490_v12 = vrot.slane %v2759_v59, 7  ;;  %v10893_v53 = vshll.u32 %v9003_v14, 16  ;;  %v2772_v57 = vshrl.u32 %v9479_v32, 16 }
 0x171   : > { %v7011_v26 = vcombine.low %v1079_v24, %v1088_v27  ;;  %v1100_v44 = vor.u32 %v10892_v1, %v9011_v56  ;;  %v2781_v39 = vshrl.u32 %v9488_v63, 16  ;;  %v7140_v14 = vcombine.low %v9479_v32, %v9488_v63  ;;  %v10918_v24 = vld [vmem:[#allocation26_spill] sm:$0xff]  ;;  %v1937_v63 = vld [vmem:[#allocation2 + $0x18] sm:$0xf] }
 0x172   : > { %v1109_v20 = vor.u32 %v10893_v53, %v9024_v10  ;;  %v9516_v10 = vld [vmem:[#allocation2 + $0x48] sm:$0xf]  ;;  %7951 = vmatmul.mubr.msk.bf16.gmra.mrb[20].mxu1 %vm1454_vm1, %v7115_v7  ;;  %v9525_v52 = vrot.slane %v2772_v57, 7  ;;  %v10896_v40 = vshll.u32 %v9056_v62, 16  ;;  %v10897_v23 = vcombine.low %v8962_v33, %v9036_v17 }
 0x173   : > { %10895 = vst [vmem:[#allocation69_spill] sm:$0xff] %v9516_v10  ;;  %7855 = vmatmul.mubr.msk.bf16.gmra.mrb[36].mxu0 %vm1454_vm1, %v7011_v26  ;;  %v1101_v3 = vsel %vm8875_vm9, %v8934_v47, %v1100_v44  ;;  %v9534_v30 = vrot.slane %v2781_v39, 7  ;;  %v1124_v50 = vrot.slane %v9080_v29, 4  ;;  %v10899_v47 = vshll.u32 %v9072_v42, 16  ;;  %v10904_v39 = vld [vmem:[#allocation18_spill] sm:$0xff] }
 0x174   : > { %v1110_v28 = vsel %vm8875_vm9, %v1102_v18, %v1109_v20  ;;  %v1122_v2 = vor.u32 %v10896_v40, %v9080_v29  ;;  %7958 = vmatprep.mubr.msk.bf16.mxu1 %vm1454_vm1, %v10897_v23  ;;  %v2794_v62 = vshrl.u32 %v9503_v9, 16  ;;  %v2803_v27 = vshrl.u32 %v9516_v10, 16  ;;  %v10903_v20 = vld [vmem:[#allocation8_spill] sm:$0xff] }
 0x175   : > { %v7012_v55 = vcombine.low %v1101_v3, %v1110_v28  ;;  %10898 = vst [vmem:[#allocation70_spill] sm:$0xff] %v9534_v30  ;;  %v1131_v59 = vor.u32 %v10899_v47, %v9092_v0  ;;  %v7141_v42 = vcombine.low %v9503_v9, %v9516_v10  ;;  %v10900_v0 = vshll.u32 %v9047_v8, 16  ;;  %v10905_v3 = vld [vmem:[#allocation17_spill] sm:$0xff]  ;;  %v10908_v23 = vld [vmem:[#allocation16_spill] sm:$0xff]  ;;  %v10909_v8 = vld [vmem:[#allocation23_spill] sm:$0xff] }
 0x176   : > { %v1123_v7 = vsel %vm8875_vm9, %v8938_v60, %v1122_v2  ;;  %v9555_v44 = vrot.slane %v2794_v62, 7  ;;  %v9557_v18 = vrot.slane %v2803_v27, 7  ;;  %v1146_v53 = vrot.slane %v9074_v19, 4  ;;  %v10907_v2 = vld [vmem:[#allocation19_spill] sm:$0xff]  ;;  %v10912_v62 = vld [vmem:[#allocation25_spill] sm:$0xff]  ;;  %v10913_v27 = vld [vmem:[#allocation22_spill] sm:$0xff] }
 0x177   : > { %7858 = vmatprep.mubr.msk.bf16.mxu0 %vm1454_vm1, %v7012_v55  ;;  %v1132_v26 = vsel %vm8875_vm9, %v1124_v50, %v1131_v59  ;;  %v1144_v60 = vor.u32 %v10900_v0, %v9074_v19  ;;  %v10906_v28 = vshll.u32 %v10905_v3, 16  ;;  %v7142_v55 = vcombine.low %v10908_v23, %v10907_v2  ;;  %v10910_v50 = vld [vmem:[#allocation21_spill] sm:$0xff]  ;;  %v10915_v0 = vld [vmem:[#allocation24_spill] sm:$0xff] }
 0x178   : > { %v7013_v1 = vcombine.low %v1123_v7, %v1132_v26  ;;  %10901 = vst [vmem:[#allocation71_spill] sm:$0xff] %v9555_v44  ;;  %10902 = vst [vmem:[#allocation72_spill] sm:$0xff] %v9557_v18  ;;  %v10911_v47 = vshll.u32 %v10910_v50, 16  ;;  %v1168_v7 = vrot.slane %v10909_v8, 4  ;;  %v10914_v19 = vshll.u32 %v10913_v27, 16  ;;  %v10916_v29 = vld [vmem:[#allocation20_spill] sm:$0xff] }
 0x179   : > { %v1145_v57 = vsel %vm8875_vm9, %v10903_v20, %v1144_v60  ;;  %v1153_v40 = vor.u32 %v10906_v28, %v10904_v39  ;;  %v10917_v20 = vld [vmem:[#allocation30_spill] sm:$0xff]  ;;  %v10919_v3 = vshll.u32 %v10918_v24, 16  ;;  %v10920_v2 = vld [vmem:[#allocation9_spill] sm:$0xff]  ;;  %v10921_v50 = vld [vmem:[#allocation31_spill] sm:$0xff] }
 0x17a   : > { %v1166_v59 = vor.u32 %v10911_v47, %v10909_v8  ;;  %v1175_v26 = vor.u32 %v10914_v19, %v10912_v62  ;;  %v1190_v8 = vrot.slane %v10917_v20, 4  ;;  %v10922_v47 = vld [vmem:[#allocation27_spill] sm:$0xff]  ;;  %v8526_v19 = vld [vmem:[%s10744_s2 + $0x58] sm:$0xff]   ;;  %7959 = vmatmul.mubr.msk.bf16.vlgmr.msra.gmra.mrb[24].mxu1 %vm1454_vm1, %v7139_v35  ;;  %v1936_v9 = vld [vmem:[#allocation2 + $0x14] sm:$0xf] }
 0x17b   : > { %v1188_v39 = vor.u32 %v10919_v3, %v10917_v20  ;;  %v1154_v28 = vsel %vm8875_vm9, %v1146_v53, %v1153_v40  ;;  %v10923_v27 = vshll.u32 %v10922_v47, 16  ;;  %7859 = vmatmul.mubr.msk.bf16.gmra.mrb[40].mxu0 %vm1454_vm1, %v7013_v1  ;;  %v10924_v40 = vld [vmem:[#allocation10_spill] sm:$0xff]  ;;  %v10925_v20 = vld [vmem:[#allocation36_spill] sm:$0xff]  ;;  %7991 = vmatpush3.bf16.msra.mxu1 %v9213_v48  ;;  %v10931_v48 = vld [vmem:[#allocation33_spill] sm:$0xff] }
 0x17c   : > { %v1167_v23 = vsel %vm8875_vm9, %v10920_v2, %v1166_v59  ;;  %v7014_v24 = vcombine.low %v1145_v57, %v1154_v28  ;;  %v1176_v53 = vsel %vm8875_vm9, %v1168_v7, %v1175_v26  ;;  %v1212_v3 = vrot.slane %v10925_v20, 4  ;;  %7962 = vmatprep.mubr.msk.bf16.mxu1 %vm1454_vm1, %v7140_v14  ;;  %v10927_v1 = vld [vmem:[#allocation28_spill] sm:$0xff]  ;;  %7992 = vmatprep.subr.bf16.mxu1 %v8526_v19 }
 0x17d   : > { %v1197_v62 = vor.u32 %v10923_v27, %v10921_v50  ;;  %v1189_v59 = vsel %vm8875_vm9, %v10924_v40, %v1188_v39  ;;  %v7015_v2 = vcombine.low %v1167_v23, %v1176_v53  ;;  %v10926_v50 = vld [vmem:[#allocation29_spill] sm:$0xff]  ;;  %v1234_v28 = vrot.slane %v9230_v49, 4  ;;  %v10928_v26 = vld [vmem:[#allocation32_spill] sm:$0xff]  ;;  %v10930_v27 = vld [vmem:[#allocation38_spill] sm:$0xff] }
 0x17e   : > { %7862 = vmatprep.mubr.msk.bf16.mxu0 %vm1454_vm1, %v7014_v24  ;;  %v10929_v39 = vshll.u32 %v10928_v26, 16  ;;  %v10932_v40 = vshll.u32 %v10931_v48, 16  ;;  %v10933_v23 = vld [vmem:[#allocation35_spill] sm:$0xff]  ;;  %v10934_v53 = vld [vmem:[#allocation34_spill] sm:$0xff]  ;;  %v3718_v30 = vld [vmem:[#allocation2 + $0x14] sm:$0xf] }
 0x17f   : > { %v1198_v35 = vsel %vm8875_vm9, %v1190_v8, %v1197_v62  ;;  %v9619_v8 = vld [vmem:[%s10744_s2 + $0x60] sm:$0xff]   ;;  %v10935_v62 = vshll.u32 %v9200_v21, 16  ;;  %7993 = vmatpush3.bf16.msra.mxu1 %v8526_v19  ;;  %v10950_v19 = vld [vmem:[#allocation49_spill] sm:$0xff]  ;;  %v10962_v26 = vld [vmem:[#allocation59_spill] sm:$0xff] }
 0x180   : > { %v7016_v7 = vcombine.low %v1189_v59, %v1198_v35  ;;  %v1210_v47 = vor.u32 %v10929_v39, %v10925_v20  ;;  %v1219_v14 = vor.u32 %v10932_v40, %v10930_v27  ;;  %v10936_v59 = vld [vmem:[#allocation37_spill] sm:$0xff]  ;;  %v10938_v39 = vld [vmem:[#allocation39_spill] sm:$0xff]  ;;  %v987_v40 = vld [vmem:[#allocation2 + $0xc0] sm:$0x8]  ;;  %8026 = vmatprep.subr.bf16.mxu1 %v9619_v8 }
 0x181   : > { %v1232_v24 = vor.u32 %v10935_v62, %v9230_v49  ;;  %v10937_v35 = vshll.u32 %v10936_v59, 16  ;;  %v10939_v27 = vshll.u32 %v10938_v39, 16  ;;  %v1256_v49 = vrot.slane %v9281_v22, 4  ;;  %v10941_v62 = vld [vmem:[#allocation45_spill] sm:$0xff] }
 0x182   : > { %v1211_v15 = vsel %vm8875_vm9, %v10940_v51, %v1210_v47  ;;  %v1220_v21 = vsel %vm8875_vm9, %v1212_v3, %v1219_v14  ;;  %v990_v3 = vld [vmem:[#allocation2 + $0xd0] sm:$0x8]  ;;  %v10946_v14 = vld [vmem:[#allocation42_spill] sm:$0xff]  ;;  %7963 = vmatmul.mubr.msk.bf16.gmra.mrb[28].mxu1 %vm1454_vm1, %v7141_v42  ;;  %v1300_v42 = vrot.slane %v9328_v13, 4 }
 0x183   : > { %v1241_v20 = vor.u32 %v10937_v35, %v9236_v45  ;;  %v1254_v48 = vor.u32 %v10939_v27, %v9281_v22  ;;  %v10942_v45 = vld [vmem:[#allocation40_spill] sm:$0xff]  ;;  %v7017_v54 = vcombine.low %v1211_v15, %v1220_v21  ;;  %v1233_v39 = vsel %vm8875_vm9, %v10944_v4, %v1232_v24  ;;  %7863 = vmatmul.mubr.msk.bf16.gmra.mrb[44].mxu0 %vm1454_vm1, %v7015_v2  ;;  %v10958_v2 = vld [vmem:[#allocation50_spill] sm:$0xff] }
 0x184   : > { %v10943_v59 = vshll.u32 %v10942_v45, 16  ;;  %v1266_v21 = vshrl.u32 %v987_v40, 16  ;;  %7966 = vmatprep.mubr.msk.bf16.mxu1 %vm1454_vm1, %v7142_v55  ;;  %7866 = vmatprep.mubr.msk.bf16.mxu0 %vm1454_vm1, %v7016_v7  ;;  %v996_v15 = vld [vmem:[#allocation2 + $0xf0] sm:$0x8]  ;;  %v10963_v7 = vld [vmem:[#allocation53_spill] sm:$0xff] }
 0x185   : > { %v1242_v27 = vsel %vm8875_vm9, %v1234_v28, %v1241_v20  ;;  %v1255_v51 = vsel %vm8875_vm9, %v10945_v41, %v1254_v48  ;;  %v10948_v28 = vld [vmem:[#allocation43_spill] sm:$0xff]  ;;  %v1278_v41 = vrot.slane %v9301_v46, 4  ;;  %v10951_v48 = vld [vmem:[#allocation44_spill] sm:$0xff]  ;;  %v10964_v56 = vshll.u32 %v10963_v7, 16 }
 0x186   : > { %v1263_v35 = vor.u32 %v10943_v59, %v10941_v62  ;;  %v7018_v47 = vcombine.low %v1233_v39, %v1242_v27  ;;  %v10947_v62 = vld [vmem:[#allocation41_spill] sm:$0xff]  ;;  %v10949_v24 = vshll.u32 %v10948_v28, 16  ;;  %v10952_v45 = vshll.u32 %v10951_v48, 16  ;;  %v993_v39 = vld [vmem:[#allocation2 + $0xe0] sm:$0x8]  ;;  %v10961_v27 = vld [vmem:[#allocation51_spill] sm:$0xff] }
 0x187   : > { %v6966_v40 = vrot.slane %v1266_v21, 11  ;;  %v10959_v21 = vshll.u32 %v10958_v2, 16  ;;  %v1310_v55 = vshrl.u32 %v993_v39, 16  ;;  %v1320_v57 = vor.u32 %v10964_v56, %v10962_v26  ;;  %v10966_v2 = vld [vmem:[#allocation55_spill] sm:$0xff]  ;;  %v10968_v39 = vld [vmem:[#allocation57_spill] sm:$0xff] }
 0x188   : > { %v1264_v22 = vsel %vm8875_vm9, %v1256_v49, %v1263_v35  ;;  %v1276_v20 = vor.u32 %v10949_v24, %v9301_v46  ;;  %v1285_v59 = vor.u32 %v10952_v45, %v10950_v19  ;;  %v10953_v49 = vld [vmem:[#allocation47_spill] sm:$0xff]  ;;  %v10954_v35 = vld [vmem:[#allocation46_spill] sm:$0xff]  ;;  %v10960_v45 = vld [vmem:[#allocation52_spill] sm:$0xff]  ;;  %v1332_v7 = vshrl.u32 %v996_v15, 16 }
 0x189   : > { %v9654_v4 = vcombine.low %v1255_v51, %v1264_v22  ;;  %v1288_v51 = vshrl.u32 %v990_v3, 16  ;;  %v10955_v22 = vld [vmem:[#allocation48_spill] sm:$0xff]  ;;  %v10957_v19 = vld [vmem:[#allocation54_spill] sm:$0xff]  ;;  %v698_v56 = vld [vmem:[#allocation2 + $0xc] sm:$0x1] }
 0x18a   : > { %v10956_v46 = vshll.u32 %v10955_v22, 16  ;;  %v1286_v24 = vsel %vm8875_vm9, %v1278_v41, %v1285_v59  ;;  %v1307_v48 = vor.u32 %v10959_v21, %v10957_v19  ;;  %v1277_v22 = vsel %vm8875_vm9, %v6966_v40, %v1276_v20  ;;  %v10965_v19 = vld [vmem:[#allocation61_spill] sm:$0xff] }
 0x18b   : > { %v9688_v41 = vcombine.low %v1277_v22, %v1286_v24  ;;  %v1322_v59 = vrot.slane %v10962_v26, 4  ;;  %v10967_v21 = vshll.u32 %v10966_v2, 16  ;;  %v6968_v40 = vrot.slane %v1310_v55, 11  ;;  %v1933_v24 = vld [vmem:[#allocation2 + $0x4] sm:$0xf]  ;;  %v10972_v2 = vld [vmem:[#allocation65_spill] sm:$0xff]  ;;  %7867 = vmatmul.mubr.msk.bf16.gmra.mrb[48].mxu0 %vm1454_vm1, %v7017_v54 }
 0x18c   : > { %v1298_v28 = vor.u32 %v10956_v46, %v9328_v13  ;;  %v6967_v46 = vrot.slane %v1288_v51, 11  ;;  %v1308_v13 = vsel %vm8875_vm9, %v1300_v42, %v1307_v48  ;;  %v10969_v51 = vld [vmem:[#allocation56_spill] sm:$0xff]  ;;  %v10970_v42 = vld [vmem:[#allocation58_spill] sm:$0xff]  ;;  %v6969_v15 = vrot.slane %v1332_v7, 11  ;;  %7870 = vmatprep.mubr.msk.bf16.mxu0 %vm1454_vm1, %v7018_v47 }
 0x18d   : > { %v1329_v3 = vor.u32 %v10967_v21, %v10965_v19  ;;  %v10971_v48 = vshll.u32 %v10970_v42, 16  ;;  %v1321_v55 = vsel %vm8875_vm9, %v6968_v40, %v1320_v57  ;;  %v10973_v21 = vld [vmem:[#allocation60_spill] sm:$0xff]  ;;  %v1985_v44 = vshrl.u32 %v1933_v24, 16 }
 0x18e   : > { %v1299_v20 = vsel %vm8875_vm9, %v6967_v46, %v1298_v28  ;;  %v1344_v28 = vrot.slane %v9385_v61, 4  ;;  %v1934_v46 = vld [vmem:[#allocation2 + $0x8] sm:$0xf]  ;;  %v10974_v60 = vshll.u32 %v10973_v21, 16  ;;  %v10979_v57 = vcombine.low %v10916_v29, %v10915_v0 }
 0x18f   : > { %v9700_v22 = vcombine.low %v1299_v20, %v1308_v13  ;;  %v1330_v26 = vsel %vm8875_vm9, %v1322_v59, %v1329_v3  ;;  %v1342_v19 = vor.u32 %v10971_v48, %v9385_v61  ;;  %v10975_v13 = vld [vmem:[#allocation63_spill] sm:$0xff]  ;;  %v10976_v20 = vld [vmem:[#allocation62_spill] sm:$0xff]  ;;  %v10977_v59 = vld [vmem:[#allocation64_spill] sm:$0xff]  ;;  %v699_v61 = vsel %vm8870_vm8, 0, %v698_v56 }
 0x190   : > { %v1351_v10 = vor.u32 %v10974_v60, %v10972_v2  ;;  %v9715_v3 = vcombine.low %v1321_v55, %v1330_v26  ;;  %7967 = vmatmul.mubr.msk.bf16.gmra.mrb[0].mxu1 %vm1454_vm1, %v10979_v57  ;;  %700 = vst [vmem:[#allocation2 + $0xc] sm:$0x1] %v699_v61  ;;  %v1988_v7 = vshll.u32 %v1933_v24, 16  ;;  %v1994_v26 = vshll.u32 %v1934_v46, 16  ;;  %v1939_v2 = vld [vmem:[#allocation2 + $0x24] sm:$0xf] }
 0x191   : > { %v1343_v60 = vsel %vm8875_vm9, %v6969_v15, %v1342_v19  ;;  %v10980_v56 = vcombine.low %v10927_v1, %v10926_v50  ;;  %v1987_v0 = vrot.slane %v1985_v44, 4  ;;  %v1998_v54 = vshrl.u32 %v1934_v46, 16 }
 0x192   : > { %v1352_v40 = vsel %vm8875_vm9, %v1344_v28, %v1351_v10  ;;  %v2009_v55 = vshrl.u32 %v1936_v9, 16  ;;  %v1990_v19 = vrot.slane %v1988_v7, 5  ;;  %v1996_v15 = vrot.slane %v1994_v26, 5  ;;  %v1940_v28 = vld [vmem:[#allocation2 + $0x28] sm:$0xf] }
 0x193   : > { %7970 = vmatprep.mubr.msk.bf16.mxu1 %vm1454_vm1, %v10980_v56  ;;  %v9735_v29 = vcombine.low %v1343_v60, %v1352_v40  ;;  %v2012_v21 = vshll.u32 %v1936_v9, 16  ;;  %v2018_v10 = vshll.u32 %v1937_v63, 16  ;;  %v2000_v24 = vrot.slane %v1998_v54, 4  ;;  %7871 = vmatmul.mubr.msk.bf16.gmra.mrb[52].mxu0 %vm1454_vm1, %v9654_v4 }
 0x194   : > { %v2011_v61 = vrot.slane %v2009_v55, 4  ;;  %v2022_v57 = vshrl.u32 %v1937_v63, 16  ;;  %v7153_v50 = vcombine.low %v9400_v31, %v9415_v16  ;;  %v1991_v1 = vor.u32 %v1990_v19, %v1987_v0  ;;  %7874 = vmatprep.mubr.msk.bf16.mxu0 %vm1454_vm1, %v9688_v41 }
 0x195   : > { %v2014_v56 = vrot.slane %v2012_v21, 5  ;;  %v2020_v47 = vrot.slane %v2018_v10, 5  ;;  %v2033_v60 = vshrl.u32 %v1939_v2, 16  ;;  %v2001_v40 = vor.u32 %v2000_v24, %v1996_v15 }
 0x196   : > { %v2024_v44 = vrot.slane %v2022_v57, 4  ;;  %v2036_v46 = vshll.u32 %v1939_v2, 16  ;;  %v2042_v42 = vshll.u32 %v1940_v28, 16  ;;  %v1992_v18 = vrot.slane %v1991_v1, 4 }
 0x197   : > { %v2015_v7 = vor.u32 %v2014_v56, %v2011_v61  ;;  %v2035_v26 = vrot.slane %v2033_v60, 4  ;;  %v2046_v9 = vshrl.u32 %v1940_v28, 16  ;;  %v1935_v32 = vld [vmem:[#allocation2 + $0xc] sm:$0x1]  ;;  %v2002_v0 = vrot.slane %v2001_v40, 4 }
 0x198   : > { %v2025_v54 = vor.u32 %v2024_v44, %v2020_v47  ;;  %v2038_v55 = vrot.slane %v2036_v46, 5  ;;  %v2044_v19 = vrot.slane %v2042_v42, 5  ;;  %v10983_v2 = vcombine.low %v10934_v53, %v10933_v23  ;;  %v3719_v61 = vld [vmem:[#allocation2 + $0x18] sm:$0xf]  ;;  %v10985_v42 = vld [vmem:[#allocation11_spill] sm:$0xff]  ;;  %v10987_v44 = vld [vmem:[#allocation14_spill] sm:$0xff] }
 0x199   : > { %v1997_v21 = vsel %vm9741_vm12, %v1992_v18, %v1996_v15  ;;  %v2004_v10 = vshll.u32 %v1935_v32, 16  ;;  %v2016_v28 = vrot.slane %v2015_v7, 4  ;;  %v2048_v24 = vrot.slane %v2046_v9, 4  ;;  %v3720_v15 = vld [vmem:[#allocation2 + $0x1c] sm:$0x1] }
 0x19a   : > { %7971 = vmatmul.mubr.msk.bf16.gmra.mrb[4].mxu1 %vm1454_vm1, %v10983_v2  ;;  %v10984_v57 = vcombine.low %v9228_v37, %v9246_v34  ;;  %v2026_v23 = vrot.slane %v2025_v54, 4  ;;  %v2039_v53 = vor.u32 %v2038_v55, %v2035_v26  ;;  %v10986_v1 = vshll.u32 %v10985_v42, 16  ;;  %v765_v7 = vld [vmem:[#allocation2 + $0x3c] sm:$0x1]  ;;  %v1942_v2 = vld [vmem:[#allocation2 + $0x34] sm:$0xf] }
 0x19b   : > { %v3767_v56 = vshrl.u32 %v3718_v30, 16  ;;  %v2006_v60 = vrot.slane %v2004_v10, 5  ;;  %v2021_v32 = vsel %vm9741_vm12, %v2016_v28, %v2020_v47  ;;  %v2049_v18 = vor.u32 %v2048_v24, %v2044_v19  ;;  %v1943_v24 = vld [vmem:[#allocation2 + $0x38] sm:$0xf]  ;;  %v3721_v42 = vld [vmem:[#allocation2 + $0x24] sm:$0xf]  ;;  %7875 = vmatmul.mubr.msk.bf16.gmra.mrb[56].mxu0 %vm1454_vm1, %v9700_v22 }
 0x19c   : > { %7974 = vmatprep.mubr.msk.bf16.mxu1 %vm1454_vm1, %v10984_v57  ;;  %v2054_v4 = vrot.slane %v10986_v1, 5  ;;  %v3770_v40 = vshll.u32 %v3718_v30, 16  ;;  %v2031_v37 = vsel %vm9741_vm12, %v2026_v23, %v10987_v44  ;;  %v2040_v34 = vrot.slane %v2039_v53, 4  ;;  %7878 = vmatprep.mubr.msk.bf16.mxu0 %vm1454_vm1, %v9715_v3 }
 0x19d   : > { %v3769_v46 = vrot.slane %v3767_v56, 4  ;;  %v3776_v41 = vshll.u32 %v3719_v61, 16  ;;  %v2007_v26 = vsel %vm9741_vm12, %v2002_v0, %v2006_v60  ;;  %v9768_v9 = vcombine.low %v2021_v32, %v2031_v37  ;;  %v3723_v37 = vld [vmem:[#allocation2 + $0x2c] sm:$0x1] }
 0x19e   : > { %v2050_v54 = vrot.slane %v2049_v18, 4  ;;  %v3772_v55 = vrot.slane %v3770_v40, 5  ;;  %v9770_v47 = vcombine.low %v1997_v21, %v2007_v26  ;;  %v2045_v30 = vsel %vm9741_vm12, %v2040_v34, %v2044_v19  ;;  %v768_v26 = vld [vmem:[#allocation2 + $0x4c] sm:$0x1] }
 0x19f   : > { %v3778_v10 = vrot.slane %v3776_v41, 5  ;;  %v3780_v28 = vshrl.u32 %v3719_v61, 16  ;;  %v3786_v53 = vshll.u32 %v3720_v15, 16  ;;  %v766_v0 = vsel %vm8870_vm8, 0, %v765_v7  ;;  %v3722_v15 = vld [vmem:[#allocation2 + $0x28] sm:$0xf] }
 0x1a0   : > { %v2055_v57 = vsel %vm9741_vm12, %v2050_v54, %v2054_v4  ;;  %v3773_v23 = vor.u32 %v3772_v55, %v3769_v46  ;;  %767 = vst [vmem:[#allocation2 + $0x3c] sm:$0x1] %v766_v0  ;;  %v2057_v21 = vshrl.u32 %v1942_v2, 16  ;;  %v2060_v60 = vshll.u32 %v1942_v2, 16  ;;  %v1946_v0 = vld [vmem:[#allocation2 + $0x48] sm:$0xf] }
 0x1a1   : > { %v9778_v1 = vcombine.low %v2045_v30, %v2055_v57  ;;  %v3782_v56 = vrot.slane %v3780_v28, 4  ;;  %v10988_v19 = vcombine.low %v10947_v62, %v10946_v14  ;;  %v3788_v4 = vrot.slane %v3786_v53, 5 }
 0x1a2   : > { %v3774_v61 = vrot.slane %v3773_v23, 4  ;;  %v2066_v32 = vshll.u32 %v1943_v24, 16  ;;  %v2070_v18 = vshrl.u32 %v1943_v24, 16  ;;  %v10989_v40 = vcombine.low %v10954_v35, %v10953_v49  ;;  %v1945_v24 = vld [vmem:[#allocation2 + $0x44] sm:$0xf] }
 0x1a3   : > { %7975 = vmatmul.mubr.msk.bf16.gmra.mrb[8].mxu1 %vm1454_vm1, %v10988_v19  ;;  %v3783_v44 = vor.u32 %v3782_v56, %v3778_v10  ;;  %v2059_v14 = vrot.slane %v2057_v21, 4  ;;  %v2062_v62 = vrot.slane %v2060_v60, 5  ;;  %v3791_v34 = vshrl.u32 %v3721_v42, 16  ;;  %7879 = vmatmul.mubr.msk.bf16.gmra.mrb[60].mxu0 %vm1454_vm1, %v9735_v29 }
 0x1a4   : > { %7978 = vmatprep.mubr.msk.bf16.mxu1 %vm1454_vm1, %v10989_v40  ;;  %v3779_v22 = vsel %vm9741_vm12, %v3774_v61, %v3778_v10  ;;  %v2068_v46 = vrot.slane %v2066_v32, 5  ;;  %v2072_v41 = vrot.slane %v2070_v18, 4  ;;  %v3794_v7 = vshll.u32 %v3721_v42, 16  ;;  %v3724_v61 = vld [vmem:[#allocation2 + $0x34] sm:$0xf]  ;;  %7886 = vmatprep.mubr.msk.bf16.mxu0 %vm1454_vm1, %v9770_v47 }
 0x1a5   : > { %v3784_v54 = vrot.slane %v3783_v44, 4  ;;  %v2063_v55 = vor.u32 %v2062_v62, %v2059_v14  ;;  %v3793_v49 = vrot.slane %v3791_v34, 4  ;;  %v3800_v35 = vshll.u32 %v3722_v15, 16 }
 0x1a6   : > { %v2073_v2 = vor.u32 %v2072_v41, %v2068_v46  ;;  %v3796_v30 = vrot.slane %v3794_v7, 5  ;;  %v3804_v28 = vshrl.u32 %v3722_v15, 16  ;;  %v3810_v3 = vshll.u32 %v3723_v37, 16 }
 0x1a7   : > { %v3789_v57 = vsel %vm9741_vm12, %v3784_v54, %v3788_v4  ;;  %v2064_v23 = vrot.slane %v2063_v55, 4  ;;  %v3802_v53 = vrot.slane %v3800_v35, 5  ;;  %v769_v10 = vsel %vm8870_vm8, 0, %v768_v26  ;;  %v1944_v56 = vld [vmem:[#allocation2 + $0x3c] sm:$0x1] }
 0x1a8   : > { %v9798_v42 = vcombine.low %v3779_v22, %v3789_v57  ;;  %v2074_v21 = vrot.slane %v2073_v2, 4  ;;  %v3797_v60 = vor.u32 %v3796_v30, %v3793_v49  ;;  %v3806_v19 = vrot.slane %v3804_v28, 4  ;;  %770 = vst [vmem:[#allocation2 + $0x4c] sm:$0x1] %v769_v10 }
 0x1a9   : > { %v2069_v32 = vsel %vm9741_vm12, %v2064_v23, %v2068_v46  ;;  %v2076_v18 = vshll.u32 %v1944_v56, 16  ;;  %v3812_v15 = vrot.slane %v3810_v3, 5  ;;  %v2081_v4 = vshrl.u32 %v1945_v24, 16  ;;  %v771_v3 = vld [vmem:[#allocation2 + $0x5c] sm:$0x1] }
 0x1aa   : > { %v10990_v40 = vcombine.low %v10961_v27, %v10960_v45  ;;  %v3798_v44 = vrot.slane %v3797_v60, 4  ;;  %v3807_v14 = vor.u32 %v3806_v19, %v3802_v53  ;;  %v2084_v62 = vshll.u32 %v1945_v24, 16  ;;  %v3725_v45 = vld [vmem:[#allocation2 + $0x38] sm:$0xf] }
 0x1ab   : > { %v2090_v37 = vshll.u32 %v1946_v0, 16  ;;  %v10991_v34 = vcombine.low %v10969_v51, %v10968_v39  ;;  %v2078_v22 = vrot.slane %v2076_v18, 5  ;;  %v2083_v46 = vrot.slane %v2081_v4, 4  ;;  %v3726_v51 = vld [vmem:[#allocation2 + $0x3c] sm:$0x1]  ;;  %7887 = vmatmul.mubr.msk.bf16.vlgmr.msra.gmra.mrb[32].mxu0 %vm1454_vm1, %v9768_v9 }
 0x1ac   : > { %7979 = vmatmul.mubr.msk.bf16.gmra.mrb[12].mxu1 %vm1454_vm1, %v10990_v40  ;;  %v2094_v27 = vshrl.u32 %v1946_v0, 16  ;;  %v3815_v41 = vshrl.u32 %v3724_v61, 16  ;;  %v3803_v29 = vsel %vm9741_vm12, %v3798_v44, %v3802_v53  ;;  %v3808_v7 = vrot.slane %v3807_v14, 4  ;;  %v1948_v0 = vld [vmem:[#allocation2 + $0x54] sm:$0xf]  ;;  %7890 = vmatprep.mubr.msk.bf16.mxu0 %vm1454_vm1, %v9778_v1 }
 0x1ad   : > { %7982 = vmatprep.mubr.msk.bf16.mxu1 %vm1454_vm1, %v10991_v34  ;;  %v2086_v26 = vrot.slane %v2084_v62, 5  ;;  %v2092_v54 = vrot.slane %v2090_v37, 5  ;;  %v2079_v55 = vsel %vm9741_vm12, %v2074_v21, %v2078_v22  ;;  %v3818_v35 = vshll.u32 %v3724_v61, 16  ;;  %v1949_v61 = vld [vmem:[#allocation2 + $0x58] sm:$0xf]  ;;  %7919 = vmatpush3.bf16.msra.mxu0 %v9508_v25 }
 0x1ae   : > { %v2096_v39 = vrot.slane %v2094_v27, 4  ;;  %v3817_v49 = vrot.slane %v3815_v41, 4  ;;  %v9818_v2 = vcombine.low %v2069_v32, %v2079_v55  ;;  %v3813_v47 = vsel %vm9741_vm12, %v3808_v7, %v3812_v15  ;;  %v3727_v40 = vld [vmem:[#allocation2 + $0x44] sm:$0xf]  ;;  %v8577_v55 = vld [vmem:[%s10744_s2 + $0x38] sm:$0xff]  }
 0x1af   : > { %v2087_v30 = vor.u32 %v2086_v26, %v2083_v46  ;;  %v3824_v28 = vshll.u32 %v3725_v45, 16  ;;  %v9822_v24 = vcombine.low %v3803_v29, %v3813_v47  ;;  %v1947_v57 = vld [vmem:[#allocation2 + $0x4c] sm:$0x1]  ;;  %v3820_v53 = vrot.slane %v3818_v35, 5  ;;  %v3728_v29 = vld [vmem:[#allocation2 + $0x48] sm:$0xf]  ;;  %7920 = vmatprep.subr.bf16.mxu0 %v8577_v55 }
 0x1b0   : > { %v2097_v23 = vor.u32 %v2096_v39, %v2092_v54  ;;  %v3828_v10 = vshrl.u32 %v3725_v45, 16  ;;  %v2100_v21 = vshll.u32 %v1947_v57, 16  ;;  %v3834_v19 = vshll.u32 %v3726_v51, 16  ;;  %v3729_v1 = vld [vmem:[#allocation2 + $0x4c] sm:$0x1] }
 0x1b1   : > { %v2088_v56 = vrot.slane %v2087_v30, 4  ;;  %v3826_v60 = vrot.slane %v3824_v28, 5  ;;  %v3821_v18 = vor.u32 %v3820_v53, %v3817_v49  ;;  %v772_v15 = vsel %vm8870_vm8, 0, %v771_v3  ;;  %v774_v47 = vld [vmem:[#allocation2 + $0x6c] sm:$0x1]  ;;  %7921 = vmatpush3.bf16.msra.mxu0 %v8577_v55 }
 0x1b2   : > { %v2098_v32 = vrot.slane %v2097_v23, 4  ;;  %v3830_v4 = vrot.slane %v3828_v10, 4  ;;  %v10992_v44 = vcombine.low %v10976_v20, %v10975_v13  ;;  %v2102_v62 = vrot.slane %v2100_v21, 5  ;;  %773 = vst [vmem:[#allocation2 + $0x5c] sm:$0x1] %v772_v15  ;;  %8134 = vmatprep.subr.bf16.mxu0 %v8558_v11 }
 0x1b3   : > { %v2093_v14 = vsel %vm9741_vm12, %v2088_v56, %v2092_v54  ;;  %v3836_v37 = vrot.slane %v3834_v19, 5  ;;  %v2105_v34 = vshrl.u32 %v1948_v0, 16  ;;  %v10993_v22 = vcombine.low %v10977_v59, %v9394_v43  ;;  %v1952_v56 = vld [vmem:[#allocation2 + $0x68] sm:$0xf]  ;;  %7891 = vmatmul.mubr.msk.bf16.gmra.mrb[36].mxu0 %vm1454_vm1, %v9818_v2 }
 0x1b4   : > { %7983 = vmatmul.mubr.msk.bf16.gmra.mrb[16].mxu1 %vm1454_vm1, %v10992_v44  ;;  %v3822_v13 = vrot.slane %v3821_v18, 4  ;;  %v3831_v20 = vor.u32 %v3830_v4, %v3826_v60  ;;  %v2108_v46 = vshll.u32 %v1948_v0, 16  ;;  %v2114_v27 = vshll.u32 %v1949_v61, 16  ;;  %v1951_v0 = vld [vmem:[#allocation2 + $0x64] sm:$0xf] }
 0x1b5   : > { %7986 = vmatprep.mubr.msk.bf16.mxu1 %vm1454_vm1, %v10993_v22  ;;  %v2103_v9 = vsel %vm9741_vm12, %v2098_v32, %v2102_v62  ;;  %v2107_v45 = vrot.slane %v2105_v34, 4  ;;  %v2118_v41 = vshrl.u32 %v1949_v61, 16  ;;  %v3839_v7 = vshrl.u32 %v3727_v40, 16  ;;  %v3730_v44 = vld [vmem:[#allocation2 + $0x54] sm:$0xf] }
 0x1b6   : > { %v7050_v26 = vcombine.low %v2093_v14, %v2103_v9  ;;  %v3827_v43 = vsel %vm9741_vm12, %v3822_v13, %v3826_v60  ;;  %v3832_v59 = vrot.slane %v3831_v20, 4  ;;  %v2110_v54 = vrot.slane %v2108_v46, 5  ;;  %v3731_v46 = vld [vmem:[#allocation2 + $0x58] sm:$0xf] }
 0x1b7   : > { %v2116_v39 = vrot.slane %v2114_v27, 5  ;;  %v2120_v51 = vrot.slane %v2118_v41, 4  ;;  %v3841_v49 = vrot.slane %v3839_v7, 4  ;;  %v3842_v35 = vshll.u32 %v3727_v40, 16  ;;  %v777_v7 = vld [vmem:[#allocation2 + $0x7c] sm:$0x1] }
 0x1b8   : > { %v3837_v25 = vsel %vm9741_vm12, %v3832_v59, %v3836_v37  ;;  %v2111_v30 = vor.u32 %v2110_v54, %v2107_v45  ;;  %v3848_v28 = vshll.u32 %v3728_v29, 16  ;;  %v3852_v3 = vshrl.u32 %v3728_v29, 16  ;;  %7894 = vmatprep.mubr.msk.bf16.mxu0 %vm1454_vm1, %v7050_v26 }
 0x1b9   : > { %v9850_v57 = vcombine.low %v3827_v43, %v3837_v25  ;;  %v2121_v23 = vor.u32 %v2120_v51, %v2116_v39  ;;  %v3844_v53 = vrot.slane %v3842_v35, 5  ;;  %v3858_v10 = vshll.u32 %v3729_v1, 16  ;;  %v1950_v21 = vld [vmem:[#allocation2 + $0x5c] sm:$0x1]  ;;  %v1954_v1 = vld [vmem:[#allocation2 + $0x74] sm:$0xf] }
 0x1ba   : > { %v2112_v60 = vrot.slane %v2111_v30, 4  ;;  %v3850_v19 = vrot.slane %v3848_v28, 5  ;;  %v3854_v61 = vrot.slane %v3852_v3, 4  ;;  %v775_v32 = vsel %vm8870_vm8, 0, %v774_v47  ;;  %v3732_v29 = vld [vmem:[#allocation2 + $0x5c] sm:$0x1] }
 0x1bb   : > { %v2122_v18 = vrot.slane %v2121_v23, 4  ;;  %v2124_v4 = vshll.u32 %v1950_v21, 16  ;;  %v3845_v15 = vor.u32 %v3844_v53, %v3841_v49  ;;  %v3860_v40 = vrot.slane %v3858_v10, 5  ;;  %776 = vst [vmem:[#allocation2 + $0x6c] sm:$0x1] %v775_v32  ;;  %v8537_v47 = vld [vmem:[%s10744_s2 + $0x68] sm:$0xff]  }
 0x1bc   : > { %7987 = vmatmul.mubr.msk.bf16.gmra.mrb[20].mxu1 %vm1454_vm1, %v7153_v50  ;;  %v2117_v14 = vsel %vm9741_vm12, %v2112_v60, %v2116_v39  ;;  %v3855_v31 = vor.u32 %v3854_v61, %v3850_v19  ;;  %v2129_v16 = vshrl.u32 %v1951_v0, 16  ;;  %v2132_v50 = vshll.u32 %v1951_v0, 16  ;;  %v1955_v35 = vld [vmem:[#allocation2 + $0x78] sm:$0xf]  ;;  %v3733_v21 = vld [vmem:[#allocation2 + $0x64] sm:$0xf] }
 0x1bd   : > { %7994 = vmatprep.mubr.msk.bf16.mxu1 %vm1454_vm1, %v9798_v42  ;;  %v2126_v62 = vrot.slane %v2124_v4, 5  ;;  %v3846_v37 = vrot.slane %v3845_v15, 4  ;;  %v2138_v2 = vshll.u32 %v1952_v56, 16  ;;  %v2142_v34 = vshrl.u32 %v1952_v56, 16 }
 0x1be   : > { %v3856_v22 = vrot.slane %v3855_v31, 4  ;;  %v2131_v13 = vrot.slane %v2129_v16, 4  ;;  %v2134_v20 = vrot.slane %v2132_v50, 5  ;;  %v3863_v27 = vshrl.u32 %v3730_v44, 16  ;;  %v3734_v31 = vld [vmem:[#allocation2 + $0x68] sm:$0xf] }
 0x1bf   : > { %v2127_v42 = vsel %vm9741_vm12, %v2122_v18, %v2126_v62  ;;  %v3851_v9 = vsel %vm9741_vm12, %v3846_v37, %v3850_v19  ;;  %v2140_v45 = vrot.slane %v2138_v2, 5  ;;  %v2144_v41 = vrot.slane %v2142_v34, 4 }
 0x1c0   : > { %v7051_v26 = vcombine.low %v2117_v14, %v2127_v42  ;;  %v3861_v43 = vsel %vm9741_vm12, %v3856_v22, %v3860_v40  ;;  %v2135_v59 = vor.u32 %v2134_v20, %v2131_v13  ;;  %v3865_v54 = vrot.slane %v3863_v27, 4  ;;  %v8538_v40 = vld [vmem:[%s10744_s2 + $0x70] sm:$0xff]  }
 0x1c1   : > { %v7179_v55 = vcombine.low %v3851_v9, %v3861_v43  ;;  %v2145_v39 = vor.u32 %v2144_v41, %v2140_v45  ;;  %v3866_v51 = vshll.u32 %v3730_v44, 16  ;;  %v3872_v49 = vshll.u32 %v3731_v46, 16 }
 0x1c2   : > { %v1953_v25 = vld [vmem:[#allocation2 + $0x6c] sm:$0x1]  ;;  %v2136_v30 = vrot.slane %v2135_v59, 4  ;;  %v3876_v28 = vshrl.u32 %v3731_v46, 16  ;;  %v3882_v3 = vshll.u32 %v3732_v29, 16  ;;  %v778_v23 = vsel %vm8870_vm8, 0, %v777_v7  ;;  %7895 = vmatmul.mubr.msk.bf16.gmra.mrb[40].mxu0 %vm1454_vm1, %v7051_v26 }
 0x1c3   : > { %v2146_v53 = vrot.slane %v2145_v39, 4  ;;  %v2148_v10 = vshll.u32 %v1953_v25, 16  ;;  %v3868_v0 = vrot.slane %v3866_v51, 5  ;;  %v3874_v56 = vrot.slane %v3872_v49, 5  ;;  %779 = vst [vmem:[#allocation2 + $0x7c] sm:$0x1] %v778_v23 }
 0x1c4   : > { %7995 = vmatmul.mubr.msk.bf16.vlgmr.msra.gmra.mrb[24].mxu1 %vm1454_vm1, %v9822_v24  ;;  %v2141_v60 = vsel %vm9741_vm12, %v2136_v30, %v2140_v45  ;;  %v3878_v19 = vrot.slane %v3876_v28, 4  ;;  %v3884_v61 = vrot.slane %v3882_v3, 5  ;;  %v2153_v32 = vshrl.u32 %v1954_v1, 16  ;;  %v3735_v2 = vld [vmem:[#allocation2 + $0x6c] sm:$0x1] }
 0x1c5   : > { %8027 = vmatpush3.bf16.msra.mxu1 %v9619_v8  ;;  %7998 = vmatprep.mubr.msk.bf16.mxu1 %vm1454_vm1, %v9850_v57  ;;  %v2150_v24 = vrot.slane %v2148_v10, 5  ;;  %v3869_v18 = vor.u32 %v3868_v0, %v3865_v54  ;;  %v2156_v4 = vshll.u32 %v1954_v1, 16  ;;  %v2162_v15 = vshll.u32 %v1955_v35, 16  ;;  %v780_v45 = vld [vmem:[#allocation2 + $0x8c] sm:$0x1] }
 0x1c6   : > { %8028 = vmatprep.subr.bf16.mxu1 %v8537_v47  ;;  %v3879_v44 = vor.u32 %v3878_v19, %v3874_v56  ;;  %v2155_v8 = vrot.slane %v2153_v32, 4  ;;  %v2166_v14 = vshrl.u32 %v1955_v35, 16  ;;  %v3887_v57 = vshrl.u32 %v3733_v21, 16  ;;  %v1957_v59 = vld [vmem:[#allocation2 + $0x84] sm:$0xf] }
 0x1c7   : > { %v2151_v16 = vsel %vm9741_vm12, %v2146_v53, %v2150_v24  ;;  %v3870_v50 = vrot.slane %v3869_v18, 4  ;;  %v2158_v62 = vrot.slane %v2156_v4, 5  ;;  %v2164_v37 = vrot.slane %v2162_v15, 5  ;;  %v1958_v49 = vld [vmem:[#allocation2 + $0x88] sm:$0xf] }
 0x1c8   : > { %v7052_v34 = vcombine.low %v2141_v60, %v2151_v16  ;;  %v3880_v22 = vrot.slane %v3879_v44, 4  ;;  %v2168_v13 = vrot.slane %v2166_v14, 4  ;;  %v3889_v20 = vrot.slane %v3887_v57, 4  ;;  %v3736_v28 = vld [vmem:[#allocation2 + $0x74] sm:$0xf] }
 0x1c9   : > { %8029 = vmatpush3.bf16.msra.mxu1 %v8537_v47  ;;  %v3875_v46 = vsel %vm9741_vm12, %v3870_v50, %v3874_v56  ;;  %v2159_v27 = vor.u32 %v2158_v62, %v2155_v8  ;;  %v3890_v42 = vshll.u32 %v3733_v21, 16  ;;  %v3896_v9 = vshll.u32 %v3734_v31, 16  ;;  %v3737_v32 = vld [vmem:[#allocation2 + $0x78] sm:$0xf]  ;;  %v783_v16 = vld [vmem:[#allocation2 + $0x9c] sm:$0x1] }
 0x1ca   : > { %8062 = vmatprep.subr.bf16.mxu1 %v8538_v40  ;;  %7898 = vmatprep.mubr.msk.bf16.mxu0 %vm1454_vm1, %v7052_v34  ;;  %v3885_v41 = vsel %vm9741_vm12, %v3880_v22, %v3884_v61  ;;  %v1956_v29 = vld [vmem:[#allocation2 + $0x7c] sm:$0x1]  ;;  %v2169_v7 = vor.u32 %v2168_v13, %v2164_v37  ;;  %v3900_v26 = vshrl.u32 %v3734_v31, 16  ;;  %v3906_v43 = vshll.u32 %v3735_v2, 16  ;;  %v1960_v34 = vld [vmem:[#allocation2 + $0x94] sm:$0xf] }
 0x1cb   : > { %v7180_v54 = vcombine.low %v3875_v46, %v3885_v41  ;;  %v2160_v1 = vrot.slane %v2159_v27, 4  ;;  %v2172_v39 = vshll.u32 %v1956_v29, 16  ;;  %v3892_v51 = vrot.slane %v3890_v42, 5  ;;  %v3738_v44 = vld [vmem:[#allocation2 + $0x7c] sm:$0x1] }
 0x1cc   : > { %7999 = vmatmul.mubr.msk.bf16.gmra.mrb[28].mxu1 %vm1454_vm1, %v7179_v55  ;;  %v2170_v35 = vrot.slane %v2169_v7, 4  ;;  %v3898_v47 = vrot.slane %v3896_v9, 5  ;;  %v3902_v25 = vrot.slane %v3900_v26, 4  ;;  %v3908_v30 = vrot.slane %v3906_v43, 5  ;;  %v1961_v27 = vld [vmem:[#allocation2 + $0x98] sm:$0xf] }
 0x1cd   : > { %8002 = vmatprep.mubr.msk.bf16.mxu1 %vm1454_vm1, %v7180_v54  ;;  %v2165_v3 = vsel %vm9741_vm12, %v2160_v1, %v2164_v37  ;;  %v2174_v23 = vrot.slane %v2172_v39, 5  ;;  %v3893_v53 = vor.u32 %v3892_v51, %v3889_v20  ;;  %v781_v55 = vsel %vm8870_vm8, 0, %v780_v45  ;;  %v3739_v29 = vld [vmem:[#allocation2 + $0x84] sm:$0xf] }
 0x1ce   : > { %v3903_v10 = vor.u32 %v3902_v25, %v3898_v47  ;;  %782 = vst [vmem:[#allocation2 + $0x8c] sm:$0x1] %v781_v55  ;;  %v2177_v0 = vshrl.u32 %v1957_v59, 16  ;;  %v2180_v56 = vshll.u32 %v1957_v59, 16  ;;  %v2186_v21 = vshll.u32 %v1958_v49, 16 }
 0x1cf   : > { %v2175_v60 = vsel %vm9741_vm12, %v2170_v35, %v2174_v23  ;;  %v3894_v19 = vrot.slane %v3893_v53, 4  ;;  %v2190_v61 = vshrl.u32 %v1958_v49, 16  ;;  %v3911_v24 = vshrl.u32 %v3736_v28, 16 }
 0x1d0   : > { %v7053_v18 = vcombine.low %v2165_v3, %v2175_v60  ;;  %v3904_v4 = vrot.slane %v3903_v10, 4  ;;  %v2179_v15 = vrot.slane %v2177_v0, 4  ;;  %v2182_v40 = vrot.slane %v2180_v56, 5  ;;  %v3740_v56 = vld [vmem:[#allocation2 + $0x88] sm:$0xf] }
 0x1d1   : > { %v3899_v8 = vsel %vm9741_vm12, %v3894_v19, %v3898_v47  ;;  %v2188_v14 = vrot.slane %v2186_v21, 5  ;;  %v2192_v31 = vrot.slane %v2190_v61, 4  ;;  %v3913_v57 = vrot.slane %v3911_v24, 4 }
 0x1d2   : > { %7899 = vmatmul.mubr.msk.bf16.gmra.mrb[44].mxu0 %vm1454_vm1, %v7053_v18  ;;  %v3909_v50 = vsel %vm9741_vm12, %v3904_v4, %v3908_v30  ;;  %v2183_v62 = vor.u32 %v2182_v40, %v2179_v15  ;;  %v3914_v37 = vshll.u32 %v3736_v28, 16  ;;  %v3920_v2 = vshll.u32 %v3737_v32, 16 }
 0x1d3   : > { %v7181_v22 = vcombine.low %v3899_v8, %v3909_v50  ;;  %v2193_v13 = vor.u32 %v2192_v31, %v2188_v14  ;;  %v3924_v20 = vshrl.u32 %v3737_v32, 16  ;;  %v3930_v46 = vshll.u32 %v3738_v44, 16  ;;  %v786_v44 = vld [vmem:[#allocation2 + $0xac] sm:$0x1]  ;;  %v1963_v8 = vld [vmem:[#allocation2 + $0xa4] sm:$0xf] }
 0x1d4   : > { %v2184_v42 = vrot.slane %v2183_v62, 4  ;;  %v3916_v9 = vrot.slane %v3914_v37, 5  ;;  %v3922_v45 = vrot.slane %v3920_v2, 5  ;;  %v784_v41 = vsel %vm8870_vm8, 0, %v783_v16 }
 0x1d5   : > { %8003 = vmatmul.mubr.msk.bf16.gmra.mrb[0].mxu1 %vm1454_vm1, %v7181_v22  ;;  %v1959_v7 = vld [vmem:[#allocation2 + $0x8c] sm:$0x1]  ;;  %v2194_v26 = vrot.slane %v2193_v13, 4  ;;  %v3926_v43 = vrot.slane %v3924_v20, 4  ;;  %v3932_v59 = vrot.slane %v3930_v46, 5  ;;  %v2201_v54 = vshrl.u32 %v1960_v34, 16 }
 0x1d6   : > { %785 = vst [vmem:[#allocation2 + $0x9c] sm:$0x1] %v784_v41  ;;  %v2189_v1 = vsel %vm9741_vm12, %v2184_v42, %v2188_v14  ;;  %v2196_v39 = vshll.u32 %v1959_v7, 16  ;;  %v3917_v51 = vor.u32 %v3916_v9, %v3913_v57  ;;  %v2204_v49 = vshll.u32 %v1960_v34, 16  ;;  %v3741_v32 = vld [vmem:[#allocation2 + $0x8c] sm:$0x1] }
 0x1d7   : > { %v3927_v35 = vor.u32 %v3926_v43, %v3922_v45  ;;  %v2203_v47 = vrot.slane %v2201_v54, 4  ;;  %v2210_v25 = vshll.u32 %v1961_v27, 16  ;;  %v2214_v30 = vshrl.u32 %v1961_v27, 16  ;;  %v1964_v22 = vld [vmem:[#allocation2 + $0xa8] sm:$0xf] }
 0x1d8   : > { %v2198_v28 = vrot.slane %v2196_v39, 5  ;;  %v3918_v3 = vrot.slane %v3917_v51, 4  ;;  %v2206_v23 = vrot.slane %v2204_v49, 5  ;;  %v3935_v53 = vshrl.u32 %v3739_v29, 16  ;;  %v3742_v42 = vld [vmem:[#allocation2 + $0x94] sm:$0xf] }
 0x1d9   : > { %v3928_v55 = vrot.slane %v3927_v35, 4  ;;  %v2212_v10 = vrot.slane %v2210_v25, 5  ;;  %v2216_v0 = vrot.slane %v2214_v30, 4  ;;  %v3938_v21 = vshll.u32 %v3739_v29, 16  ;;  %v3743_v54 = vld [vmem:[#allocation2 + $0x98] sm:$0xf] }
 0x1da   : > { %v2199_v60 = vsel %vm9741_vm12, %v2194_v26, %v2198_v28  ;;  %v3923_v19 = vsel %vm9741_vm12, %v3918_v3, %v3922_v45  ;;  %v2207_v61 = vor.u32 %v2206_v23, %v2203_v47  ;;  %v3937_v24 = vrot.slane %v3935_v53, 4 }
 0x1db   : > { %v7054_v18 = vcombine.low %v2189_v1, %v2199_v60  ;;  %v3933_v4 = vsel %vm9741_vm12, %v3928_v55, %v3932_v59  ;;  %v2217_v15 = vor.u32 %v2216_v0, %v2212_v10  ;;  %v3940_v40 = vrot.slane %v3938_v21, 5 }
 0x1dc   : > { %v7182_v14 = vcombine.low %v3923_v19, %v3933_v4  ;;  %v2208_v57 = vrot.slane %v2207_v61, 4  ;;  %v3944_v16 = vshll.u32 %v3740_v56, 16  ;;  %v3948_v50 = vshrl.u32 %v3740_v56, 16  ;;  %v1966_v19 = vld [vmem:[#allocation2 + $0xb4] sm:$0xf] }
 0x1dd   : > { %v1962_v31 = vld [vmem:[#allocation2 + $0x9c] sm:$0x1]  ;;  %7902 = vmatprep.mubr.msk.bf16.mxu0 %vm1454_vm1, %v7054_v18  ;;  %v2218_v62 = vrot.slane %v2217_v15, 4  ;;  %v3941_v2 = vor.u32 %v3940_v40, %v3937_v24  ;;  %v3954_v34 = vshll.u32 %v3741_v32, 16  ;;  %v787_v27 = vsel %vm8870_vm8, 0, %v786_v44 }
 0x1de   : > { %v2220_v37 = vshll.u32 %v1962_v31, 16  ;;  %8006 = vmatprep.mubr.msk.bf16.mxu1 %vm1454_vm1, %v7182_v14  ;;  %v2213_v13 = vsel %vm9741_vm12, %v2208_v57, %v2212_v10  ;;  %v3946_v20 = vrot.slane %v3944_v16, 5  ;;  %v3950_v46 = vrot.slane %v3948_v50, 4  ;;  %788 = vst [vmem:[#allocation2 + $0xac] sm:$0x1] %v787_v27 }
 0x1df   : > { %v3942_v45 = vrot.slane %v3941_v2, 4  ;;  %v3956_v41 = vrot.slane %v3954_v34, 5  ;;  %v2225_v29 = vshrl.u32 %v1963_v8, 16  ;;  %v2228_v26 = vshll.u32 %v1963_v8, 16  ;;  %v3744_v49 = vld [vmem:[#allocation2 + $0x9c] sm:$0x1] }
 0x1e0   : > { %v2222_v9 = vrot.slane %v2220_v37, 5  ;;  %v3951_v7 = vor.u32 %v3950_v46, %v3946_v20  ;;  %v2234_v43 = vshll.u32 %v1964_v22, 16  ;;  %v2238_v59 = vshrl.u32 %v1964_v22, 16  ;;  %v789_v10 = vld [vmem:[#allocation2 + $0xbc] sm:$0x1] }
 0x1e1   : > { %v3947_v39 = vsel %vm9741_vm12, %v3942_v45, %v3946_v20  ;;  %v2227_v51 = vrot.slane %v2225_v29, 4  ;;  %v3959_v35 = vshrl.u32 %v3742_v42, 16  ;;  %v2230_v30 = vrot.slane %v2228_v26, 5  ;;  %v1967_v4 = vld [vmem:[#allocation2 + $0xb8] sm:$0xf] }
 0x1e2   : > { %v2223_v1 = vsel %vm9741_vm12, %v2218_v62, %v2222_v9  ;;  %v3952_v25 = vrot.slane %v3951_v7, 4  ;;  %v2236_v28 = vrot.slane %v2234_v43, 5  ;;  %v2240_v3 = vrot.slane %v2238_v59, 4  ;;  %v3745_v62 = vld [vmem:[#allocation2 + $0xa4] sm:$0xf] }
 0x1e3   : > { %v7055_v47 = vcombine.low %v2213_v13, %v2223_v1  ;;  %v3961_v23 = vrot.slane %v3959_v35, 4  ;;  %v3962_v53 = vshll.u32 %v3742_v42, 16  ;;  %v3968_v55 = vshll.u32 %v3743_v54, 16  ;;  %v792_v1 = vld [vmem:[#allocation2 + $0xcc] sm:$0x1] }
 0x1e4   : > { %v3957_v0 = vsel %vm9741_vm12, %v3952_v25, %v3956_v41  ;;  %v2231_v56 = vor.u32 %v2230_v30, %v2227_v51  ;;  %v3972_v21 = vshrl.u32 %v3743_v54, 16  ;;  %v3978_v60 = vshll.u32 %v3744_v49, 16  ;;  %v3746_v41 = vld [vmem:[#allocation2 + $0xa8] sm:$0xf] }
 0x1e5   : > { %7903 = vmatmul.mubr.msk.bf16.gmra.mrb[48].mxu0 %vm1454_vm1, %v7055_v47  ;;  %v7183_v61 = vcombine.low %v3947_v39, %v3957_v0  ;;  %v2241_v32 = vor.u32 %v2240_v3, %v2236_v28  ;;  %v3964_v24 = vrot.slane %v3962_v53, 5  ;;  %v3970_v18 = vrot.slane %v3968_v55, 5  ;;  %v1965_v15 = vld [vmem:[#allocation2 + $0xac] sm:$0x1]  ;;  %v1969_v3 = vld [vmem:[#allocation2 + $0xc4] sm:$0xf] }
 0x1e6   : > { %v2232_v40 = vrot.slane %v2231_v56, 4  ;;  %v3974_v44 = vrot.slane %v3972_v21, 4  ;;  %v3980_v8 = vrot.slane %v3978_v60, 5  ;;  %v790_v14 = vsel %vm8870_vm8, 0, %v789_v10  ;;  %v3747_v59 = vld [vmem:[#allocation2 + $0xac] sm:$0x1] }
 0x1e7   : > { %8007 = vmatmul.mubr.msk.bf16.gmra.mrb[4].mxu1 %vm1454_vm1, %v7183_v61  ;;  %v2242_v31 = vrot.slane %v2241_v32, 4  ;;  %v2244_v57 = vshll.u32 %v1965_v15, 16  ;;  %v3965_v16 = vor.u32 %v3964_v24, %v3961_v23  ;;  %791 = vst [vmem:[#allocation2 + $0xbc] sm:$0x1] %v790_v14  ;;  %v2249_v50 = vshrl.u32 %v1966_v19, 16 }
 0x1e8   : > { %v2237_v37 = vsel %vm9741_vm12, %v2232_v40, %v2236_v28  ;;  %v3975_v2 = vor.u32 %v3974_v44, %v3970_v18  ;;  %v2252_v34 = vshll.u32 %v1966_v19, 16  ;;  %v2258_v22 = vshll.u32 %v1967_v4, 16  ;;  %v1970_v23 = vld [vmem:[#allocation2 + $0xc8] sm:$0xf]  ;;  %v3748_v32 = vld [vmem:[#allocation2 + $0xb4] sm:$0xf] }
 0x1e9   : > { %v2246_v13 = vrot.slane %v2244_v57, 5  ;;  %v3966_v20 = vrot.slane %v3965_v16, 4  ;;  %v2251_v46 = vrot.slane %v2249_v50, 4  ;;  %v2262_v27 = vshrl.u32 %v1967_v4, 16  ;;  %v3749_v50 = vld [vmem:[#allocation2 + $0xb8] sm:$0xf] }
 0x1ea   : > { %v3976_v42 = vrot.slane %v3975_v2, 4  ;;  %v2254_v9 = vrot.slane %v2252_v34, 5  ;;  %v2260_v45 = vrot.slane %v2258_v22, 5  ;;  %v3983_v29 = vshrl.u32 %v3745_v62, 16 }
 0x1eb   : > { %v2247_v7 = vsel %vm9741_vm12, %v2242_v31, %v2246_v13  ;;  %v3971_v26 = vsel %vm9741_vm12, %v3966_v20, %v3970_v18  ;;  %v2264_v43 = vrot.slane %v2262_v27, 4  ;;  %v3986_v54 = vshll.u32 %v3745_v62, 16  ;;  %v795_v20 = vld [vmem:[#allocation2 + $0xdc] sm:$0x1] }
 0x1ec   : > { %v7056_v39 = vcombine.low %v2237_v37, %v2247_v7  ;;  %v3981_v51 = vsel %vm9741_vm12, %v3976_v42, %v3980_v8  ;;  %v2255_v49 = vor.u32 %v2254_v9, %v2251_v46  ;;  %v3985_v35 = vrot.slane %v3983_v29, 4 }
 0x1ed   : > { %v7184_v47 = vcombine.low %v3971_v26, %v3981_v51  ;;  %v2265_v25 = vor.u32 %v2264_v43, %v2260_v45  ;;  %v3988_v30 = vrot.slane %v3986_v54, 5  ;;  %v3992_v28 = vshll.u32 %v3746_v41, 16 }
 0x1ee   : > { %7906 = vmatprep.mubr.msk.bf16.mxu0 %vm1454_vm1, %v7056_v39  ;;  %v1968_v53 = vld [vmem:[#allocation2 + $0xbc] sm:$0x1]  ;;  %v2256_v55 = vrot.slane %v2255_v49, 4  ;;  %v3996_v10 = vshrl.u32 %v3746_v41, 16  ;;  %v4002_v0 = vshll.u32 %v3747_v59, 16  ;;  %v793_v56 = vsel %vm8870_vm8, 0, %v792_v1 }
 0x1ef   : > { %8010 = vmatprep.mubr.msk.bf16.mxu1 %vm1454_vm1, %v7184_v47  ;;  %v2266_v21 = vrot.slane %v2265_v25, 4  ;;  %v2268_v60 = vshll.u32 %v1968_v53, 16  ;;  %v3989_v19 = vor.u32 %v3988_v30, %v3985_v35  ;;  %v3994_v61 = vrot.slane %v3992_v28, 5  ;;  %794 = vst [vmem:[#allocation2 + $0xcc] sm:$0x1] %v793_v56 }
 0x1f0   : > { %v2261_v24 = vsel %vm9741_vm12, %v2256_v55, %v2260_v45  ;;  %v3998_v18 = vrot.slane %v3996_v10, 4  ;;  %v4004_v4 = vrot.slane %v4002_v0, 5  ;;  %v2273_v15 = vshrl.u32 %v1969_v3, 16  ;;  %v3750_v13 = vld [vmem:[#allocation2 + $0xbc] sm:$0x1] }
 0x1f1   : > { %v2270_v40 = vrot.slane %v2268_v60, 5  ;;  %v3990_v44 = vrot.slane %v3989_v19, 4  ;;  %v2276_v8 = vshll.u32 %v1969_v3, 16  ;;  %v2282_v14 = vshll.u32 %v1970_v23, 16  ;;  %v1972_v39 = vld [vmem:[#allocation2 + $0xd4] sm:$0xf] }
 0x1f2   : > { %v3999_v31 = vor.u32 %v3998_v18, %v3994_v61  ;;  %v2275_v57 = vrot.slane %v2273_v15, 4  ;;  %v2286_v16 = vshrl.u32 %v1970_v23, 16  ;;  %v4007_v62 = vshrl.u32 %v3748_v32, 16  ;;  %v1973_v25 = vld [vmem:[#allocation2 + $0xd8] sm:$0xf] }
 0x1f3   : > { %v2271_v37 = vsel %vm9741_vm12, %v2266_v21, %v2270_v40  ;;  %v3995_v2 = vsel %vm9741_vm12, %v3990_v44, %v3994_v61  ;;  %v2278_v34 = vrot.slane %v2276_v8, 5  ;;  %v2284_v22 = vrot.slane %v2282_v14, 5  ;;  %v3751_v53 = vld [vmem:[#allocation2 + $0xc4] sm:$0xf] }
 0x1f4   : > { %v7057_v46 = vcombine.low %v2261_v24, %v2271_v37  ;;  %v4000_v27 = vrot.slane %v3999_v31, 4  ;;  %v2288_v42 = vrot.slane %v2286_v16, 4  ;;  %v4009_v9 = vrot.slane %v4007_v62, 4 }
 0x1f5   : > { %v2279_v45 = vor.u32 %v2278_v34, %v2275_v57  ;;  %v4010_v41 = vshll.u32 %v3748_v32, 16  ;;  %v4016_v29 = vshll.u32 %v3749_v50, 16  ;;  %v4020_v7 = vshrl.u32 %v3749_v50, 16 }
 0x1f6   : > { %7907 = vmatmul.mubr.msk.bf16.gmra.mrb[52].mxu0 %vm1454_vm1, %v7057_v46  ;;  %v4005_v26 = vsel %vm9741_vm12, %v4000_v27, %v4004_v4  ;;  %v1971_v43 = vld [vmem:[#allocation2 + $0xcc] sm:$0x1]  ;;  %v2289_v59 = vor.u32 %v2288_v42, %v2284_v22  ;;  %v4026_v54 = vshll.u32 %v3750_v13, 16  ;;  %v796_v1 = vsel %vm8870_vm8, 0, %v795_v20  ;;  %v3752_v4 = vld [vmem:[#allocation2 + $0xc8] sm:$0xf] }
 0x1f7   : > { %v7185_v51 = vcombine.low %v3995_v2, %v4005_v26  ;;  %v2280_v49 = vrot.slane %v2279_v45, 4  ;;  %v2292_v35 = vshll.u32 %v1971_v43, 16  ;;  %v4012_v47 = vrot.slane %v4010_v41, 5  ;;  %797 = vst [vmem:[#allocation2 + $0xdc] sm:$0x1] %v796_v1 }
 0x1f8   : > { %v2290_v30 = vrot.slane %v2289_v59, 4  ;;  %v4018_v28 = vrot.slane %v4016_v29, 5  ;;  %v4022_v3 = vrot.slane %v4020_v7, 4  ;;  %v4028_v23 = vrot.slane %v4026_v54, 5  ;;  %v3753_v16 = vld [vmem:[#allocation2 + $0xcc] sm:$0x1] }
 0x1f9   : > { %8011 = vmatmul.mubr.msk.bf16.gmra.mrb[8].mxu1 %vm1454_vm1, %v7185_v51  ;;  %v2285_v55 = vsel %vm9741_vm12, %v2280_v49, %v2284_v22  ;;  %v2294_v10 = vrot.slane %v2292_v35, 5  ;;  %v4013_v0 = vor.u32 %v4012_v47, %v4009_v9  ;;  %v2297_v56 = vshrl.u32 %v1972_v39, 16  ;;  %v798_v20 = vld [vmem:[#allocation2 + $0xec] sm:$0x1]  ;;  %v1975_v45 = vld [vmem:[#allocation2 + $0xe4] sm:$0xf] }
 0x1fa   : > { %v4023_v21 = vor.u32 %v4022_v3, %v4018_v28  ;;  %v2300_v60 = vshll.u32 %v1972_v39, 16  ;;  %v2306_v19 = vshll.u32 %v1973_v25, 16  ;;  %v2310_v61 = vshrl.u32 %v1973_v25, 16  ;;  %v1976_v43 = vld [vmem:[#allocation2 + $0xe8] sm:$0xf] }
 0x1fb   : > { %v2295_v32 = vsel %vm9741_vm12, %v2290_v30, %v2294_v10  ;;  %v4014_v24 = vrot.slane %v4013_v0, 4  ;;  %v2299_v18 = vrot.slane %v2297_v56, 4  ;;  %v4031_v15 = vshrl.u32 %v3751_v53, 16  ;;  %v3754_v25 = vld [vmem:[#allocation2 + $0xd4] sm:$0xf] }
 0x1fc   : > { %v7058_v40 = vcombine.low %v2285_v55, %v2295_v32  ;;  %v4024_v44 = vrot.slane %v4023_v21, 4  ;;  %v2302_v8 = vrot.slane %v2300_v60, 5  ;;  %v2308_v14 = vrot.slane %v2306_v19, 5  ;;  %v801_v21 = vld [vmem:[#allocation2 + $0xfc] sm:$0x1] }
 0x1fd   : > { %v4019_v31 = vsel %vm9741_vm12, %v4014_v24, %v4018_v28  ;;  %v2312_v57 = vrot.slane %v2310_v61, 4  ;;  %v4033_v50 = vrot.slane %v4031_v15, 4  ;;  %v4034_v62 = vshll.u32 %v3751_v53, 16  ;;  %v3755_v53 = vld [vmem:[#allocation2 + $0xd8] sm:$0xf] }
 0x1fe   : > { %7910 = vmatprep.mubr.msk.bf16.mxu0 %vm1454_vm1, %v7058_v40  ;;  %v4029_v37 = vsel %vm9741_vm12, %v4024_v44, %v4028_v23  ;;  %v1974_v2 = vld [vmem:[#allocation2 + $0xdc] sm:$0x1]  ;;  %v2303_v34 = vor.u32 %v2302_v8, %v2299_v18  ;;  %v4040_v22 = vshll.u32 %v3752_v4, 16  ;;  %v4044_v13 = vshrl.u32 %v3752_v4, 16  ;;  %v1978_v44 = vld [vmem:[#allocation2 + $0xf4] sm:$0xf] }
 0x1ff   : > { %v7186_v46 = vcombine.low %v4019_v31, %v4029_v37  ;;  %v2313_v27 = vor.u32 %v2312_v57, %v2308_v14  ;;  %v2316_v42 = vshll.u32 %v1974_v2, 16  ;;  %v4036_v9 = vrot.slane %v4034_v62, 5  ;;  %v3756_v32 = vld [vmem:[#allocation2 + $0xdc] sm:$0x1]  ;;  %v1979_v2 = vld [vmem:[#allocation2 + $0xf8] sm:$0xf] }
 0x200   : > { %v2304_v41 = vrot.slane %v2303_v34, 4  ;;  %v4042_v29 = vrot.slane %v4040_v22, 5  ;;  %v4046_v7 = vrot.slane %v4044_v13, 4  ;;  %v4050_v26 = vshll.u32 %v3753_v16, 16 }
 0x201   : > { %8014 = vmatprep.mubr.msk.bf16.mxu1 %vm1454_vm1, %v7186_v46  ;;  %v2314_v59 = vrot.slane %v2313_v27, 4  ;;  %v2318_v54 = vrot.slane %v2316_v42, 5  ;;  %v4037_v1 = vor.u32 %v4036_v9, %v4033_v50  ;;  %v799_v39 = vsel %vm8870_vm8, 0, %v798_v20 }
 0x202   : > { %v2309_v51 = vsel %vm9741_vm12, %v2304_v41, %v2308_v14  ;;  %v4047_v49 = vor.u32 %v4046_v7, %v4042_v29  ;;  %v4052_v35 = vrot.slane %v4050_v26, 5  ;;  %800 = vst [vmem:[#allocation2 + $0xec] sm:$0x1] %v799_v39  ;;  %v2321_v47 = vshrl.u32 %v1975_v45, 16  ;;  %v3757_v41 = vld [vmem:[#allocation2 + $0xe4] sm:$0xf] }
 0x203   : > { %v2319_v30 = vsel %vm9741_vm12, %v2314_v59, %v2318_v54  ;;  %v4038_v28 = vrot.slane %v4037_v1, 4  ;;  %v2324_v3 = vshll.u32 %v1975_v45, 16  ;;  %v2330_v23 = vshll.u32 %v1976_v43, 16 }
 0x204   : > { %v7059_v55 = vcombine.low %v2309_v51, %v2319_v30  ;;  %v4048_v10 = vrot.slane %v4047_v49, 4  ;;  %v2323_v0 = vrot.slane %v2321_v47, 4  ;;  %v2334_v56 = vshrl.u32 %v1976_v43, 16 }
 0x205   : > { %v4043_v60 = vsel %vm9741_vm12, %v4038_v28, %v4042_v29  ;;  %v2326_v19 = vrot.slane %v2324_v3, 5  ;;  %v2332_v61 = vrot.slane %v2330_v23, 5  ;;  %v4055_v24 = vshrl.u32 %v3754_v25, 16 }
 0x206   : > { %7911 = vmatmul.mubr.msk.bf16.gmra.mrb[56].mxu0 %vm1454_vm1, %v7059_v55  ;;  %v4053_v18 = vsel %vm9741_vm12, %v4048_v10, %v4052_v35  ;;  %v2336_v4 = vrot.slane %v2334_v56, 4  ;;  %v4058_v15 = vshll.u32 %v3754_v25, 16  ;;  %v4064_v40 = vshll.u32 %v3755_v53, 16  ;;  %v3758_v35 = vld [vmem:[#allocation2 + $0xe8] sm:$0xf] }
 0x207   : > { %v7187_v8 = vcombine.low %v4043_v60, %v4053_v18  ;;  %v2327_v14 = vor.u32 %v2326_v19, %v2323_v0  ;;  %v4057_v31 = vrot.slane %v4055_v24, 4  ;;  %v4068_v57 = vshrl.u32 %v3755_v53, 16  ;;  %v2674_v55 = vld [vmem:[#allocation2 + $0x10] sm:$0x8] }
 0x208   : > { %v2337_v16 = vor.u32 %v2336_v4, %v2332_v61  ;;  %v4060_v50 = vrot.slane %v4058_v15, 5  ;;  %v4066_v62 = vrot.slane %v4064_v40, 5  ;;  %v4074_v37 = vshll.u32 %v3756_v32, 16 }
 0x209   : > { %8015 = vmatmul.mubr.msk.bf16.gmra.mrb[12].mxu1 %vm1454_vm1, %v7187_v8  ;;  %v1977_v34 = vld [vmem:[#allocation2 + $0xec] sm:$0x1]  ;;  %v2328_v22 = vrot.slane %v2327_v14, 4  ;;  %v4070_v13 = vrot.slane %v4068_v57, 4  ;;  %v802_v20 = vsel %vm8870_vm8, 0, %v801_v21  ;;  %v2345_v46 = vshrl.u32 %v1978_v44, 16 }
 0x20a   : > { %v2338_v27 = vrot.slane %v2337_v16, 4  ;;  %v2340_v42 = vshll.u32 %v1977_v34, 16  ;;  %v4061_v9 = vor.u32 %v4060_v50, %v4057_v31  ;;  %v4076_v45 = vrot.slane %v4074_v37, 5  ;;  %803 = vst [vmem:[#allocation2 + $0xfc] sm:$0x1] %v802_v20 }
 0x20b   : > { %v2333_v29 = vsel %vm9741_vm12, %v2328_v22, %v2332_v61  ;;  %v4071_v7 = vor.u32 %v4070_v13, %v4066_v62  ;;  %v2347_v26 = vrot.slane %v2345_v46, 4  ;;  %v2348_v43 = vshll.u32 %v1978_v44, 16  ;;  %v3759_v53 = vld [vmem:[#allocation2 + $0xec] sm:$0x1]  ;;  %v3760_v57 = vld [vmem:[#allocation2 + $0xf4] sm:$0xf] }
 0x20c   : > { %v2342_v59 = vrot.slane %v2340_v42, 5  ;;  %v4062_v54 = vrot.slane %v4061_v9, 4  ;;  %v2354_v1 = vshll.u32 %v1979_v2, 16  ;;  %v2358_v39 = vshrl.u32 %v1979_v2, 16  ;;  %v3761_v2 = vld [vmem:[#allocation2 + $0xf8] sm:$0xf] }
 0x20d   : > { %v4072_v51 = vrot.slane %v4071_v7, 4  ;;  %v2350_v49 = vrot.slane %v2348_v43, 5  ;;  %v4079_v47 = vshrl.u32 %v3757_v41, 16  ;;  %v4082_v25 = vshll.u32 %v3757_v41, 16 }
 0x20e   : > { %v2343_v30 = vsel %vm9741_vm12, %v2338_v27, %v2342_v59  ;;  %v4067_v28 = vsel %vm9741_vm12, %v4062_v54, %v4066_v62  ;;  %v2356_v3 = vrot.slane %v2354_v1, 5  ;;  %v2360_v23 = vrot.slane %v2358_v39, 4  ;;  %v2677_v59 = vld [vmem:[#allocation2 + $0x20] sm:$0x8] }
 0x20f   : > { %v7060_v10 = vcombine.low %v2333_v29, %v2343_v30  ;;  %v4077_v0 = vsel %vm9741_vm12, %v4072_v51, %v4076_v45  ;;  %v2351_v56 = vor.u32 %v2350_v49, %v2347_v26  ;;  %v4081_v21 = vrot.slane %v4079_v47, 4 }
 0x210   : > { %v7188_v60 = vcombine.low %v4067_v28, %v4077_v0  ;;  %v2361_v19 = vor.u32 %v2360_v23, %v2356_v3  ;;  %v4084_v61 = vrot.slane %v4082_v25, 5  ;;  %v4088_v32 = vshll.u32 %v3758_v35, 16  ;;  %v3763_v23 = vld [vmem:[#allocation2 + $0x104] sm:$0xf] }
 0x211   : > { %7914 = vmatprep.mubr.msk.bf16.mxu0 %vm1454_vm1, %v7060_v10  ;;  %v1980_v24 = vld [vmem:[#allocation2 + $0xfc] sm:$0x1]  ;;  %v2352_v18 = vrot.slane %v2351_v56, 4  ;;  %v4092_v4 = vshrl.u32 %v3758_v35, 16  ;;  %v4098_v15 = vshll.u32 %v3759_v53, 16  ;;  %v2723_v40 = vshrl.u32 %v2674_v55, 16 }
 0x212   : > { %8018 = vmatprep.mubr.msk.bf16.mxu1 %vm1454_vm1, %v7188_v60  ;;  %v2362_v44 = vrot.slane %v2361_v19, 4  ;;  %v2364_v8 = vshll.u32 %v1980_v24, 16  ;;  %v4085_v14 = vor.u32 %v4084_v61, %v4081_v21  ;;  %v4090_v31 = vrot.slane %v4088_v32, 5  ;;  %v804_v35 = vld [vmem:[#allocation2 + $0x10c] sm:$0x1] }
 0x213   : > { %v2357_v16 = vsel %vm9741_vm12, %v2352_v18, %v2356_v3  ;;  %v4094_v50 = vrot.slane %v4092_v4, 4  ;;  %v4100_v62 = vrot.slane %v4098_v15, 5  ;;  %v7080_v37 = vrot.slane %v2723_v40, 11  ;;  %v3764_v56 = vld [vmem:[#allocation2 + $0x108] sm:$0xf] }
 0x214   : > { %v2366_v34 = vrot.slane %v2364_v8, 5  ;;  %v4086_v22 = vrot.slane %v4085_v14, 4  ;;  %v10994_v13 = vshll.u32 %v8962_v33, 16  ;;  %v2735_v46 = vrot.slane %v9455_v38, 4  ;;  %v3762_v33 = vld [vmem:[#allocation2 + $0xfc] sm:$0x1] }
 0x215   : > { %v4095_v27 = vor.u32 %v4094_v50, %v4090_v31  ;;  %v10995_v42 = vshll.u32 %v9036_v17, 16  ;;  %v4103_v45 = vshrl.u32 %v3760_v57, 16  ;;  %v4106_v41 = vshll.u32 %v3760_v57, 16  ;;  %v2680_v15 = vld [vmem:[#allocation2 + $0x30] sm:$0x8] }
 0x216   : > { %v2733_v20 = vor.u32 %v10994_v13, %v9455_v38  ;;  %v2367_v29 = vsel %vm9741_vm12, %v2362_v44, %v2366_v34  ;;  %v4091_v7 = vsel %vm9741_vm12, %v4086_v22, %v4090_v31  ;;  %v4112_v43 = vshll.u32 %v3761_v2, 16  ;;  %v10029_v57 = vld [vmem:[#allocation2 + $0x24] sm:$0xf] }
 0x217   : > { %v2742_v9 = vor.u32 %v10995_v42, %v9475_v5  ;;  %v7061_v38 = vcombine.low %v2357_v16, %v2367_v29  ;;  %v4096_v54 = vrot.slane %v4095_v27, 4  ;;  %v4105_v5 = vrot.slane %v4103_v45, 4  ;;  %v10998_v22 = vld [vmem:[#allocation66_spill] sm:$0xff]  ;;  %v11001_v42 = vld [vmem:[#allocation67_spill] sm:$0xff] }
 0x218   : > { %v2734_v26 = vsel %vm8875_vm9, %v7080_v37, %v2733_v20  ;;  %v4108_v39 = vrot.slane %v4106_v41, 5  ;;  %v4114_v51 = vrot.slane %v4112_v43, 5  ;;  %v4116_v49 = vshrl.u32 %v3761_v2, 16  ;;  %v4457_v2 = vld [vmem:[#allocation2 + $0x20] sm:$0x8] }
 0x219   : > { %v2743_v17 = vsel %vm8875_vm9, %v2735_v46, %v2742_v9  ;;  %7915 = vmatmul.mubr.msk.bf16.gmra.mrb[60].mxu0 %vm1454_vm1, %v7061_v38  ;;  %v4101_v47 = vsel %vm9741_vm12, %v4096_v54, %v4100_v62  ;;  %v4122_v25 = vshll.u32 %v3762_v33, 16  ;;  %v2745_v30 = vshrl.u32 %v2677_v59, 16  ;;  %v11000_v27 = vld [vmem:[#allocation70_spill] sm:$0xff]  ;;  %v10040_v41 = vld [vmem:[#allocation2 + $0x28] sm:$0xf] }
 0x21a   : > { %v7100_v1 = vcombine.low %v2734_v26, %v2743_v17  ;;  %v10996_v28 = vshll.u32 %v9437_v58, 16  ;;  %v7189_v53 = vcombine.low %v4091_v7, %v4101_v47  ;;  %v4109_v55 = vor.u32 %v4108_v39, %v4105_v5  ;;  %v2683_v54 = vld [vmem:[#allocation2 + $0x40] sm:$0x8] }
 0x21b   : > { %v4118_v10 = vrot.slane %v4116_v49, 4  ;;  %v2757_v0 = vrot.slane %v9486_v36, 4  ;;  %v4124_v21 = vrot.slane %v4122_v25, 5  ;;  %v7081_v60 = vrot.slane %v2745_v30, 11  ;;  %v10051_v30 = vld [vmem:[#allocation2 + $0x34] sm:$0xf] }
 0x21c   : > { %v2755_v3 = vor.u32 %v10996_v28, %v9486_v36  ;;  %7922 = vmatprep.mubr.msk.bf16.mxu0 %vm1454_vm1, %v7100_v1  ;;  %v10997_v19 = vshll.u32 %v9457_v6, 16  ;;  %v805_v32 = vsel %vm8870_vm8, 0, %v804_v35  ;;  %8019 = vmatmul.mubr.msk.bf16.gmra.mrb[16].mxu1 %vm1454_vm1, %v7189_v53  ;;  %v4110_v58 = vrot.slane %v4109_v55, 4  ;;  %v4460_v55 = vld [vmem:[#allocation2 + $0x30] sm:$0x8] }
 0x21d   : > { %v4119_v24 = vor.u32 %v4118_v10, %v4114_v51  ;;  %806 = vst [vmem:[#allocation2 + $0x10c] sm:$0x1] %v805_v32  ;;  %v4127_v18 = vshrl.u32 %v3763_v23, 16  ;;  %v4130_v4 = vshll.u32 %v3763_v23, 16  ;;  %v4136_v44 = vshll.u32 %v3764_v56, 16 }
 0x21e   : > { %v2764_v61 = vor.u32 %v10997_v19, %v9490_v12  ;;  %v2756_v36 = vsel %vm8875_vm9, %v7081_v60, %v2755_v3  ;;  %v4140_v6 = vshrl.u32 %v3764_v56, 16  ;;  %v4115_v12 = vsel %vm9741_vm12, %v4110_v58, %v4114_v51  ;;  %v11004_v60 = vld [vmem:[#allocation68_spill] sm:$0xff] }
 0x21f   : > { %v4120_v8 = vrot.slane %v4119_v24, 4  ;;  %v4129_v31 = vrot.slane %v4127_v18, 4  ;;  %v4132_v16 = vrot.slane %v4130_v4, 5  ;;  %v4138_v50 = vrot.slane %v4136_v44, 5  ;;  %v11006_v18 = vld [vmem:[#allocation72_spill] sm:$0xff]  ;;  %v11007_v4 = vld [vmem:[#allocation69_spill] sm:$0xff] }
 0x220   : > { %v2765_v40 = vsel %vm8875_vm9, %v2757_v0, %v2764_v61  ;;  %v4142_v62 = vrot.slane %v4140_v6, 4  ;;  %v2767_v37 = vshrl.u32 %v2680_v15, 16  ;;  %v10999_v13 = vshll.u32 %v10998_v22, 16  ;;  %v10068_v6 = vld [vmem:[#allocation2 + $0x38] sm:$0xf] }
 0x221   : > { %v7101_v14 = vcombine.low %v2756_v36, %v2765_v40  ;;  %v4125_v34 = vsel %vm9741_vm12, %v4120_v8, %v4124_v21  ;;  %v2779_v46 = vrot.slane %v9525_v52, 4  ;;  %v11002_v9 = vshll.u32 %v11001_v42, 16  ;;  %v11003_v21 = vld [vmem:[#allocation71_spill] sm:$0xff] }
 0x222   : > { %v2777_v20 = vor.u32 %v10999_v13, %v9525_v52  ;;  %v7190_v29 = vcombine.low %v4115_v12, %v4125_v34  ;;  %v4133_v7 = vor.u32 %v4132_v16, %v4129_v31  ;;  %v4143_v26 = vor.u32 %v4142_v62, %v4138_v50 }
 0x223   : > { %v2786_v45 = vor.u32 %v11002_v9, %v11000_v27  ;;  %7923 = vmatmul.mubr.msk.bf16.vlgmr.msra.gmra.mrb[32].mxu0 %vm1454_vm1, %v7101_v14  ;;  %v7082_v33 = vrot.slane %v2767_v37, 11  ;;  %v4506_v59 = vshrl.u32 %v4457_v2, 16  ;;  %v4511_v38 = vshrl.u32 %v10029_v57, 16  ;;  %v4463_v14 = vld [vmem:[#allocation2 + $0x40] sm:$0x8] }
 0x224   : > { %v4514_v52 = vshll.u32 %v10029_v57, 16  ;;  %8022 = vmatprep.mubr.msk.bf16.mxu1 %vm1454_vm1, %v7190_v29  ;;  %v3765_v17 = vld [vmem:[#allocation2 + $0x10c] sm:$0x1]  ;;  %v4134_v5 = vrot.slane %v4133_v7, 4  ;;  %v4144_v1 = vrot.slane %v4143_v26, 4  ;;  %v4520_v51 = vshrl.u32 %v10040_v41, 16  ;;  %8135 = vmatpush3.bf16.msra.mxu0 %v8558_v11 }
 0x225   : > { %v2787_v43 = vsel %vm8875_vm9, %v2779_v46, %v2786_v45  ;;  %v2778_v39 = vsel %vm8875_vm9, %v7082_v33, %v2777_v20  ;;  %v4146_v49 = vshll.u32 %v3765_v17, 16  ;;  %v7210_v47 = vrot.slane %v4506_v59, 11  ;;  %v10077_v37 = vld [vmem:[#allocation2 + $0x44] sm:$0xf]  ;;  %v10079_v2 = vld [vmem:[#allocation2 + $0x48] sm:$0xf] }
 0x226   : > { %v7102_v35 = vcombine.low %v2778_v39, %v2787_v43  ;;  %v4513_v25 = vrot.slane %v4511_v38, 7  ;;  %v4139_v28 = vsel %vm9741_vm12, %v4134_v5, %v4138_v50  ;;  %v4522_v3 = vrot.slane %v4520_v51, 7  ;;  %v10081_v46 = vld [vmem:[#allocation2 + $0x54] sm:$0xf]  ;;  %v4466_v29 = vld [vmem:[#allocation2 + $0x50] sm:$0x8] }
 0x227   : > { %v4523_v23 = vshll.u32 %v10040_v41, 16  ;;  %v2789_v53 = vshrl.u32 %v2683_v54, 16  ;;  %v4148_v10 = vrot.slane %v4146_v49, 5  ;;  %v11005_v19 = vshll.u32 %v11004_v60, 16  ;;  %v10092_v59 = vld [vmem:[#allocation2 + $0x58] sm:$0xf] }
 0x228   : > { %7926 = vmatprep.mubr.msk.bf16.mxu0 %vm1454_vm1, %v7102_v35  ;;  %v4516_v0 = vor.u32 %v4514_v52, %v4513_v25  ;;  %v4518_v56 = vrot.slane %v4513_v25, 4  ;;  %v2801_v24 = vrot.slane %v11003_v21, 4  ;;  %v11008_v15 = vshll.u32 %v11007_v4, 16  ;;  %v8539_v4 = vld [vmem:[%s10744_s2 + $0x78] sm:$0xff]  }
 0x229   : > { %v2799_v61 = vor.u32 %v11005_v19, %v11003_v21  ;;  %v4525_v32 = vor.u32 %v4523_v23, %v4522_v3  ;;  %v7083_v58 = vrot.slane %v2789_v53, 11  ;;  %v4149_v40 = vsel %vm9741_vm12, %v4144_v1, %v4148_v10  ;;  %v10100_v10 = vld [vmem:[#allocation2 + $0x64] sm:$0xf]  ;;  %v10105_v19 = vld [vmem:[#allocation2 + $0x68] sm:$0xf] }
 0x22a   : > { %v2808_v36 = vor.u32 %v11008_v15, %v11006_v18  ;;  %v4517_v44 = vsel %vm8875_vm9, %v7210_v47, %v4516_v0  ;;  %v4528_v12 = vshrl.u32 %v4460_v55, 16  ;;  %v4533_v8 = vshrl.u32 %v10051_v30, 16  ;;  %v4472_v18 = vld [vmem:[#allocation2 + $0x70] sm:$0x8] }
 0x22b   : > { %v7191_v31 = vcombine.low %v4139_v28, %v4149_v40  ;;  %v4526_v16 = vsel %vm8875_vm9, %v4518_v56, %v4525_v32  ;;  %v2800_v50 = vsel %vm8875_vm9, %v7083_v58, %v2799_v61  ;;  %v4536_v27 = vshll.u32 %v10051_v30, 16  ;;  %v4469_v28 = vld [vmem:[#allocation2 + $0x60] sm:$0x8] }
 0x22c   : > { %v2809_v62 = vsel %vm8875_vm9, %v2801_v24, %v2808_v36  ;;  %v7230_v34 = vcombine.low %v4517_v44, %v4526_v16  ;;  %v7211_v13 = vrot.slane %v4528_v12, 11  ;;  %v4535_v20 = vrot.slane %v4533_v8, 7  ;;  %v10114_v12 = vld [vmem:[#allocation2 + $0x74] sm:$0xf] }
 0x22d   : > { %v7103_v22 = vcombine.low %v2800_v50, %v2809_v62  ;;  %8023 = vmatmul.mubr.msk.bf16.gmra.mrb[20].mxu1 %vm1454_vm1, %v7191_v31  ;;  %v4542_v42 = vshrl.u32 %v10068_v6, 16  ;;  %v4545_v9 = vshll.u32 %v10068_v6, 16  ;;  %v4550_v45 = vshrl.u32 %v4463_v14, 16  ;;  %v10120_v50 = vld [vmem:[#allocation2 + $0x78] sm:$0xf]  ;;  %v8578_v62 = vld [vmem:[%s10744_s2 + $0x70] sm:$0xff]  }
 0x22e   : > { %8030 = vmatprep.mubr.msk.bf16.mxu1 %vm1454_vm1, %v7230_v34  ;;  %v4540_v7 = vrot.slane %v4535_v20, 4  ;;  %v4555_v26 = vshrl.u32 %v10077_v37, 16  ;;  %v4558_v33 = vshll.u32 %v10077_v37, 16  ;;  %v4564_v43 = vshrl.u32 %v10079_v2, 16 }
 0x22f   : > { %7927 = vmatmul.mubr.msk.bf16.gmra.mrb[36].mxu0 %vm1454_vm1, %v7103_v22  ;;  %v4538_v38 = vor.u32 %v4536_v27, %v4535_v20  ;;  %v4544_v52 = vrot.slane %v4542_v42, 7  ;;  %v7212_v54 = vrot.slane %v4550_v45, 11  ;;  %v4567_v17 = vshll.u32 %v10079_v2, 16  ;;  %v10131_v27 = vld [vmem:[#allocation2 + $0x84] sm:$0xf] }
 0x230   : > { %v4557_v5 = vrot.slane %v4555_v26, 7  ;;  %v4566_v1 = vrot.slane %v4564_v43, 7  ;;  %v4572_v39 = vshrl.u32 %v4466_v29, 16  ;;  %v4577_v51 = vshrl.u32 %v10081_v46, 16  ;;  %v10137_v26 = vld [vmem:[%s10744_s2 + $0x80] sm:$0xff]  }
 0x231   : > { %v4539_v49 = vsel %vm8875_vm9, %v7211_v13, %v4538_v38  ;;  %v4547_v35 = vor.u32 %v4545_v9, %v4544_v52  ;;  %v4580_v47 = vshll.u32 %v10081_v46, 16  ;;  %v4586_v25 = vshrl.u32 %v10092_v59, 16 }
 0x232   : > { %v4560_v3 = vor.u32 %v4558_v33, %v4557_v5  ;;  %v4562_v23 = vrot.slane %v4557_v5, 4  ;;  %v4569_v53 = vor.u32 %v4567_v17, %v4566_v1  ;;  %v7213_v55 = vrot.slane %v4572_v39, 11  ;;  %v10142_v39 = vld [vmem:[#allocation2 + $0x88] sm:$0xf] }
 0x233   : > { %v4548_v0 = vsel %vm8875_vm9, %v4540_v7, %v4547_v35  ;;  %v4579_v56 = vrot.slane %v4577_v51, 7  ;;  %v4588_v21 = vrot.slane %v4586_v25, 7  ;;  %v4589_v60 = vshll.u32 %v10092_v59, 16  ;;  %v4475_v7 = vld [vmem:[#allocation2 + $0x80] sm:$0x8] }
 0x234   : > { %v7231_v61 = vcombine.low %v4539_v49, %v4548_v0  ;;  %v4561_v32 = vsel %vm8875_vm9, %v7212_v54, %v4560_v3  ;;  %v4570_v58 = vsel %vm8875_vm9, %v4562_v23, %v4569_v53  ;;  %v4594_v24 = vshrl.u32 %v4469_v28, 16  ;;  %v4478_v25 = vld [vmem:[#allocation2 + $0x90] sm:$0x8] }
 0x235   : > { %v7232_v15 = vcombine.low %v4561_v32, %v4570_v58  ;;  %v4582_v36 = vor.u32 %v4580_v47, %v4579_v56  ;;  %v4584_v40 = vrot.slane %v4579_v56, 4  ;;  %v4591_v44 = vor.u32 %v4589_v60, %v4588_v21  ;;  %v10157_v58 = vld [vmem:[#allocation2 + $0x98] sm:$0xf] }
 0x236   : > { %8031 = vmatmul.mubr.msk.bf16.vlgmr.msra.gmra.mrb[24].mxu1 %vm1454_vm1, %v7231_v61  ;;  %v7214_v8 = vrot.slane %v4594_v24, 11  ;;  %v4599_v14 = vshrl.u32 %v10100_v10, 16  ;;  %v4602_v31 = vshll.u32 %v10100_v10, 16  ;;  %v4608_v16 = vshrl.u32 %v10105_v19, 16 }
 0x237   : > { %8063 = vmatpush3.bf16.msra.mxu1 %v8578_v62  ;;  %8034 = vmatprep.mubr.msk.bf16.mxu1 %vm1454_vm1, %v7232_v15  ;;  %v4583_v34 = vsel %vm8875_vm9, %v7213_v55, %v4582_v36  ;;  %v4592_v22 = vsel %vm8875_vm9, %v4584_v40, %v4591_v44  ;;  %v4611_v13 = vshll.u32 %v10105_v19, 16  ;;  %v4616_v20 = vshrl.u32 %v4472_v18, 16  ;;  %v10150_v55 = vld [vmem:[#allocation2 + $0x94] sm:$0xf]  ;;  %v4481_v40 = vld [vmem:[#allocation2 + $0xa0] sm:$0x8] }
 0x238   : > { %v7233_v42 = vcombine.low %v4583_v34, %v4592_v22  ;;  %v4601_v9 = vrot.slane %v4599_v14, 7  ;;  %v4610_v45 = vrot.slane %v4608_v16, 7  ;;  %v4621_v29 = vshrl.u32 %v10114_v12, 16  ;;  %8064 = vmatprep.subr.bf16.mxu1 %v8539_v4  ;;  %v10164_v44 = vld [vmem:[#allocation2 + $0xa4] sm:$0xf] }
 0x239   : > { %v7215_v33 = vrot.slane %v4616_v20, 11  ;;  %v4624_v43 = vshll.u32 %v10114_v12, 16  ;;  %v4630_v38 = vshrl.u32 %v10120_v50, 16  ;;  %v4633_v52 = vshll.u32 %v10120_v50, 16  ;;  %v10166_v62 = vld [vmem:[#allocation2 + $0xa8] sm:$0xf] }
 0x23a   : > { %v4604_v54 = vor.u32 %v4602_v31, %v4601_v9  ;;  %v4606_v17 = vrot.slane %v4601_v9, 4  ;;  %v4613_v5 = vor.u32 %v4611_v13, %v4610_v45  ;;  %v4623_v1 = vrot.slane %v4621_v29, 7 }
 0x23b   : > { %v4632_v51 = vrot.slane %v4630_v38, 7  ;;  %v4638_v49 = vshrl.u32 %v4475_v7, 16  ;;  %v4643_v35 = vshrl.u32 %v10131_v27, 16  ;;  %v4646_v47 = vshll.u32 %v10131_v27, 16  ;;  %8065 = vmatpush3.bf16.msra.mxu1 %v8539_v4  ;;  %v10174_v7 = vld [vmem:[#allocation2 + $0xb4] sm:$0xf] }
 0x23c   : > { %v4605_v28 = vsel %vm8875_vm9, %v7214_v8, %v4604_v54  ;;  %v4614_v3 = vsel %vm8875_vm9, %v4606_v17, %v4613_v5  ;;  %v4626_v23 = vor.u32 %v4624_v43, %v4623_v1  ;;  %v4628_v53 = vrot.slane %v4623_v1, 4  ;;  %8098 = vmatprep.subr.bf16.mxu1 %v10137_v26  ;;  %v4484_v54 = vld [vmem:[#allocation2 + $0xb0] sm:$0x8] }
 0x23d   : > { %v7234_v0 = vcombine.low %v4605_v28, %v4614_v3  ;;  %v4635_v56 = vor.u32 %v4633_v52, %v4632_v51  ;;  %v7216_v21 = vrot.slane %v4638_v49, 11  ;;  %v4645_v60 = vrot.slane %v4643_v35, 7  ;;  %v10180_v49 = vld [vmem:[#allocation2 + $0xb8] sm:$0xf] }
 0x23e   : > { %8035 = vmatmul.mubr.msk.bf16.gmra.mrb[28].mxu1 %vm1454_vm1, %v7233_v42  ;;  %v4627_v61 = vsel %vm8875_vm9, %v7215_v33, %v4626_v23  ;;  %v4652_v32 = vshrl.u32 %v10142_v39, 16  ;;  %v4660_v24 = vshrl.u32 %v4478_v25, 16  ;;  %v4655_v15 = vshll.u32 %v10142_v39, 16 }
 0x23f   : > { %8038 = vmatprep.mubr.msk.bf16.mxu1 %vm1454_vm1, %v7234_v0  ;;  %v4636_v18 = vsel %vm8875_vm9, %v4628_v53, %v4635_v56  ;;  %v4648_v4 = vor.u32 %v4646_v47, %v4645_v60  ;;  %v4665_v36 = vshrl.u32 %v10150_v55, 16  ;;  %v4650_v14 = vrot.slane %v4645_v60, 4  ;;  %v4487_v56 = vld [vmem:[#allocation2 + $0xc0] sm:$0x8] }
 0x240   : > { %v7235_v8 = vcombine.low %v4627_v61, %v4636_v18  ;;  %v4654_v31 = vrot.slane %v4652_v32, 7  ;;  %v7217_v16 = vrot.slane %v4660_v24, 11  ;;  %v4668_v13 = vshll.u32 %v10150_v55, 16  ;;  %v10191_v24 = vld [vmem:[#allocation2 + $0xc4] sm:$0xf] }
 0x241   : > { %v4649_v34 = vsel %vm8875_vm9, %v7216_v21, %v4648_v4  ;;  %v4667_v22 = vrot.slane %v4665_v36, 7  ;;  %v4674_v20 = vshrl.u32 %v10157_v58, 16  ;;  %v4677_v9 = vshll.u32 %v10157_v58, 16  ;;  %v10194_v36 = vld [vmem:[#allocation2 + $0xc8] sm:$0xf] }
 0x242   : > { %v4657_v42 = vor.u32 %v4655_v15, %v4654_v31  ;;  %v4682_v45 = vshrl.u32 %v4481_v40, 16  ;;  %v4687_v29 = vshrl.u32 %v10164_v44, 16  ;;  %v4690_v38 = vshll.u32 %v10164_v44, 16 }
 0x243   : > { %v4670_v33 = vor.u32 %v4668_v13, %v4667_v22  ;;  %v4676_v43 = vrot.slane %v4674_v20, 7  ;;  %v4696_v52 = vshrl.u32 %v10166_v62, 16  ;;  %v4672_v5 = vrot.slane %v4667_v22, 4 }
 0x244   : > { %v4658_v17 = vsel %vm8875_vm9, %v4650_v14, %v4657_v42  ;;  %v7218_v1 = vrot.slane %v4682_v45, 11  ;;  %v4689_v51 = vrot.slane %v4687_v29, 7  ;;  %v4699_v28 = vshll.u32 %v10166_v62, 16  ;;  %v10202_v42 = vld [vmem:[#allocation2 + $0xd4] sm:$0xf] }
 0x245   : > { %v7236_v35 = vcombine.low %v4649_v34, %v4658_v17  ;;  %v4679_v47 = vor.u32 %v4677_v9, %v4676_v43  ;;  %v4698_v25 = vrot.slane %v4696_v52, 7  ;;  %v4671_v3 = vsel %vm8875_vm9, %v7217_v16, %v4670_v33  ;;  %v4490_v16 = vld [vmem:[#allocation2 + $0xd0] sm:$0x8]  ;;  %v10205_v43 = vld [vmem:[#allocation2 + $0xe4] sm:$0xf] }
 0x246   : > { %8039 = vmatmul.mubr.msk.bf16.gmra.mrb[0].mxu1 %vm1454_vm1, %v7235_v8  ;;  %v4692_v23 = vor.u32 %v4690_v38, %v4689_v51  ;;  %v4704_v53 = vshrl.u32 %v4484_v54, 16  ;;  %v4709_v0 = vshrl.u32 %v10174_v7, 16  ;;  %v4694_v60 = vrot.slane %v4689_v51, 4  ;;  %v10208_v17 = vld [vmem:[#allocation2 + $0xd8] sm:$0xf] }
 0x247   : > { %8042 = vmatprep.mubr.msk.bf16.mxu1 %vm1454_vm1, %v7236_v35  ;;  %v4680_v21 = vsel %vm8875_vm9, %v4672_v5, %v4679_v47  ;;  %v4701_v61 = vor.u32 %v4699_v28, %v4698_v25  ;;  %v4718_v32 = vshrl.u32 %v10180_v49, 16  ;;  %v4712_v15 = vshll.u32 %v10174_v7, 16  ;;  %v4493_v25 = vld [vmem:[#allocation2 + $0xe0] sm:$0x8] }
 0x248   : > { %v7237_v18 = vcombine.low %v4671_v3, %v4680_v21  ;;  %v4711_v4 = vrot.slane %v4709_v0, 7  ;;  %v4721_v14 = vshll.u32 %v10180_v49, 16  ;;  %v4726_v31 = vshrl.u32 %v4487_v56, 16 }
 0x249   : > { %v4702_v40 = vsel %vm8875_vm9, %v4694_v60, %v4701_v61  ;;  %v4720_v8 = vrot.slane %v4718_v32, 7  ;;  %v4693_v34 = vsel %vm8875_vm9, %v7218_v1, %v4692_v23  ;;  %v7219_v22 = vrot.slane %v4704_v53, 11  ;;  %v10220_v60 = vld [vmem:[#allocation2 + $0xe8] sm:$0xf] }
 0x24a   : > { %v4714_v13 = vor.u32 %v4712_v15, %v4711_v4  ;;  %v4731_v20 = vshrl.u32 %v10191_v24, 16  ;;  %v7238_v9 = vcombine.low %v4693_v34, %v4702_v40  ;;  %v4716_v45 = vrot.slane %v4711_v4, 4  ;;  %v4496_v15 = vld [vmem:[#allocation2 + $0xf0] sm:$0x8] }
 0x24b   : > { %v4723_v29 = vor.u32 %v4721_v14, %v4720_v8  ;;  %v4740_v33 = vshrl.u32 %v10194_v36, 16  ;;  %v7220_v38 = vrot.slane %v4726_v31, 11  ;;  %v4734_v54 = vshll.u32 %v10191_v24, 16 }
 0x24c   : > { %v4733_v52 = vrot.slane %v4731_v20, 7  ;;  %v4748_v5 = vshrl.u32 %v4490_v16, 16  ;;  %v4743_v35 = vshll.u32 %v10194_v36, 16  ;;  %v4753_v47 = vshrl.u32 %v10202_v42, 16  ;;  %v10228_v16 = vld [vmem:[#allocation2 + $0xf4] sm:$0xf] }
 0x24d   : > { %v4724_v1 = vsel %vm8875_vm9, %v4716_v45, %v4723_v29  ;;  %v4742_v51 = vrot.slane %v4740_v33, 7  ;;  %v4715_v28 = vsel %vm8875_vm9, %v7219_v22, %v4714_v13  ;;  %v4756_v23 = vshll.u32 %v10202_v42, 16 }
 0x24e   : > { %8043 = vmatmul.mubr.msk.bf16.gmra.mrb[4].mxu1 %vm1454_vm1, %v7237_v18  ;;  %v4736_v3 = vor.u32 %v4734_v54, %v4733_v52  ;;  %v4738_v53 = vrot.slane %v4733_v52, 4  ;;  %v4755_v56 = vrot.slane %v4753_v47, 7  ;;  %v4762_v21 = vshrl.u32 %v10208_v17, 16  ;;  %v10234_v52 = vld [vmem:[#allocation2 + $0x104] sm:$0xf] }
 0x24f   : > { %8046 = vmatprep.mubr.msk.bf16.mxu1 %vm1454_vm1, %v7238_v9  ;;  %v4745_v0 = vor.u32 %v4743_v35, %v4742_v51  ;;  %v7239_v61 = vcombine.low %v4715_v28, %v4724_v1  ;;  %v7221_v32 = vrot.slane %v4748_v5, 11  ;;  %v4770_v4 = vshrl.u32 %v4493_v25, 16  ;;  %v10232_v9 = vld [vmem:[#allocation2 + $0xf8] sm:$0xf]  ;;  %v4499_v35 = vld [vmem:[#allocation2 + $0x100] sm:$0x8] }
 0x250   : > { %v4775_v18 = vshrl.u32 %v10205_v43, 16  ;;  %v4737_v40 = vsel %vm8875_vm9, %v7220_v38, %v4736_v3  ;;  %v4764_v14 = vrot.slane %v4762_v21, 7  ;;  %v4765_v31 = vshll.u32 %v10208_v17, 16  ;;  %v10245_v21 = vld [vmem:[#allocation2 + $0x108] sm:$0xf] }
 0x251   : > { %v4746_v8 = vsel %vm8875_vm9, %v4738_v53, %v4745_v0  ;;  %v4758_v34 = vor.u32 %v4756_v23, %v4755_v56  ;;  %v4778_v13 = vshll.u32 %v10205_v43, 16  ;;  %v4784_v20 = vshrl.u32 %v10220_v60, 16 }
 0x252   : > { %v4777_v22 = vrot.slane %v4775_v18, 7  ;;  %v7240_v45 = vcombine.low %v4737_v40, %v4746_v8  ;;  %v4760_v29 = vrot.slane %v4755_v56, 4  ;;  %v4767_v33 = vor.u32 %v4765_v31, %v4764_v14  ;;  %v702_v8 = vld [vmem:[#allocation2 + $0x110] sm:$0x8] }
 0x253   : > { %v4792_v38 = vshrl.u32 %v4496_v15, 16  ;;  %v7222_v54 = vrot.slane %v4770_v4, 11  ;;  %v4786_v5 = vrot.slane %v4784_v20, 7  ;;  %v4787_v1 = vshll.u32 %v10220_v60, 16 }
 0x254   : > { %v4797_v51 = vshrl.u32 %v10228_v16, 16  ;;  %v4768_v47 = vsel %vm8875_vm9, %v4760_v29, %v4767_v33  ;;  %v4780_v25 = vor.u32 %v4778_v13, %v4777_v22  ;;  %v4782_v28 = vrot.slane %v4777_v22, 4  ;;  %v10254_v22 = vld [vmem:[#allocation2 + $0x114] sm:$0xf]  ;;  %v10258_v33 = vld [vmem:[#allocation2 + $0x118] sm:$0xf] }
 0x255   : > { %v4806_v3 = vshrl.u32 %v10232_v9, 16  ;;  %v4789_v23 = vor.u32 %v4787_v1, %v4786_v5  ;;  %v10242_v53 = vrot.slane %v4792_v38, 11  ;;  %v4800_v56 = vshll.u32 %v10228_v16, 16 }
 0x256   : > { %8047 = vmatmul.mubr.msk.bf16.gmra.mrb[8].mxu1 %vm1454_vm1, %v7239_v61  ;;  %v4799_v0 = vrot.slane %v4797_v51, 7  ;;  %v4809_v18 = vshll.u32 %v10232_v9, 16  ;;  %v4814_v15 = vshrl.u32 %v4499_v35, 16  ;;  %v4819_v40 = vshrl.u32 %v10234_v52, 16 }
 0x257   : > { %8050 = vmatprep.mubr.msk.bf16.mxu1 %vm1454_vm1, %v7240_v45  ;;  %v4808_v4 = vrot.slane %v4806_v3, 7  ;;  %v4759_v61 = vsel %vm8875_vm9, %v7221_v32, %v4758_v34  ;;  %v4790_v14 = vsel %vm8875_vm9, %v4782_v28, %v4789_v23  ;;  %v4781_v20 = vsel %vm8875_vm9, %v7222_v54, %v4780_v25 }
 0x258   : > { %v4802_v31 = vor.u32 %v4800_v56, %v4799_v0  ;;  %v7241_v13 = vcombine.low %v4759_v61, %v4768_v47  ;;  %v4804_v45 = vrot.slane %v4799_v0, 4  ;;  %v7242_v38 = vcombine.low %v4781_v20, %v4790_v14 }
 0x259   : > { %v4811_v29 = vor.u32 %v4809_v18, %v4808_v4  ;;  %v4822_v5 = vshll.u32 %v10234_v52, 16  ;;  %v4828_v1 = vshrl.u32 %v10245_v21, 16  ;;  %v703_v34 = vsel %vm8815_vm4, 0, %v702_v8 }
 0x25a   : > { %v4803_v51 = vsel %vm8875_vm9, %v10242_v53, %v4802_v31  ;;  %v7224_v35 = vrot.slane %v4814_v15, 11  ;;  %v4821_v47 = vrot.slane %v4819_v40, 7  ;;  %704 = vst [vmem:[#allocation2 + $0x110] sm:$0x8] %v703_v34  ;;  %v4841_v54 = vshrl.u32 %v10254_v22, 16 }
 0x25b   : > { %v4830_v25 = vrot.slane %v4828_v1, 7  ;;  %v4831_v28 = vshll.u32 %v10245_v21, 16  ;;  %v4844_v3 = vshll.u32 %v10254_v22, 16  ;;  %v4850_v23 = vshrl.u32 %v10258_v33, 16 }
 0x25c   : > { %v4812_v0 = vsel %vm8875_vm9, %v4804_v45, %v4811_v29  ;;  %v4843_v56 = vrot.slane %v4841_v54, 7  ;;  %v4853_v4 = vshll.u32 %v10258_v33, 16  ;;  %v7268_v53 = vcombine.low %v10029_v57, %v10040_v41  ;;  %v5504_v29 = vld [vmem:[#allocation2 + $0x34] sm:$0xf] }
 0x25d   : > { %v4833_v18 = vor.u32 %v4831_v28, %v4830_v25  ;;  %v4852_v15 = vrot.slane %v4850_v23, 7  ;;  %v7269_v40 = vcombine.low %v10051_v30, %v10068_v6  ;;  %v7270_v8 = vcombine.low %v10077_v37, %v10079_v2  ;;  %v5505_v28 = vld [vmem:[#allocation2 + $0x38] sm:$0xf] }
 0x25e   : > { %8051 = vmatmul.mubr.msk.bf16.gmra.mrb[12].mxu1 %vm1454_vm1, %v7241_v13  ;;  %v4824_v61 = vor.u32 %v4822_v5, %v4821_v47  ;;  %v4826_v14 = vrot.slane %v4821_v47, 4  ;;  %v7271_v31 = vcombine.low %v10081_v46, %v10092_v59  ;;  %v7272_v57 = vcombine.low %v10100_v10, %v10105_v19 }
 0x25f   : > { %8054 = vmatprep.mubr.msk.bf16.mxu1 %vm1454_vm1, %v7242_v38  ;;  %v4846_v41 = vor.u32 %v4844_v3, %v4843_v56  ;;  %v4848_v13 = vrot.slane %v4843_v56, 4  ;;  %v7273_v20 = vcombine.low %v10114_v12, %v10120_v50  ;;  %v7274_v30 = vcombine.low %v10131_v27, %v10142_v39  ;;  %v5503_v38 = vld [vmem:[#allocation2 + $0x2c] sm:$0x1]  ;;  %v5508_v56 = vld [vmem:[#allocation2 + $0x48] sm:$0xf] }
 0x260   : > { %v4834_v6 = vsel %vm8875_vm9, %v4826_v14, %v4833_v18  ;;  %v7275_v37 = vcombine.low %v10150_v55, %v10157_v58  ;;  %v7276_v2 = vcombine.low %v10164_v44, %v10166_v62  ;;  %v7277_v46 = vcombine.low %v10174_v7, %v10180_v49 }
 0x261   : > { %v4502_v59 = vld [vmem:[#allocation2 + $0x110] sm:$0x8]  ;;  %v4855_v10 = vor.u32 %v4853_v4, %v4852_v15  ;;  %v7278_v19 = vcombine.low %v10191_v24, %v10194_v36  ;;  %v7279_v12 = vcombine.low %v10202_v42, %v10208_v17  ;;  %v7280_v50 = vcombine.low %v10205_v43, %v10220_v60  ;;  %v8550_v43 = vld [vmem:[%s10744_s2 + $0x88] sm:$0xff]   ;;  %v5501_v17 = vld [vmem:[#allocation2 + $0x24] sm:$0xf] }
 0x262   : > { %v4836_v27 = vshrl.u32 %v4502_v59, 16  ;;  %v7281_v39 = vcombine.low %v10228_v16, %v10232_v9  ;;  %v7282_v55 = vcombine.low %v10234_v52, %v10245_v21  ;;  %v7283_v58 = vcombine.low %v10254_v22, %v10258_v33  ;;  %v5516_v16 = vld [vmem:[#allocation2 + $0x74] sm:$0xf] }
 0x263   : > { %v7243_v44 = vcombine.low %v4803_v51, %v4812_v0  ;;  %v4825_v62 = vsel %vm8875_vm9, %v7224_v35, %v4824_v61  ;;  %v4856_v36 = vsel %vm8875_vm9, %v4848_v13, %v4855_v10  ;;  %v5550_v1 = vshrl.u32 %v5501_v17, 16  ;;  %v5507_v0 = vld [vmem:[#allocation2 + $0x44] sm:$0xf] }
 0x264   : > { %v7244_v7 = vcombine.low %v4825_v62, %v4834_v6  ;;  %v7225_v49 = vrot.slane %v4836_v27, 11  ;;  %v5553_v32 = vshll.u32 %v5501_v17, 16  ;;  %v5574_v34 = vshrl.u32 %v5504_v29, 16 }
 0x265   : > { %v5577_v51 = vshll.u32 %v5504_v29, 16  ;;  %v5569_v23 = vshll.u32 %v5503_v38, 16  ;;  %v5552_v4 = vrot.slane %v5550_v1, 4  ;;  %v5587_v61 = vshrl.u32 %v5505_v28, 16 }
 0x266   : > { %8055 = vmatmul.mubr.msk.bf16.gmra.mrb[16].mxu1 %vm1454_vm1, %v7243_v44  ;;  %v4847_v24 = vsel %vm8875_vm9, %v7225_v49, %v4846_v41  ;;  %v5576_v18 = vrot.slane %v5574_v34, 4  ;;  %v5598_v14 = vshrl.u32 %v5507_v0, 16  ;;  %v707_v41 = vld [vmem:[#allocation2 + $0x11c] sm:$0x1]  ;;  %v5611_v13 = vshrl.u32 %v5508_v56, 16 }
 0x267   : > { %8058 = vmatprep.mubr.msk.bf16.mxu1 %vm1454_vm1, %v7244_v7  ;;  %v7245_v42 = vcombine.low %v4847_v24, %v4856_v36  ;;  %v5579_v15 = vrot.slane %v5577_v51, 5  ;;  %v5571_v6 = vrot.slane %v5569_v23, 5  ;;  %v708_v27 = vsel %vm8870_vm8, 0, %v707_v41  ;;  %v5509_v24 = vld [vmem:[#allocation2 + $0x4c] sm:$0x1] }
 0x268   : > { %v5600_v44 = vrot.slane %v5598_v14, 4  ;;  %709 = vst [vmem:[#allocation2 + $0x11c] sm:$0x1] %v708_v27  ;;  %v5613_v36 = vrot.slane %v5611_v13, 4  ;;  %v5617_v51 = vshll.u32 %v5509_v24, 16  ;;  %v5673_v14 = vshll.u32 %v5516_v16, 16 }
 0x26e   : > { %8059 = vmatmul.mubr.msk.bf16.gmra.mrb[20].mxu1 %vm1454_vm1, %v7245_v42 }
 0x26f   : > { %8066 = vmatprep.mubr.msk.bf16.mxu1 %vm1454_vm1, %v7268_v53  ;;  %v5555_v53 = vrot.slane %v5553_v32, 5 }
 0x276   : > { %8067 = vmatmul.mubr.msk.bf16.vlgmr.msra.gmra.mrb[24].mxu1 %vm1454_vm1, %v7269_v40 }
 0x277   : > { %8099 = vmatpush3.bf16.msra.mxu1 %v10137_v26  ;;  %8070 = vmatprep.mubr.msk.bf16.mxu1 %vm1454_vm1, %v7270_v8  ;;  %v5502_v26 = vld [vmem:[#allocation2 + $0x28] sm:$0xf]  ;;  %v5583_v8 = vshll.u32 %v5505_v28, 16  ;;  %v5512_v28 = vld [vmem:[#allocation2 + $0x5c] sm:$0x1] }
 0x278   : > { %8100 = vmatprep.subr.bf16.mxu1 %v8550_v43  ;;  %v5559_v60 = vshll.u32 %v5502_v26, 16  ;;  %v5563_v45 = vshrl.u32 %v5502_v26, 16 }
 0x279   : > { %v10350_v10 = vrot.slane %v5583_v8, 5  ;;  %v5515_v8 = vld [vmem:[#allocation2 + $0x6c] sm:$0x1] }
 0x27a   : > { %v10341_v47 = vrot.slane %v5559_v60, 5  ;;  %v5565_v54 = vrot.slane %v5563_v45, 4 }
 0x27b   : > { %8101 = vmatpush3.bf16.msra.mxu1 %v8550_v43 }
 0x27c   : > { %v5566_v40 = vor.u32 %v5565_v54, %v10341_v47 }
 0x27e   : > { %8071 = vmatmul.mubr.msk.bf16.gmra.mrb[28].mxu1 %vm1454_vm1, %v7271_v31  ;;  %v5601_v31 = vshll.u32 %v5507_v0, 16  ;;  %v5567_v59 = vrot.slane %v5566_v40, 4 }
 0x27f   : > { %8074 = vmatprep.mubr.msk.bf16.mxu1 %vm1454_vm1, %v7272_v57  ;;  %v5607_v57 = vshll.u32 %v5508_v56, 16 }
 0x280   : > { %v5603_v62 = vrot.slane %v5601_v31, 5  ;;  %v5572_v29 = vsel %vm9741_vm12, %v5567_v59, %v5571_v6  ;;  %v5519_v6 = vld [vmem:[#allocation2 + $0x84] sm:$0xf]  ;;  %v5520_v59 = vld [vmem:[#allocation2 + $0x88] sm:$0xf] }
 0x281   : > { %v10354_v7 = vrot.slane %v5607_v57, 5  ;;  %v5694_v24 = vshrl.u32 %v5519_v6, 16 }
 0x282   : > { %v5604_v34 = vor.u32 %v5603_v62, %v5600_v44  ;;  %v5675_v44 = vrot.slane %v5673_v14, 5 }
 0x286   : > { %8075 = vmatmul.mubr.msk.bf16.gmra.mrb[0].mxu1 %vm1454_vm1, %v7273_v20  ;;  %v5510_v20 = vld [vmem:[#allocation2 + $0x54] sm:$0xf] }
 0x287   : > { %8078 = vmatprep.mubr.msk.bf16.mxu1 %vm1454_vm1, %v7274_v30  ;;  %v5556_v30 = vor.u32 %v5555_v53, %v5552_v4  ;;  %v5622_v49 = vshrl.u32 %v5510_v20, 16  ;;  %v5625_v42 = vshll.u32 %v5510_v20, 16  ;;  %v5605_v20 = vrot.slane %v5604_v34, 4 }
 0x289   : > { %v5557_v48 = vrot.slane %v5556_v30, 4  ;;  %v5624_v54 = vrot.slane %v5622_v49, 4  ;;  %v5627_v23 = vrot.slane %v5625_v42, 5  ;;  %v5517_v30 = vld [vmem:[#allocation2 + $0x78] sm:$0xf]  ;;  %v5703_v42 = vshll.u32 %v5520_v59, 16 }
 0x28a   : > { %v5679_v62 = vshll.u32 %v5517_v30, 16  ;;  %v5683_v49 = vshrl.u32 %v5517_v30, 16 }
 0x28c   : > { %v5685_v34 = vrot.slane %v5683_v49, 4 }
 0x28e   : > { %8079 = vmatmul.mubr.msk.bf16.gmra.mrb[4].mxu1 %vm1454_vm1, %v7275_v37  ;;  %v5580_v37 = vor.u32 %v5579_v15, %v5576_v18  ;;  %v5562_v15 = vsel %vm9741_vm12, %v5557_v48, %v10341_v47  ;;  %v5641_v47 = vshll.u32 %v5512_v28, 16  ;;  %v5523_v48 = vld [vmem:[#allocation2 + $0x98] sm:$0xf] }
 0x28f   : > { %8082 = vmatprep.mubr.msk.bf16.mxu1 %vm1454_vm1, %v7276_v2  ;;  %v5511_v2 = vld [vmem:[#allocation2 + $0x58] sm:$0xf]  ;;  %v7306_v57 = vcombine.low %v5562_v15, %v5572_v29 }
 0x290   : > { %v5631_v43 = vshll.u32 %v5511_v2, 16  ;;  %v5635_v11 = vshrl.u32 %v5511_v2, 16  ;;  %v10362_v38 = vrot.slane %v5580_v37, 4  ;;  %v5619_v2 = vrot.slane %v5617_v51, 5 }
 0x291   : > { %v5643_v33 = vrot.slane %v5641_v47, 5  ;;  %v5696_v51 = vrot.slane %v5694_v24, 4 }
 0x292   : > { %v10372_v0 = vrot.slane %v5631_v43, 5  ;;  %v5637_v56 = vrot.slane %v5635_v11, 4  ;;  %v5586_v41 = vsel %vm9741_vm12, %v10362_v38, %v10350_v10  ;;  %v5707_v43 = vshrl.u32 %v5520_v59, 16  ;;  %v5518_v38 = vld [vmem:[#allocation2 + $0x7c] sm:$0x1] }
 0x295   : > { %v10337_v5 = vpop.f32.mrb[40].mxu0 }
 0x296   : > { %8083 = vmatmul.mubr.msk.bf16.gmra.mrb[8].mxu1 %vm1454_vm1, %v7277_v46  ;;  %v10339_v35 = vpop.f32.mrb[41].mxu0  ;;  %v5513_v46 = vld [vmem:[#allocation2 + $0x64] sm:$0xf] }
 0x297   : > { %8086 = vmatprep.mubr.msk.bf16.mxu1 %vm1454_vm1, %v7278_v19  ;;  %v10343_v25 = vpop.f32.mrb[42].mxu0  ;;  %v5589_v19 = vrot.slane %v5587_v61, 4  ;;  %v5646_v26 = vshrl.u32 %v5513_v46, 16  ;;  %v5649_v17 = vshll.u32 %v5513_v46, 16  ;;  %v5670_v61 = vshrl.u32 %v5516_v16, 16 }
 0x298   : > { %v10345_v3 = vpop.f32.mrb[43].mxu0  ;;  %v5628_v46 = vor.u32 %v5627_v23, %v5624_v54  ;;  %v10405_v16 = vrot.slane %v5703_v42, 5 }
 0x299   : > { %v5590_v32 = vor.u32 %v5589_v19, %v10350_v10  ;;  %v5648_v52 = vrot.slane %v5646_v26, 4  ;;  %v5651_v21 = vrot.slane %v5649_v17, 5  ;;  %v5638_v19 = vor.u32 %v5637_v56, %v10372_v0  ;;  %v5521_v56 = vld [vmem:[#allocation2 + $0x8c] sm:$0x1] }
 0x29a   : > { %v5672_v10 = vrot.slane %v5670_v61, 4  ;;  %v5610_v26 = vsel %vm9741_vm12, %v5605_v20, %v10354_v7  ;;  %v5525_v61 = vld [vmem:[#allocation2 + $0xa4] sm:$0xf]  ;;  %v5526_v20 = vld [vmem:[#allocation2 + $0xa8] sm:$0xf] }
 0x29b   : > { %v5591_v13 = vrot.slane %v5590_v32, 4  ;;  %v5639_v17 = vrot.slane %v5638_v19, 4  ;;  %v10403_v32 = vrot.slane %v5679_v62, 5  ;;  %v5742_v47 = vshrl.u32 %v5525_v61, 16 }
 0x29c   : > { %v5745_v59 = vshll.u32 %v5525_v61, 16 }
 0x29d   : > { %v5644_v15 = vsel %vm9741_vm12, %v5639_v17, %v5643_v33  ;;  %v5529_v33 = vld [vmem:[#allocation2 + $0xb8] sm:$0xf] }
 0x29e   : > { %8087 = vmatmul.mubr.msk.bf16.gmra.mrb[12].mxu1 %vm1454_vm1, %v7279_v12  ;;  %v5514_v12 = vld [vmem:[#allocation2 + $0x68] sm:$0xf] }
 0x29f   : > { %8090 = vmatprep.mubr.msk.bf16.mxu1 %vm1454_vm1, %v7280_v50  ;;  %v5506_v50 = vld [vmem:[#allocation2 + $0x3c] sm:$0x1]  ;;  %v5655_v60 = vshll.u32 %v5514_v12, 16  ;;  %v5659_v45 = vshrl.u32 %v5514_v12, 16  ;;  %v5652_v12 = vor.u32 %v5651_v21, %v5648_v52  ;;  %v5727_v52 = vshll.u32 %v5523_v48, 16 }
 0x2a0   : > { %v5593_v1 = vshll.u32 %v5506_v50, 16  ;;  %v5665_v50 = vshll.u32 %v5515_v8, 16  ;;  %v5731_v21 = vshrl.u32 %v5523_v48, 16  ;;  %v5689_v8 = vshll.u32 %v5518_v38, 16 }
 0x2a1   : > { %v5661_v53 = vrot.slane %v5659_v45, 4  ;;  %v5747_v48 = vrot.slane %v5745_v59, 5  ;;  %v5533_v59 = vld [vmem:[#allocation2 + $0xcc] sm:$0x1] }
 0x2a2   : > { %v5595_v40 = vrot.slane %v5593_v1, 5  ;;  %v5667_v45 = vrot.slane %v5665_v50, 5  ;;  %v5676_v1 = vor.u32 %v5675_v44, %v5672_v10  ;;  %v5755_v50 = vshrl.u32 %v5526_v20, 16  ;;  %v5528_v10 = vld [vmem:[#allocation2 + $0xb4] sm:$0xf] }
 0x2a3   : > { %v5691_v49 = vrot.slane %v5689_v8, 5 }
 0x2a4   : > { %v5596_v11 = vsel %vm9741_vm12, %v5591_v13, %v5595_v40 }
 0x2a5   : > { %v10369_v9 = vpop.f32.mrb[44].mxu0  ;;  %v7307_v28 = vcombine.low %v5586_v41, %v5596_v11 }
 0x2a6   : > { %8091 = vmatmul.mubr.msk.bf16.gmra.mrb[16].mxu1 %vm1454_vm1, %v7281_v39  ;;  %v5614_v39 = vor.u32 %v5613_v36, %v10354_v7  ;;  %v10374_v4 = vpop.f32.mrb[45].mxu0  ;;  %v5697_v36 = vshll.u32 %v5519_v6, 16  ;;  %v5709_v7 = vrot.slane %v5707_v43, 4 }
 0x2a7   : > { %8094 = vmatprep.mubr.msk.bf16.mxu1 %vm1454_vm1, %v7282_v55  ;;  %v10376_v55 = vrot.slane %v5655_v60, 5  ;;  %v10378_v18 = vpop.f32.mrb[46].mxu0  ;;  %v5653_v60 = vrot.slane %v5652_v12, 4 }
 0x2a8   : > { %v10383_v31 = vpop.f32.mrb[47].mxu0  ;;  %v5615_v37 = vrot.slane %v5614_v39, 4  ;;  %v5699_v54 = vrot.slane %v5697_v36, 5  ;;  %v5522_v39 = vld [vmem:[#allocation2 + $0x94] sm:$0xf]  ;;  %v5710_v6 = vor.u32 %v5709_v7, %v10405_v16 }
 0x2a9   : > { %v5662_v27 = vor.u32 %v5661_v53, %v10376_v55  ;;  %v5658_v40 = vsel %vm9741_vm12, %v5653_v60, %v10376_v55  ;;  %v5718_v41 = vshrl.u32 %v5522_v39, 16  ;;  %v5721_v13 = vshll.u32 %v5522_v39, 16  ;;  %v5524_v55 = vld [vmem:[#allocation2 + $0x9c] sm:$0x1] }
 0x2aa   : > { %v5620_v22 = vsel %vm9741_vm12, %v5615_v37, %v5619_v2  ;;  %v5700_v30 = vor.u32 %v5699_v54, %v5696_v51  ;;  %v5713_v37 = vshll.u32 %v5521_v56, 16  ;;  %v10421_v2 = vrot.slane %v5727_v52, 5 }
 0x2ab   : > { %v5663_v29 = vrot.slane %v5662_v27, 4  ;;  %v7308_v23 = vcombine.low %v5610_v26, %v5620_v22  ;;  %v5751_v27 = vshll.u32 %v5526_v20, 16  ;;  %v5720_v24 = vrot.slane %v5718_v41, 4 }
 0x2ac   : > { %v5723_v36 = vrot.slane %v5721_v13, 5  ;;  %v5711_v11 = vrot.slane %v5710_v6, 4  ;;  %v5715_v26 = vrot.slane %v5713_v37, 5  ;;  %v5737_v22 = vshll.u32 %v5524_v55, 16  ;;  %v5530_v6 = vld [vmem:[#allocation2 + $0xbc] sm:$0x1] }
 0x2ad   : > { %v5668_v14 = vsel %vm9741_vm12, %v5663_v29, %v5667_v45  ;;  %v5701_v17 = vrot.slane %v5700_v30, 4  ;;  %v5744_v45 = vrot.slane %v5742_v47, 4  ;;  %v5531_v29 = vld [vmem:[#allocation2 + $0xc4] sm:$0xf]  ;;  %v5766_v51 = vshrl.u32 %v5528_v10, 16 }
 0x2ae   : > { %8095 = vmatmul.mubr.msk.bf16.gmra.mrb[20].mxu1 %vm1454_vm1, %v7283_v58  ;;  %v5629_v58 = vrot.slane %v5628_v46, 4  ;;  %v5733_v46 = vrot.slane %v5731_v21, 4  ;;  %v7310_v12 = vcombine.low %v5658_v40, %v5668_v14  ;;  %v5769_v54 = vshll.u32 %v5528_v10, 16 }
 0x2af   : > { %8102 = vmatprep.mubr.msk.bf16.mxu1 %vm1454_vm1, %v7306_v57  ;;  %v5686_v57 = vor.u32 %v5685_v34, %v10403_v32  ;;  %v5757_v34 = vrot.slane %v5755_v50, 4  ;;  %v5724_v39 = vor.u32 %v5723_v36, %v5720_v24  ;;  %v5779_v56 = vshrl.u32 %v5529_v33, 16  ;;  %v5535_v24 = vld [vmem:[#allocation2 + $0xd8] sm:$0xf] }
 0x2b0   : > { %v5634_v53 = vsel %vm9741_vm12, %v5629_v58, %v10372_v0  ;;  %v5677_v0 = vrot.slane %v5676_v1, 4  ;;  %v5734_v60 = vor.u32 %v5733_v46, %v10421_v2  ;;  %v10435_v1 = vrot.slane %v5751_v27, 5  ;;  %v5534_v27 = vld [vmem:[#allocation2 + $0xd4] sm:$0xf] }
 0x2b1   : > { %v7309_v19 = vcombine.low %v5634_v53, %v5644_v15  ;;  %v5687_v62 = vrot.slane %v5686_v57, 4  ;;  %v5716_v52 = vsel %vm9741_vm12, %v5711_v11, %v5715_v26  ;;  %v5739_v21 = vrot.slane %v5737_v22, 5 }
 0x2b2   : > { %v5682_v43 = vsel %vm9741_vm12, %v5677_v0, %v10403_v32  ;;  %v5532_v32 = vld [vmem:[#allocation2 + $0xc8] sm:$0xf]  ;;  %v5790_v53 = vshrl.u32 %v5531_v29, 16  ;;  %v5793_v15 = vshll.u32 %v5531_v29, 16  ;;  %v5735_v40 = vrot.slane %v5734_v60, 4 }
 0x2b3   : > { %v5692_v7 = vsel %vm9741_vm12, %v5687_v62, %v5691_v49  ;;  %v5748_v8 = vor.u32 %v5747_v48, %v5744_v45  ;;  %v5799_v61 = vshll.u32 %v5532_v32, 16  ;;  %v5803_v14 = vshrl.u32 %v5532_v32, 16  ;;  %v5538_v29 = vld [vmem:[#allocation2 + $0xe8] sm:$0xf] }
 0x2b4   : > { %v5758_v57 = vor.u32 %v5757_v34, %v10435_v1  ;;  %v5768_v13 = vrot.slane %v5766_v51, 4  ;;  %v5771_v20 = vrot.slane %v5769_v54, 5  ;;  %v5706_v0 = vsel %vm9741_vm12, %v5701_v17, %v10405_v16 }
 0x2b5   : > { %v5725_v30 = vrot.slane %v5724_v39, 4  ;;  %v5781_v55 = vrot.slane %v5779_v56, 4  ;;  %v7311_v46 = vcombine.low %v5682_v43, %v5692_v7  ;;  %v7312_v47 = vcombine.low %v5706_v0, %v5716_v52  ;;  %v5536_v52 = vld [vmem:[#allocation2 + $0xdc] sm:$0x1] }
 0x2b6   : > { %8103 = vmatmul.mubr.msk.bf16.vlgmr.msra.gmra.mrb[24].mxu1 %vm1454_vm1, %v7307_v28  ;;  %v5527_v28 = vld [vmem:[#allocation2 + $0xac] sm:$0x1]  ;;  %v5740_v50 = vsel %vm9741_vm12, %v5735_v40, %v5739_v21  ;;  %v5749_v10 = vrot.slane %v5748_v8, 4  ;;  %v10451_v62 = vrot.slane %v5799_v61, 5  ;;  %v5805_v49 = vrot.slane %v5803_v14, 4 }
 0x2b7   : > { %8106 = vmatprep.mubr.msk.bf16.mxu1 %vm1454_vm1, %v7308_v23  ;;  %v5775_v23 = vshll.u32 %v5529_v33, 16  ;;  %v5761_v41 = vshll.u32 %v5527_v28, 16  ;;  %v5759_v16 = vrot.slane %v5758_v57, 4  ;;  %v5772_v11 = vor.u32 %v5771_v20, %v5768_v13  ;;  %v5537_v28 = vld [vmem:[#allocation2 + $0xe4] sm:$0xf] }
 0x2b8   : > { %v10423_v44 = vpop.f32.mrb[48].mxu0  ;;  %v5785_v26 = vshll.u32 %v5530_v6, 16  ;;  %v5730_v43 = vsel %vm9741_vm12, %v5725_v30, %v10421_v2  ;;  %v5809_v33 = vshll.u32 %v5533_v59, 16  ;;  %v5814_v60 = vshrl.u32 %v5534_v27, 16  ;;  %v5539_v30 = vld [vmem:[#allocation2 + $0xec] sm:$0x1] }
 0x2b9   : > { %v10425_v42 = vpop.f32.mrb[49].mxu0  ;;  %v10447_v37 = vrot.slane %v5775_v23, 5  ;;  %v5763_v36 = vrot.slane %v5761_v41, 5  ;;  %v5817_v45 = vshll.u32 %v5534_v27, 16  ;;  %v5823_v48 = vshll.u32 %v5535_v24, 16 }
 0x2ba   : > { %v10430_v58 = vpop.f32.mrb[50].mxu0  ;;  %v7313_v34 = vcombine.low %v5730_v43, %v5740_v50  ;;  %v5806_v51 = vor.u32 %v5805_v49, %v10451_v62  ;;  %v5827_v54 = vshrl.u32 %v5535_v24, 16  ;;  %v5754_v32 = vsel %vm9741_vm12, %v5749_v10, %v10435_v1  ;;  %v5540_v6 = vld [vmem:[#allocation2 + $0xf4] sm:$0xf]  ;;  %v5544_v24 = vld [vmem:[#allocation2 + $0x108] sm:$0xf] }
 0x2bb   : > { %v10433_v38 = vpop.f32.mrb[51].mxu0  ;;  %v5782_v22 = vor.u32 %v5781_v55, %v10447_v37  ;;  %v5764_v2 = vsel %vm9741_vm12, %v5759_v16, %v5763_v36  ;;  %v5773_v7 = vrot.slane %v5772_v11, 4  ;;  %v5787_v39 = vrot.slane %v5785_v26, 5 }
 0x2bc   : > { %v5811_v56 = vrot.slane %v5809_v33, 5  ;;  %v5847_v21 = vshll.u32 %v5538_v29, 16  ;;  %v5816_v40 = vrot.slane %v5814_v60, 4  ;;  %v5819_v8 = vrot.slane %v5817_v45, 5 }
 0x2bd   : > { %v5783_v23 = vrot.slane %v5782_v22, 4  ;;  %v10465_v61 = vrot.slane %v5823_v48, 5  ;;  %v5807_v57 = vrot.slane %v5806_v51, 4  ;;  %v5829_v1 = vrot.slane %v5827_v54, 4 }
 0x2be   : > { %8107 = vmatmul.mubr.msk.bf16.gmra.mrb[28].mxu1 %vm1454_vm1, %v7309_v19  ;;  %v5792_v19 = vrot.slane %v5790_v53, 4  ;;  %v5851_v53 = vshrl.u32 %v5538_v29, 16  ;;  %v5838_v41 = vshrl.u32 %v5537_v28, 16  ;;  %v5841_v13 = vshll.u32 %v5537_v28, 16 }
 0x2bf   : > { %8110 = vmatprep.mubr.msk.bf16.mxu1 %vm1454_vm1, %v7310_v12  ;;  %v5795_v12 = vrot.slane %v5793_v15, 5  ;;  %v7314_v0 = vcombine.low %v5754_v32, %v5764_v2  ;;  %v5788_v27 = vsel %vm9741_vm12, %v5783_v23, %v5787_v39  ;;  %v5820_v10 = vor.u32 %v5819_v8, %v5816_v40  ;;  %v5546_v32 = vld [vmem:[#allocation2 + $0x114] sm:$0xf]  ;;  %v5547_v23 = vld [vmem:[#allocation2 + $0x118] sm:$0xf] }
 0x2c0   : > { %v5853_v59 = vrot.slane %v5851_v53, 4  ;;  %v5833_v49 = vshll.u32 %v5536_v52, 16  ;;  %v5830_v16 = vor.u32 %v5829_v1, %v10465_v61  ;;  %v5840_v36 = vrot.slane %v5838_v41, 4  ;;  %v5542_v40 = vld [vmem:[#allocation2 + $0xfc] sm:$0x1] }
 0x2c1   : > { %v5796_v17 = vor.u32 %v5795_v12, %v5792_v19  ;;  %v5541_v19 = vld [vmem:[#allocation2 + $0xf8] sm:$0xf]  ;;  %v5843_v11 = vrot.slane %v5841_v13, 5  ;;  %v5857_v26 = vshll.u32 %v5539_v30, 16  ;;  %v5862_v43 = vshrl.u32 %v5540_v6, 16 }
 0x2c2   : > { %v5871_v22 = vshll.u32 %v5541_v19, 16  ;;  %v5875_v33 = vshrl.u32 %v5541_v19, 16  ;;  %v5865_v45 = vshll.u32 %v5540_v6, 16  ;;  %v5895_v48 = vshll.u32 %v5544_v24, 16  ;;  %v5545_v41 = vld [vmem:[#allocation2 + $0x10c] sm:$0x1] }
 0x2c3   : > { %v5797_v15 = vrot.slane %v5796_v17, 4  ;;  %v5543_v17 = vld [vmem:[#allocation2 + $0x104] sm:$0xf]  ;;  %v5821_v51 = vrot.slane %v5820_v10, 4  ;;  %v5835_v54 = vrot.slane %v5833_v49, 5  ;;  %v5831_v2 = vrot.slane %v5830_v16, 4 }
 0x2c4   : > { %v5886_v39 = vshrl.u32 %v5543_v17, 16  ;;  %v5889_v28 = vshll.u32 %v5543_v17, 16  ;;  %v5864_v52 = vrot.slane %v5862_v43, 4  ;;  %v5877_v53 = vrot.slane %v5875_v33, 4 }
 0x2c5   : > { %v5802_v50 = vsel %vm9741_vm12, %v5797_v15, %v10451_v62  ;;  %v5899_v62 = vshrl.u32 %v5544_v24, 16  ;;  %v5867_v8 = vrot.slane %v5865_v45, 5  ;;  %v5910_v13 = vshrl.u32 %v5546_v32, 16  ;;  %v5548_v45 = vld [vmem:[#allocation2 + $0x11c] sm:$0x1] }
 0x2c6   : > { %8111 = vmatmul.mubr.msk.bf16.gmra.mrb[0].mxu1 %vm1454_vm1, %v7311_v46  ;;  %v5778_v46 = vsel %vm9741_vm12, %v5773_v7, %v10447_v37  ;;  %v5812_v37 = vsel %vm9741_vm12, %v5807_v57, %v5811_v56  ;;  %v5844_v7 = vor.u32 %v5843_v11, %v5840_v36  ;;  %v5859_v56 = vrot.slane %v5857_v26, 5 }
 0x2c7   : > { %8114 = vmatprep.mubr.msk.bf16.mxu1 %vm1454_vm1, %v7312_v47  ;;  %v10477_v47 = vrot.slane %v5847_v21, 5  ;;  %v7315_v29 = vcombine.low %v5778_v46, %v5788_v27  ;;  %v5873_v21 = vrot.slane %v5871_v22, 5  ;;  %v5897_v57 = vrot.slane %v5895_v48, 5 }
 0x2c8   : > { %v5901_v1 = vrot.slane %v5899_v62, 4  ;;  %v5919_v30 = vshll.u32 %v5547_v23, 16  ;;  %v5923_v6 = vshrl.u32 %v5547_v23, 16  ;;  %v5845_v46 = vrot.slane %v5844_v7, 4 }
 0x2c9   : > { %v10467_v14 = vpop.f32.mrb[52].mxu0  ;;  %v5854_v60 = vor.u32 %v5853_v59, %v10477_v47  ;;  %v5888_v59 = vrot.slane %v5886_v39, 4  ;;  %v5891_v19 = vrot.slane %v5889_v28, 5  ;;  %v5826_v27 = vsel %vm9741_vm12, %v5821_v51, %v10465_v61 }
 0x2ca   : > { %v10469_v20 = vpop.f32.mrb[53].mxu0  ;;  %v5878_v10 = vor.u32 %v5877_v53, %v5873_v21  ;;  %v5881_v49 = vshll.u32 %v5542_v40, 16  ;;  %v5902_v16 = vor.u32 %v5901_v1, %v5897_v57  ;;  %v5905_v36 = vshll.u32 %v5545_v41, 16 }
 0x2cb   : > { %v10471_v55 = vpop.f32.mrb[54].mxu0  ;;  %v5855_v15 = vrot.slane %v5854_v60, 4  ;;  %v5912_v11 = vrot.slane %v5910_v13, 4  ;;  %v5921_v43 = vrot.slane %v5919_v30, 5  ;;  %v5925_v22 = vrot.slane %v5923_v6, 4 }
 0x2cc   : > { %v10479_v12 = vpop.f32.mrb[55].mxu0  ;;  %v5850_v61 = vsel %vm9741_vm12, %v5845_v46, %v10477_v47  ;;  %v5892_v60 = vor.u32 %v5891_v19, %v5888_v59  ;;  %v5929_v28 = vshll.u32 %v5548_v45, 16 }
 0x2cd   : > { %v5860_v24 = vsel %vm9741_vm12, %v5855_v15, %v5859_v56  ;;  %v5926_v47 = vor.u32 %v5925_v22, %v5921_v43 }
 0x2ce   : > { %8115 = vmatmul.mubr.msk.bf16.gmra.mrb[4].mxu1 %vm1454_vm1, %v7313_v34  ;;  %v7316_v34 = vcombine.low %v5802_v50, %v5812_v37  ;;  %v5836_v50 = vsel %vm9741_vm12, %v5831_v2, %v5835_v54  ;;  %v5868_v37 = vor.u32 %v5867_v8, %v5864_v52  ;;  %v7318_v62 = vcombine.low %v5850_v61, %v5860_v24 }
 0x2cf   : > { %8118 = vmatprep.mubr.msk.bf16.mxu1 %vm1454_vm1, %v7314_v0  ;;  %v5913_v0 = vshll.u32 %v5546_v32, 16  ;;  %v7317_v17 = vcombine.low %v5826_v27, %v5836_v50  ;;  %v5903_v54 = vrot.slane %v5902_v16, 4  ;;  %v5907_v32 = vrot.slane %v5905_v36, 5  ;;  %v8559_v16 = vld [vmem:[%s10745_s3 + $0x8] sm:$0xff]  }
 0x2d0   : > { %v5869_v7 = vrot.slane %v5868_v37, 4  ;;  %v5893_v23 = vrot.slane %v5892_v60, 4  ;;  %v5927_v40 = vrot.slane %v5926_v47, 4  ;;  %v5931_v8 = vrot.slane %v5929_v28, 5  ;;  %8136 = vmatprep.subr.bf16.mxu0 %v8559_v16 }
 0x2d1   : > { %v5915_v26 = vrot.slane %v5913_v0, 5  ;;  %v5908_v52 = vsel %vm9741_vm12, %v5903_v54, %v5907_v32  ;;  %8137 = vmatpush3.bf16.msra.mxu0 %v8559_v16 }
 0x2d2   : > { %v5874_v53 = vsel %vm9741_vm12, %v5869_v7, %v5873_v21  ;;  %v5898_v41 = vsel %vm9741_vm12, %v5893_v23, %v5897_v57  ;;  %v5932_v30 = vsel %vm9741_vm12, %v5927_v40, %v5931_v8 }
 0x2d3   : > { %v5916_v39 = vor.u32 %v5915_v26, %v5912_v11  ;;  %v7320_v13 = vcombine.low %v5898_v41, %v5908_v52  ;;  %v10542_v11 = vld [vmem:[%s10747_s5] ss:$0 sm:$0xff] }
 0x2d5   : > { %v5917_v15 = vrot.slane %v5916_v39, 4 }
 0x2d6   : > { %8119 = vmatmul.mubr.msk.bf16.gmra.mrb[8].mxu1 %vm1454_vm1, %v7315_v29  ;;  %v5879_v29 = vrot.slane %v5878_v10, 4 }
 0x2d7   : > { %8122 = vmatprep.mubr.msk.bf16.mxu1 %vm1454_vm1, %v7316_v34  ;;  %v5883_v34 = vrot.slane %v5881_v49, 5  ;;  %v5922_v0 = vsel %vm9741_vm12, %v5917_v15, %v5921_v43 }
 0x2d8   : > { %v7321_v6 = vcombine.low %v5922_v0, %v5932_v30 }
 0x2d9   : > { %v10500_v33 = vpop.f32.mrb[56].mxu0  ;;  %v5884_v56 = vsel %vm9741_vm12, %v5879_v29, %v5883_v34 }
 0x2da   : > { %v10505_v48 = vpop.f32.mrb[57].mxu0  ;;  %v7319_v1 = vcombine.low %v5874_v53, %v5884_v56 }
 0x2db   : > { %v10507_v51 = vpop.f32.mrb[58].mxu0 }
 0x2dc   : > { %v10510_v2 = vpop.f32.mrb[59].mxu0 }
 0x2de   : > { %8123 = vmatmul.mubr.msk.bf16.gmra.mrb[12].mxu1 %vm1454_vm1, %v7317_v17 }
 0x2df   : > { %8126 = vmatprep.mubr.msk.bf16.mxu1 %vm1454_vm1, %v7318_v62 }
 0x2e6   : > { %8127 = vmatmul.mubr.msk.bf16.gmra.mrb[16].mxu1 %vm1454_vm1, %v7319_v1 }
 0x2e7   : > { %8130 = vmatprep.mubr.msk.bf16.mxu1 %vm1454_vm1, %v7320_v13 }
 0x2ec   : > { %v10528_v21 = vpop.f32.mrb[60].mxu0 }
 0x2ed   : > { %v10530_v46 = vpop.f32.mrb[61].mxu0 }
 0x2ee   : > { %8131 = vmatmul.mubr.msk.bf16.gmra.mrb[20].mxu1 %vm1454_vm1, %v7321_v6  ;;  %v10532_v59 = vpop.f32.mrb[62].mxu0 }
 0x2ef   : > { %v10534_v57 = vpop.f32.mrb[63].mxu0 }
 0x2f6   : > { %v7924_v19 = vpop.f32.mrb[32].mxu0 }
 0x2f7   : > { %v3221_v27 = vpop.f32.mrb[33].mxu0 }
 0x2f8   : > { %v7925_v50 = vpop.f32.mrb[34].mxu0 }
 0x2f9   : > { %v3224_v10 = vpop.f32.mrb[35].mxu0 }
 0x302   : > { %v7928_v49 = vpop.f32.mrb[36].mxu0 }
 0x303   : > { %v3237_v24 = vpop.f32.mrb[37].mxu0 }
 0x304   : > { %v7929_v37 = vpop.f32.mrb[38].mxu0 }
 0x305   : > { %v3240_v63 = vpop.f32.mrb[39].mxu0 }
 0x389   : > { %v8104_v36 = vpop.f32.mrb[24].mxu1 }
 0x38a   : > { %v8174_v26 = vadd.f32 %v8104_v36, %v7924_v19  ;;  %v6080_v43 = vpop.f32.mrb[25].mxu1 }
 0x38b   : > { %v8175_v22 = vadd.f32 %v6080_v43, %v3221_v27  ;;  %v8105_v17 = vpop.f32.mrb[26].mxu1 }
 0x38c   : > { %v6248_v61 = vadd.f32 %v8174_v26, %v10542_v11  ;;  %v8176_v60 = vadd.f32 %v8105_v17, %v7925_v50  ;;  %v6083_v45 = vpop.f32.mrb[27].mxu1 }
 0x38d   : > { %v6246_v62 = vadd.f32 %v8175_v22, %v10542_v11  ;;  %v8177_v29 = vadd.f32 %v6083_v45, %v3224_v10 }
 0x38e   : > { %v6249_v34 = vadd.f32 %v8176_v60, %v10542_v11  ;;  %v6280_v32 = vmax.f32 %v6248_v61, 0.0 }
 0x38f   : > { %v6247_v54 = vadd.f32 %v8177_v29, %v10542_v11  ;;  %v6278_v39 = vmax.f32 %v6246_v62, 0.0 }
 0x390   : > { %v6281_v7 = vmax.f32 %v6249_v34, 0.0 }
 0x391   : > { %v6279_v47 = vmax.f32 %v6247_v54, 0.0  ;;  %v8108_v28 = vpop.f32.mrb[28].mxu1 }
 0x392   : > { %v6311_v23 = vpack.c.bf16 %v6281_v7, %v6280_v32  ;;  %v8178_v56 = vadd.f32 %v8108_v28, %v7928_v49  ;;  %v6096_v52 = vpop.f32.mrb[29].mxu1 }
 0x393   : > { %v6310_v53 = vpack.c.bf16 %v6279_v47, %v6278_v39  ;;  %v8179_v15 = vadd.f32 %v6096_v52, %v3237_v24  ;;  %v8109_v40 = vpop.f32.mrb[30].mxu1 }
 0x394   : > { %v6252_v8 = vadd.f32 %v8178_v56, %v10542_v11  ;;  %v8180_v1 = vadd.f32 %v8109_v40, %v7929_v37  ;;  %v6099_v41 = vpop.f32.mrb[31].mxu1 }
 0x395   : > { %v6250_v13 = vadd.f32 %v8179_v15, %v10542_v11  ;;  %v8181_v0 = vadd.f32 %v6099_v41, %v3240_v63  ;;  %8138 = vmatprep.mubr.msk.bf16.mxu0 %vm1454_vm1, %v6310_v53 }
 0x396   : > { %v6253_v30 = vadd.f32 %v8180_v1, %v10542_v11  ;;  %8139 = vmatmul.mubr.msk.bf16.vlgmr.msra.gmra.mrb[64].mxu0 %vm1454_vm1, %v6311_v23  ;;  %v6284_v19 = vmax.f32 %v6252_v8, 0.0 }
 0x397   : > { %v6251_v6 = vadd.f32 %v8181_v0, %v10542_v11  ;;  %v6282_v50 = vmax.f32 %v6250_v13, 0.0 }
 0x398   : > { %v6285_v27 = vmax.f32 %v6253_v30, 0.0 }
 0x399   : > { %v6283_v10 = vmax.f32 %v6251_v6, 0.0  ;;  %v8112_v49 = vpop.f32.mrb[0].mxu1 }
 0x39a   : > { %v6313_v24 = vpack.c.bf16 %v6285_v27, %v6284_v19  ;;  %v8182_v37 = vadd.f32 %v8112_v49, %v10337_v5  ;;  %v6112_v16 = vpop.f32.mrb[1].mxu1 }
 0x39b   : > { %v6312_v36 = vpack.c.bf16 %v6283_v10, %v6282_v50  ;;  %v8183_v63 = vadd.f32 %v6112_v16, %v10339_v35  ;;  %v8113_v26 = vpop.f32.mrb[2].mxu1 }
 0x39c   : > { %v6256_v43 = vadd.f32 %v8182_v37, %v10542_v11  ;;  %v8184_v22 = vadd.f32 %v8113_v26, %v10343_v25  ;;  %v6115_v17 = vpop.f32.mrb[3].mxu1 }
 0x39d   : > { %v6254_v61 = vadd.f32 %v8183_v63, %v10542_v11  ;;  %v8185_v60 = vadd.f32 %v6115_v17, %v10345_v3  ;;  %8142 = vmatprep.mubr.msk.bf16.mxu0 %vm1454_vm1, %v6312_v36 }
 0x39e   : > { %v6257_v45 = vadd.f32 %v8184_v22, %v10542_v11  ;;  %8143 = vmatmul.mubr.msk.bf16.gmra.mrb[68].mxu0 %vm1454_vm1, %v6313_v24  ;;  %v6288_v62 = vmax.f32 %v6256_v43, 0.0 }
 0x39f   : > { %v6255_v5 = vadd.f32 %v8185_v60, %v10542_v11  ;;  %v6286_v29 = vmax.f32 %v6254_v61, 0.0 }
 0x3a0   : > { %v6289_v35 = vmax.f32 %v6257_v45, 0.0 }
 0x3a1   : > { %v6287_v34 = vmax.f32 %v6255_v5, 0.0  ;;  %v8116_v54 = vpop.f32.mrb[4].mxu1 }
 0x3a2   : > { %v6315_v32 = vpack.c.bf16 %v6289_v35, %v6288_v62  ;;  %v8186_v25 = vadd.f32 %v8116_v54, %v10369_v9  ;;  %v6128_v7 = vpop.f32.mrb[5].mxu1 }
 0x3a3   : > { %v6314_v39 = vpack.c.bf16 %v6287_v34, %v6286_v29  ;;  %v8187_v3 = vadd.f32 %v6128_v7, %v10374_v4  ;;  %v8117_v47 = vpop.f32.mrb[6].mxu1 }
 0x3a4   : > { %v6260_v28 = vadd.f32 %v8186_v25, %v10542_v11  ;;  %v8188_v23 = vadd.f32 %v8117_v47, %v10378_v18  ;;  %v6131_v56 = vpop.f32.mrb[7].mxu1 }
 0x3a5   : > { %v6258_v52 = vadd.f32 %v8187_v3, %v10542_v11  ;;  %v8189_v53 = vadd.f32 %v6131_v56, %v10383_v31  ;;  %8146 = vmatprep.mubr.msk.bf16.mxu0 %vm1454_vm1, %v6314_v39 }
 0x3a6   : > { %v6261_v15 = vadd.f32 %v8188_v23, %v10542_v11  ;;  %8147 = vmatmul.mubr.msk.bf16.gmra.mrb[72].mxu0 %vm1454_vm1, %v6315_v32  ;;  %v6292_v40 = vmax.f32 %v6260_v28, 0.0 }
 0x3a7   : > { %v6259_v9 = vadd.f32 %v8189_v53, %v10542_v11  ;;  %v6290_v8 = vmax.f32 %v6258_v52, 0.0 }
 0x3a8   : > { %v6293_v4 = vmax.f32 %v6261_v15, 0.0 }
 0x3a9   : > { %v6291_v1 = vmax.f32 %v6259_v9, 0.0  ;;  %v8120_v41 = vpop.f32.mrb[8].mxu1 }
 0x3aa   : > { %v6317_v13 = vpack.c.bf16 %v6293_v4, %v6292_v40  ;;  %v8190_v18 = vadd.f32 %v8120_v41, %v10423_v44  ;;  %v6144_v0 = vpop.f32.mrb[9].mxu1 }
 0x3ab   : > { %v6316_v30 = vpack.c.bf16 %v6291_v1, %v6290_v8  ;;  %v8191_v31 = vadd.f32 %v6144_v0, %v10425_v42  ;;  %v8121_v6 = vpop.f32.mrb[10].mxu1 }
 0x3ac   : > { %v6264_v19 = vadd.f32 %v8190_v18, %v10542_v11  ;;  %v8192_v27 = vadd.f32 %v8121_v6, %v10430_v58  ;;  %v6147_v50 = vpop.f32.mrb[11].mxu1 }
 0x3ad   : > { %v6262_v10 = vadd.f32 %v8191_v31, %v10542_v11  ;;  %v8193_v49 = vadd.f32 %v6147_v50, %v10433_v38  ;;  %8150 = vmatprep.mubr.msk.bf16.mxu0 %vm1454_vm1, %v6316_v30 }
 0x3ae   : > { %v6265_v24 = vadd.f32 %v8192_v27, %v10542_v11  ;;  %8151 = vmatmul.mubr.msk.bf16.gmra.mrb[76].mxu0 %vm1454_vm1, %v6317_v13  ;;  %v6296_v37 = vmax.f32 %v6264_v19, 0.0 }
 0x3af   : > { %v6263_v44 = vadd.f32 %v8193_v49, %v10542_v11  ;;  %v6294_v16 = vmax.f32 %v6262_v10, 0.0 }
 0x3b0   : > { %v6297_v42 = vmax.f32 %v6265_v24, 0.0  ;;  %v8579_v24 = vld [vmem:[%s8765_s23 + $0x8] sm:$0xff]  }
 0x3b1   : > { %v6295_v36 = vmax.f32 %v6263_v44, 0.0  ;;  %v8124_v63 = vpop.f32.mrb[12].mxu1  ;;  %v6560_v44 = vunpack.c.l.bf16 %v8579_v24 }
 0x3b2   : > { %v6319_v26 = vpack.c.bf16 %v6297_v42, %v6296_v37  ;;  %v8194_v58 = vadd.f32 %v8124_v63, %v10467_v14  ;;  %v6160_v43 = vpop.f32.mrb[13].mxu1  ;;  %v6561_v63 = vunpack.c.h.bf16 %v8579_v24 }
 0x3b3   : > { %v6318_v22 = vpack.c.bf16 %v6295_v36, %v6294_v16  ;;  %v8195_v38 = vadd.f32 %v6160_v43, %v10469_v20  ;;  %v8125_v17 = vpop.f32.mrb[14].mxu1 }
 0x3b4   : > { %v6268_v61 = vadd.f32 %v8194_v58, %v10542_v11  ;;  %v8196_v60 = vadd.f32 %v8125_v17, %v10471_v55  ;;  %v6163_v45 = vpop.f32.mrb[15].mxu1 }
 0x3b5   : > { %v6266_v5 = vadd.f32 %v8195_v38, %v10542_v11  ;;  %v8197_v62 = vadd.f32 %v6163_v45, %v10479_v12  ;;  %8154 = vmatprep.mubr.msk.bf16.mxu0 %vm1454_vm1, %v6318_v22 }
 0x3b6   : > { %v6269_v35 = vadd.f32 %v8196_v60, %v10542_v11  ;;  %8155 = vmatmul.mubr.msk.bf16.gmra.mrb[80].mxu0 %vm1454_vm1, %v6319_v26  ;;  %v6300_v29 = vmax.f32 %v6268_v61, 0.0 }
 0x3b7   : > { %v6267_v14 = vadd.f32 %v8197_v62, %v10542_v11  ;;  %v6298_v34 = vmax.f32 %v6266_v5, 0.0 }
 0x3b8   : > { %v6301_v20 = vmax.f32 %v6269_v35, 0.0 }
 0x3b9   : > { %v6299_v54 = vmax.f32 %v6267_v14, 0.0  ;;  %v8128_v32 = vpop.f32.mrb[16].mxu1  ;;  %v8581_v14 = vld [vmem:[%s8765_s23 + $0x18] sm:$0xff]  }
 0x3ba   : > { %v6321_v25 = vpack.c.bf16 %v6301_v20, %v6300_v29  ;;  %v8198_v55 = vadd.f32 %v8128_v32, %v10500_v33  ;;  %v6176_v7 = vpop.f32.mrb[17].mxu1  ;;  %v6564_v29 = vunpack.c.l.bf16 %v8581_v14  ;;  %v8582_v32 = vld [vmem:[%s8765_s23 + $0x10] sm:$0xff]  }
 0x3bb   : > { %v6320_v39 = vpack.c.bf16 %v6299_v54, %v6298_v34  ;;  %v8199_v12 = vadd.f32 %v6176_v7, %v10505_v48  ;;  %v8129_v3 = vpop.f32.mrb[18].mxu1 }
 0x3bc   : > { %v6272_v47 = vadd.f32 %v8198_v55, %v10542_v11  ;;  %v8200_v28 = vadd.f32 %v8129_v3, %v10507_v51  ;;  %v6179_v23 = vpop.f32.mrb[19].mxu1 }
 0x3bd   : > { %v6270_v56 = vadd.f32 %v8199_v12, %v10542_v11  ;;  %v8201_v52 = vadd.f32 %v6179_v23, %v10510_v2  ;;  %8158 = vmatprep.mubr.msk.bf16.mxu0 %vm1454_vm1, %v6320_v39  ;;  %v6565_v12 = vunpack.c.h.bf16 %v8581_v14  ;;  %v6563_v23 = vunpack.c.h.bf16 %v8582_v32 }
 0x3be   : > { %v6273_v53 = vadd.f32 %v8200_v28, %v10542_v11  ;;  %8159 = vmatmul.mubr.msk.bf16.gmra.mrb[84].mxu0 %vm1454_vm1, %v6321_v25  ;;  %v6304_v15 = vmax.f32 %v6272_v47, 0.0  ;;  %v6562_v25 = vunpack.c.l.bf16 %v8582_v32 }
 0x3bf   : > { %v6271_v33 = vadd.f32 %v8201_v52, %v10542_v11  ;;  %v6302_v9 = vmax.f32 %v6270_v56, 0.0 }
 0x3c0   : > { %v6305_v48 = vmax.f32 %v6273_v53, 0.0 }
 0x3c1   : > { %v6303_v40 = vmax.f32 %v6271_v33, 0.0  ;;  %v8132_v4 = vpop.f32.mrb[20].mxu1 }
 0x3c2   : > { %v6323_v8 = vpack.c.bf16 %v6305_v48, %v6304_v15  ;;  %v8202_v51 = vadd.f32 %v8132_v4, %v10528_v21  ;;  %v6192_v1 = vpop.f32.mrb[21].mxu1 }
 0x3c3   : > { %v6322_v41 = vpack.c.bf16 %v6303_v40, %v6302_v9  ;;  %v8203_v2 = vadd.f32 %v6192_v1, %v10530_v46  ;;  %v8133_v13 = vpop.f32.mrb[22].mxu1 }
 0x3c4   : > { %v6276_v18 = vadd.f32 %v8202_v51, %v10542_v11  ;;  %v8204_v0 = vadd.f32 %v8133_v13, %v10532_v59  ;;  %v6195_v30 = vpop.f32.mrb[23].mxu1  ;;  %v8584_v13 = vld [vmem:[%s8765_s23 + $0x20] sm:$0xff]  }
 0x3c5   : > { %v6274_v31 = vadd.f32 %v8203_v2, %v10542_v11  ;;  %v8205_v6 = vadd.f32 %v6195_v30, %v10534_v57  ;;  %8162 = vmatprep.mubr.msk.bf16.mxu0 %vm1454_vm1, %v6322_v41  ;;  %v10619_v57 = vld [vmem:[%s10748_s6] ss:$0 sm:$0xff] }
 0x3c6   : > { %v6277_v21 = vadd.f32 %v8204_v0, %v10542_v11  ;;  %8163 = vmatmul.mubr.msk.bf16.gmra.mrb[88].mxu0 %vm1454_vm1, %v6323_v8  ;;  %v6308_v19 = vmax.f32 %v6276_v18, 0.0  ;;  %v8583_v8 = vld [vmem:[%s8765_s23 + $0x28] sm:$0xff]   ;;  %v6566_v18 = vunpack.c.l.bf16 %v8584_v13 }
 0x3c7   : > { %v6275_v46 = vadd.f32 %v8205_v6, %v10542_v11  ;;  %v6306_v50 = vmax.f32 %v6274_v31, 0.0  ;;  %v8580_v11 = vld [vmem:[%s8765_s23] sm:$0xff]   ;;  %v6568_v51 = vunpack.c.l.bf16 %v8583_v8  ;;  %v6569_v6 = vunpack.c.h.bf16 %v8583_v8 }
 0x3c8   : > { %v6309_v27 = vmax.f32 %v6277_v21, 0.0  ;;  %v6558_v37 = vunpack.c.l.bf16 %v8580_v11  ;;  %v6559_v26 = vunpack.c.h.bf16 %v8580_v11 }
 0x3c9   : > { %v6307_v10 = vmax.f32 %v6275_v46, 0.0 }
 0x3ca   : > { %v6325_v59 = vpack.c.bf16 %v6309_v27, %v6308_v19  ;;  %v6567_v27 = vunpack.c.h.bf16 %v8584_v13 }
 0x3cb   : > { %v6324_v49 = vpack.c.bf16 %v6307_v10, %v6306_v50 }
 0x3cd   : > { %8166 = vmatprep.mubr.msk.bf16.mxu0 %vm1454_vm1, %v6324_v49 }
 0x3ce   : > { %8167 = vmatmul.mubr.msk.bf16.gmra.mrb[92].mxu0 %vm1454_vm1, %v6325_v59 }
 0x469   : > { %v8140_v42 = vpop.f32.mrb[64].mxu0 }
 0x46a   : > { %v6440_v16 = vadd.f32 %v8140_v42, %v10619_v57  ;;  %v6431_v36 = vpop.f32.mrb[65].mxu0 }
 0x46b   : > { %v6432_v58 = vadd.f32 %v10619_v57, %v6431_v36  ;;  %v8141_v43 = vpop.f32.mrb[66].mxu0 }
 0x46c   : > { %v6592_v22 = vadd.f32 %v6560_v44, %v6440_v16  ;;  %v6443_v38 = vadd.f32 %v8141_v43, %v10619_v57  ;;  %v6434_v17 = vpop.f32.mrb[67].mxu0  ;;  %v8585_v16 = vld [vmem:[%s8765_s23 + $0x38] sm:$0xff]   ;;  %v8586_v43 = vld [vmem:[%s8765_s23 + $0x30] sm:$0xff]  }
 0x46d   : > { %v6590_v61 = vadd.f32 %v6558_v37, %v6432_v58  ;;  %v6435_v60 = vadd.f32 %v10619_v57, %v6434_v17  ;;  %v6572_v36 = vunpack.c.l.bf16 %v8585_v16 }
 0x46e   : > { %v6593_v45 = vadd.f32 %v6561_v63, %v6443_v38  ;;  %v6624_v62 = vmax.f32 %v6592_v22, 0.0  ;;  %v6570_v22 = vunpack.c.l.bf16 %v8586_v43 }
 0x46f   : > { %v6591_v5 = vadd.f32 %v6559_v26, %v6435_v60  ;;  %v6622_v20 = vmax.f32 %v6590_v61, 0.0  ;;  %v6573_v60 = vunpack.c.h.bf16 %v8585_v16 }
 0x470   : > { %v6625_v35 = vmax.f32 %v6593_v45, 0.0 }
 0x471   : > { %v6623_v34 = vmax.f32 %v6591_v5, 0.0  ;;  %v8144_v54 = vpop.f32.mrb[68].mxu0 }
 0x472   : > { %v7471_v55 = vpack.c.bf16 %v6625_v35, %v6624_v62  ;;  %v6456_v7 = vadd.f32 %v8144_v54, %v10619_v57  ;;  %v6447_v39 = vpop.f32.mrb[69].mxu0  ;;  %v6571_v35 = vunpack.c.h.bf16 %v8586_v43 }
 0x473   : > { %v7466_v3 = vpack.c.bf16 %v6623_v34, %v6622_v20  ;;  %v6448_v47 = vadd.f32 %v10619_v57, %v6447_v39  ;;  %v8145_v28 = vpop.f32.mrb[70].mxu0  ;;  %v8587_v39 = vld [vmem:[%s8765_s23 + $0x48] sm:$0xff]  }
 0x474   : > { %7543 = vst [vmem:[%s10634_s22 + $0x8] sm:$0xff] %v7471_v55   ;;  %v6596_v56 = vadd.f32 %v6564_v29, %v6456_v7  ;;  %v6459_v52 = vadd.f32 %v8145_v28, %v10619_v57  ;;  %v6450_v53 = vpop.f32.mrb[71].mxu0 }
 0x475   : > { %7467 = vst [vmem:[%s10634_s22] sm:$0xff] %v7466_v3   ;;  %v6594_v33 = vadd.f32 %v6562_v25, %v6448_v47  ;;  %v6451_v15 = vadd.f32 %v10619_v57, %v6450_v53 }
 0x476   : > { %v6597_v48 = vadd.f32 %v6565_v12, %v6459_v52  ;;  %v6628_v40 = vmax.f32 %v6596_v56, 0.0  ;;  %v6576_v12 = vunpack.c.l.bf16 %v8587_v39 }
 0x477   : > { %v6595_v9 = vadd.f32 %v6563_v23, %v6451_v15  ;;  %v6626_v1 = vmax.f32 %v6594_v33, 0.0  ;;  %v8588_v23 = vld [vmem:[%s8765_s23 + $0x40] sm:$0xff]   ;;  %v6577_v15 = vunpack.c.h.bf16 %v8587_v39 }
 0x478   : > { %v6629_v4 = vmax.f32 %v6597_v48, 0.0  ;;  %v6574_v56 = vunpack.c.l.bf16 %v8588_v23 }
 0x479   : > { %v6627_v41 = vmax.f32 %v6595_v9, 0.0  ;;  %v8148_v2 = vpop.f32.mrb[72].mxu0 }
 0x47a   : > { %v7481_v0 = vpack.c.bf16 %v6629_v4, %v6628_v40  ;;  %v6472_v30 = vadd.f32 %v8148_v2, %v10619_v57  ;;  %v6463_v31 = vpop.f32.mrb[73].mxu0  ;;  %v6575_v4 = vunpack.c.h.bf16 %v8588_v23 }
 0x47b   : > { %v7476_v21 = vpack.c.bf16 %v6627_v41, %v6626_v1  ;;  %v6464_v46 = vadd.f32 %v10619_v57, %v6463_v31  ;;  %v8149_v19 = vpop.f32.mrb[74].mxu0  ;;  %v8589_v31 = vld [vmem:[%s8765_s23 + $0x58] sm:$0xff]  }
 0x47c   : > { %7545 = vst [vmem:[%s10634_s22 + $0x18] sm:$0xff] %v7481_v0   ;;  %v6600_v50 = vadd.f32 %v6568_v51, %v6472_v30  ;;  %v6475_v10 = vadd.f32 %v8149_v19, %v10619_v57  ;;  %v6466_v59 = vpop.f32.mrb[75].mxu0 }
 0x47d   : > { %7544 = vst [vmem:[%s10634_s22 + $0x10] sm:$0xff] %v7476_v21   ;;  %v6598_v49 = vadd.f32 %v6566_v18, %v6464_v46  ;;  %v6467_v24 = vadd.f32 %v10619_v57, %v6466_v59 }
 0x47e   : > { %v6601_v44 = vadd.f32 %v6569_v6, %v6475_v10  ;;  %v6632_v37 = vmax.f32 %v6600_v50, 0.0  ;;  %v6580_v6 = vunpack.c.l.bf16 %v8589_v31 }
 0x47f   : > { %v6599_v11 = vadd.f32 %v6567_v27, %v6467_v24  ;;  %v6630_v63 = vmax.f32 %v6598_v49, 0.0  ;;  %v8590_v27 = vld [vmem:[%s8765_s23 + $0x50] sm:$0xff]   ;;  %v6581_v24 = vunpack.c.h.bf16 %v8589_v31 }
 0x480   : > { %v6633_v42 = vmax.f32 %v6601_v44, 0.0  ;;  %v6578_v50 = vunpack.c.l.bf16 %v8590_v27 }
 0x481   : > { %v6631_v26 = vmax.f32 %v6599_v11, 0.0  ;;  %v8152_v58 = vpop.f32.mrb[76].mxu0 }
 0x482   : > { %v7491_v38 = vpack.c.bf16 %v6633_v42, %v6632_v37  ;;  %v6488_v17 = vadd.f32 %v8152_v58, %v10619_v57  ;;  %v6479_v61 = vpop.f32.mrb[77].mxu0  ;;  %v6579_v42 = vunpack.c.h.bf16 %v8590_v27 }
 0x483   : > { %v7486_v45 = vpack.c.bf16 %v6631_v26, %v6630_v63  ;;  %v6480_v5 = vadd.f32 %v10619_v57, %v6479_v61  ;;  %v8153_v62 = vpop.f32.mrb[78].mxu0  ;;  %v8591_v61 = vld [vmem:[%s8765_s23 + $0x68] sm:$0xff]  }
 0x484   : > { %7547 = vst [vmem:[%s10634_s22 + $0x28] sm:$0xff] %v7491_v38   ;;  %v6604_v14 = vadd.f32 %v6572_v36, %v6488_v17  ;;  %v6491_v29 = vadd.f32 %v8153_v62, %v10619_v57  ;;  %v6482_v20 = vpop.f32.mrb[79].mxu0 }
 0x485   : > { %7546 = vst [vmem:[%s10634_s22 + $0x20] sm:$0xff] %v7486_v45   ;;  %v6602_v34 = vadd.f32 %v6570_v22, %v6480_v5  ;;  %v6483_v54 = vadd.f32 %v10619_v57, %v6482_v20 }
 0x486   : > { %v6605_v32 = vadd.f32 %v6573_v60, %v6491_v29  ;;  %v6636_v55 = vmax.f32 %v6604_v14, 0.0  ;;  %v6584_v60 = vunpack.c.l.bf16 %v8591_v61 }
 0x487   : > { %v6603_v25 = vadd.f32 %v6571_v35, %v6483_v54  ;;  %v6634_v3 = vmax.f32 %v6602_v34, 0.0  ;;  %v8592_v35 = vld [vmem:[%s8765_s23 + $0x60] sm:$0xff]   ;;  %v6585_v54 = vunpack.c.h.bf16 %v8591_v61 }
 0x488   : > { %v6637_v7 = vmax.f32 %v6605_v32, 0.0  ;;  %v6582_v14 = vunpack.c.l.bf16 %v8592_v35 }
 0x489   : > { %v6635_v47 = vmax.f32 %v6603_v25, 0.0  ;;  %v8156_v28 = vpop.f32.mrb[80].mxu0 }
 0x48a   : > { %v7501_v52 = vpack.c.bf16 %v6637_v7, %v6636_v55  ;;  %v6504_v53 = vadd.f32 %v8156_v28, %v10619_v57  ;;  %v6495_v33 = vpop.f32.mrb[81].mxu0  ;;  %v6583_v7 = vunpack.c.h.bf16 %v8592_v35 }
 0x48b   : > { %v7496_v48 = vpack.c.bf16 %v6635_v47, %v6634_v3  ;;  %v6496_v9 = vadd.f32 %v10619_v57, %v6495_v33  ;;  %v8157_v40 = vpop.f32.mrb[82].mxu0  ;;  %v8593_v33 = vld [vmem:[%s8765_s23 + $0x78] sm:$0xff]  }
 0x48c   : > { %7549 = vst [vmem:[%s10634_s22 + $0x38] sm:$0xff] %v7501_v52   ;;  %v6608_v8 = vadd.f32 %v6576_v12, %v6504_v53  ;;  %v6507_v51 = vadd.f32 %v8157_v40, %v10619_v57  ;;  %v6498_v1 = vpop.f32.mrb[83].mxu0 }
 0x48d   : > { %7548 = vst [vmem:[%s10634_s22 + $0x30] sm:$0xff] %v7496_v48   ;;  %v6606_v41 = vadd.f32 %v6574_v56, %v6496_v9  ;;  %v6499_v2 = vadd.f32 %v10619_v57, %v6498_v1 }
 0x48e   : > { %v6609_v13 = vadd.f32 %v6577_v15, %v6507_v51  ;;  %v6640_v0 = vmax.f32 %v6608_v8, 0.0  ;;  %v6588_v15 = vunpack.c.l.bf16 %v8593_v33 }
 0x48f   : > { %v6607_v18 = vadd.f32 %v6575_v4, %v6499_v2  ;;  %v6638_v21 = vmax.f32 %v6606_v41, 0.0  ;;  %v8594_v4 = vld [vmem:[%s8765_s23 + $0x70] sm:$0xff]   ;;  %v6589_v2 = vunpack.c.h.bf16 %v8593_v33  ;;  %s7462_s23 = sshll.u32 %s8724_s28, 11  ;;  %s10701_s28 = scalar_lea.sflag [#allocation4], %s269_s20 }
 0x490   : > { %v6641_v30 = vmax.f32 %v6609_v13, 0.0  ;;  %v6586_v8 = vunpack.c.l.bf16 %v8594_v4  ;;  %s10693_s13 = scalar_lea.hbm %s10749_s7, %s7462_s23 }
 0x491   : > { %v6639_v46 = vmax.f32 %v6607_v18, 0.0  ;;  %v8160_v19 = vpop.f32.mrb[84].mxu0 }
 0x492   : > { %v7511_v10 = vpack.c.bf16 %v6641_v30, %v6640_v0  ;;  %v6520_v59 = vadd.f32 %v8160_v19, %v10619_v57  ;;  %v6511_v49 = vpop.f32.mrb[85].mxu0  ;;  %v6587_v30 = vunpack.c.h.bf16 %v8594_v4 }
 0x493   : > { %v7506_v44 = vpack.c.bf16 %v6639_v46, %v6638_v21  ;;  %v6512_v11 = vadd.f32 %v10619_v57, %v6511_v49  ;;  %v8161_v37 = vpop.f32.mrb[86].mxu0 }
 0x494   : > { %7551 = vst [vmem:[%s10634_s22 + $0x48] sm:$0xff] %v7511_v10   ;;  %v6612_v16 = vadd.f32 %v6580_v6, %v6520_v59  ;;  %v6523_v36 = vadd.f32 %v8161_v37, %v10619_v57  ;;  %v6514_v63 = vpop.f32.mrb[87].mxu0 }
 0x495   : > { %7550 = vst [vmem:[%s10634_s22 + $0x40] sm:$0xff] %v7506_v44   ;;  %v6610_v26 = vadd.f32 %v6578_v50, %v6512_v11  ;;  %v6515_v58 = vadd.f32 %v10619_v57, %v6514_v63 }
 0x496   : > { %v6613_v43 = vadd.f32 %v6581_v24, %v6523_v36  ;;  %v6644_v38 = vmax.f32 %v6612_v16, 0.0 }
 0x497   : > { %v6611_v22 = vadd.f32 %v6579_v42, %v6515_v58  ;;  %v6642_v45 = vmax.f32 %v6610_v26, 0.0 }
 0x498   : > { %v6645_v17 = vmax.f32 %v6613_v43, 0.0 }
 0x499   : > { %v6643_v5 = vmax.f32 %v6611_v22, 0.0  ;;  %v8164_v62 = vpop.f32.mrb[88].mxu0 }
 0x49a   : > { %v7521_v29 = vpack.c.bf16 %v6645_v17, %v6644_v38  ;;  %v6536_v20 = vadd.f32 %v8164_v62, %v10619_v57  ;;  %v6527_v34 = vpop.f32.mrb[89].mxu0 }
 0x49b   : > { %v7516_v32 = vpack.c.bf16 %v6643_v5, %v6642_v45  ;;  %v6528_v25 = vadd.f32 %v10619_v57, %v6527_v34  ;;  %v8165_v55 = vpop.f32.mrb[90].mxu0 }
 0x49c   : > { %7553 = vst [vmem:[%s10634_s22 + $0x58] sm:$0xff] %v7521_v29   ;;  %v6616_v39 = vadd.f32 %v6584_v60, %v6536_v20  ;;  %v6539_v12 = vadd.f32 %v8165_v55, %v10619_v57  ;;  %v6530_v3 = vpop.f32.mrb[91].mxu0 }
 0x49d   : > { %7552 = vst [vmem:[%s10634_s22 + $0x50] sm:$0xff] %v7516_v32   ;;  %v6614_v47 = vadd.f32 %v6582_v14, %v6528_v25  ;;  %v6531_v28 = vadd.f32 %v10619_v57, %v6530_v3 }
 0x49e   : > { %v6617_v23 = vadd.f32 %v6585_v54, %v6539_v12  ;;  %v6648_v52 = vmax.f32 %v6616_v39, 0.0 }
 0x49f   : > { %v6615_v56 = vadd.f32 %v6583_v7, %v6531_v28  ;;  %v6646_v48 = vmax.f32 %v6614_v47, 0.0 }
 0x4a0   : > { %v6649_v53 = vmax.f32 %v6617_v23, 0.0 }
 0x4a1   : > { %v6647_v9 = vmax.f32 %v6615_v56, 0.0  ;;  %v8168_v40 = vpop.f32.mrb[92].mxu0 }
 0x4a2   : > { %v7531_v51 = vpack.c.bf16 %v6649_v53, %v6648_v52  ;;  %v6552_v1 = vadd.f32 %v8168_v40, %v10619_v57  ;;  %v6543_v41 = vpop.f32.mrb[93].mxu0 }
 0x4a3   : > { %v7526_v13 = vpack.c.bf16 %v6647_v9, %v6646_v48  ;;  %v6544_v18 = vadd.f32 %v10619_v57, %v6543_v41  ;;  %v8169_v0 = vpop.f32.mrb[94].mxu0 }
 0x4a4   : > { %7555 = vst [vmem:[%s10634_s22 + $0x68] sm:$0xff] %v7531_v51   ;;  %v6620_v31 = vadd.f32 %v6588_v15, %v6552_v1  ;;  %v6555_v6 = vadd.f32 %v8169_v0, %v10619_v57  ;;  %v6546_v21 = vpop.f32.mrb[95].mxu0 }
 0x4a5   : > { %7554 = vst [vmem:[%s10634_s22 + $0x60] sm:$0xff] %v7526_v13   ;;  %v6618_v46 = vadd.f32 %v6586_v8, %v6544_v18  ;;  %v6547_v19 = vadd.f32 %v10619_v57, %v6546_v21 }
 0x4a6   : > { %v6621_v27 = vadd.f32 %v6589_v2, %v6555_v6  ;;  %v6652_v10 = vmax.f32 %v6620_v31, 0.0 }
 0x4a7   : > { %v6619_v50 = vadd.f32 %v6587_v30, %v6547_v19  ;;  %v6650_v49 = vmax.f32 %v6618_v46, 0.0 }
 0x4a8   : > { %v6653_v59 = vmax.f32 %v6621_v27, 0.0 }
 0x4a9   : > { %v6651_v24 = vmax.f32 %v6619_v50, 0.0 }
 0x4aa   : > { %v7541_v44 = vpack.c.bf16 %v6653_v59, %v6652_v10 }
 0x4ab   : > { %v7536_v57 = vpack.c.bf16 %v6651_v24, %v6650_v49 }
 0x4ac   : > { %7557 = vst [vmem:[%s10634_s22 + $0x78] sm:$0xff] %v7541_v44  }
 0x4ad   : > { %7556 = vst [vmem:[%s10634_s22 + $0x70] sm:$0xff] %v7536_v57  }
 0x4ae   : > { %8608 = shalt.err (!%p8605_p3)
}
 0x4af   : > { %s8609_s18 = scalar_lea.hbm %s10693_s13, 2048  ;;  %s8613_s21 = scalar_lea.hbm %s10749_s7, 4096 }
 0x4b0   : > { %p8610_p4 = scmp.ne.s32.totalorder %s10693_s13, %s8609_s18  ;;  %p8614_p9 = scmp.lt.u32.totalorder %s10693_s13, %s10749_s7 }
 0x4b1   : > { %p8615_p10 = scmp.lt.u32.totalorder %s8613_s21, %s8609_s18  ;;  %p8617_p12 = scmp.lt.u32.totalorder %s8609_s18, %s10693_s13 }
 0x4b2   : > { %p8611_p7 = pnand %p8610_p4, %p8741_p5 }
 0x4b3   : > { %p8616_p11 = por %p8615_p10, %p8614_p9 }
 0x4b4   : > { %p8612_p8 = pneg %p8611_p7 }
 0x4b5   : > { %p8618_p13 = por %p8617_p12, %p8616_p11 }
 0x4b7   : > { %p8619_p0 = pnand %p8618_p13, %p8612_p8 }
 0x4b9   : > { %8622 = shalt.err (!%p8619_p0)
}
 0x4ba   : > { %s8661_s8 = smov 64   ;;  %s8662_s9 = smov 4  }
 0x4bb   : > { %8430 = dma.vmem_to_hbm [thread:$0]  (%p8741_p5), %s10695_s29, 2048, %s10693_s13, %s10701_s28, %s8661_s8, %s8661_s8, %s8662_s9  }
 0x4bc PF: > { %p8436_p1 = scmp.ge.s32.totalorder %s8657_s27, 2  ;;  %s6843_s14 = sand.u32 1, %s8645_s24  }
 0x4bd   : > { %s6844_s15 = scalar_lea.sflag [#allocation4], %s6843_s14 }
 0x4be   : > { %p8433_p2 = pnand %p8436_p1, %p8745_p6 }
 0x4c0   : > { %8640 = dma.done.wait (!%p8433_p2), %s6844_s15, 2048  }
 0x4c1   : > { %8642 = vsyncadd (!%p8433_p2), %s6844_s15, 4294965248  ;;  %p17_p3 = scmp.ge.s32.totalorder %s8728_s30, 4   ;;  %s11010_s24 = smov %s8649_s25 }
 0x4c2   : > { %s11011_s25 = smov %s8653_s26  ;;  %s11012_s26 = smov %s8739_s10 }
 0x4c3   : > { %s11013_s27 = smov %s8728_s30  ;;  %19 = sbr.rel (!%p17_p3) target bundleno = 3 (0x3), region = 94 }
 0x4ca   :  { %6849 = vsyncpa [#allocation4], 1 }
 0x4cb   :  { %6851 = vsyncpa [#allocation4 + $0x1], 1 }

</bundles_post_ra>
